<compile_context>
chip_gen: v5e
topology: v5e:2x2
jax: 0.10.0
libtpu: 0.0.40
codegen_flags: <defaults>
</compile_context>

<pallas_src>
import jax
import jax.numpy as jnp
import numpy as np
from jax.experimental import pallas as pl
from jax.experimental.pallas import tpu as pltpu


# ----------------------------------------------------------------------------
# Single fused kernel: bidirectional LSTM recurrence + attention head + MLP.
#
#   gx_ref  : [T, B, 8H]  pre-projected gate inputs, "step-major":
#             at step s, the forward gate slots hold time s and the backward
#             gate slots hold time T-1-s.  Gate columns are interleaved per
#             gate: [i_f, i_b, f_f, f_b, g_f, g_b, o_f, o_b] (each H wide).
#   whh_ref : [2H, 8H]    block-diagonal recurrent weights in the same layout
#             (rows 0:H act on h_fwd, rows H:2H act on h_bwd).
#   out_ref : [B, C]      logits.
#   seq_scr : [T, B, 2H]  VMEM scratch holding the bidirectional output
#             sequence in PyTorch order ([fwd | bwd] on the last dim).
# ----------------------------------------------------------------------------
def bilstm_fused_kernel(gx_ref, whh_ref, wl_ref, bl_ref, wa_ref, ba_ref,
                        w1_ref, b1_ref, w2_ref, b2_ref, w3_ref, b3_ref,
                        out_ref, seq_scr):
    T, B, G = gx_ref.shape
    H2 = G // 4            # 2H: both directions stacked on the lane axis
    H = H2 // 2

    # ---- fused bidirectional recurrence (fully unrolled, T is static) ------
    whh = whh_ref[...]                                    # hoisted, read once
    h = jnp.zeros((B, H2), jnp.float32)                   # [h_fwd | h_bwd]
    c = jnp.zeros((B, H2), jnp.float32)
    for s in range(T):
        if s == 0:
            gates = gx_ref[0]                             # h == 0 at step 0
        else:
            gates = gx_ref[s] + jnp.dot(h, whh,
                                        preferred_element_type=jnp.float32)
        i = jax.nn.sigmoid(gates[:, 0 * H2:1 * H2])       # both directions
        f = jax.nn.sigmoid(gates[:, 1 * H2:2 * H2])
        g = jnp.tanh(gates[:, 2 * H2:3 * H2])
        o = jax.nn.sigmoid(gates[:, 3 * H2:4 * H2])
        c = f * c + i * g
        h = o * jnp.tanh(c)
        # forward output belongs to time s, backward output to time T-1-s
        seq_scr[s, :, 0:H] = h[:, 0:H]
        seq_scr[T - 1 - s, :, H:H2] = h[:, H:H2]

    # ---- head: tanh(Linear) + softmax over T (online) + weighted sum -------
    wl = wl_ref[...]
    bl = bl_ref[...]
    wa = wa_ref[...]
    ba = ba_ref[...]
    m = jnp.full((B, 1), -jnp.inf, jnp.float32)
    l = jnp.zeros((B, 1), jnp.float32)
    acc = jnp.zeros((B, H2), jnp.float32)
    for t in range(T):
        y_t = jnp.tanh(jnp.dot(seq_scr[t], wl,
                               preferred_element_type=jnp.float32) + bl)
        s_t = jnp.sum(y_t * wa, axis=-1, keepdims=True) + ba       # [B, 1]
        m_new = jnp.maximum(m, s_t)
        corr = jnp.exp(m - m_new)
        p_t = jnp.exp(s_t - m_new)
        l = corr * l + p_t
        acc = corr * acc + p_t * y_t
        m = m_new
    ctx = acc / l                                                   # [B, 2H]

    # ---- classifier MLP: 2H -> 192 -> 84 -> C with ReLU --------------------
    z = jnp.maximum(jnp.dot(ctx, w1_ref[...],
                            preferred_element_type=jnp.float32) + b1_ref[...],
                    0.0)
    z = jnp.maximum(jnp.dot(z, w2_ref[...],
                            preferred_element_type=jnp.float32) + b2_ref[...],
                    0.0)
    out_ref[...] = jnp.dot(z, w3_ref[...],
                           preferred_element_type=jnp.float32) + b3_ref[...]


# ----------------------------------------------------------------------------
# Wrapper: one-time weight prep + embedding-folded input projection (plain
# JAX glue), then a single pallas_call for the whole network.
# ----------------------------------------------------------------------------
def _interleave_gates(a_f, a_b, H):
    """Interleave per-gate blocks: [..., 4H] fwd + [..., 4H] bwd ->
    [..., 8H] ordered (i_f, i_b, f_f, f_b, g_f, g_b, o_f, o_b)."""
    parts = []
    for k in range(4):
        parts.append(a_f[..., k * H:(k + 1) * H])
        parts.append(a_b[..., k * H:(k + 1) * H])
    return jnp.concatenate(parts, axis=-1)


def bilstm_net_forward(tokens_tb, embedding, p):
    H = p["w_hh_f"].shape[0]
    T, B = tokens_tb.shape
    H2 = 2 * H
    C = p["w3"].shape[1]

    # Fold the input projection (both directions, biases included) into the
    # embedding table: one [V,E]x[E,8H] matmul + a gather replaces 2*T
    # per-step input matmuls on the recurrent critical path.
    w_ih = _interleave_gates(p["w_ih_f"], p["w_ih_b"], H)            # [E, 8H]
    b_ih = _interleave_gates(p["b_f"], p["b_b"], H)                  # [1, 8H]
    proj_table = embedding @ w_ih + b_ih                             # [V, 8H]
    gx_nat = proj_table[tokens_tb]                                   # [T, B, 8H]

    # Step-major gate inputs: at fused step s the forward chain consumes
    # time s, the backward chain consumes time T-1-s.
    fwd_mask = _interleave_gates(jnp.ones((4 * H,), bool),
                                 jnp.zeros((4 * H,), bool), H)       # [8H]
    gx_step = jnp.where(fwd_mask, gx_nat, gx_nat[::-1])              # [T, B, 8H]

    # Block-diagonal recurrent weights so both directions share ONE
    # [B,2H]x[2H,8H] MXU op per step (N=256 matches the v6e/v7x MXU tile).
    zpad = jnp.zeros((H, 4 * H), embedding.dtype)
    whh_blk = _interleave_gates(
        jnp.concatenate([p["w_hh_f"], zpad], axis=0),
        jnp.concatenate([zpad, p["w_hh_b"]], axis=0), H)             # [2H, 8H]

    vmem = pl.BlockSpec(memory_space=pltpu.MemorySpace.VMEM)
    # TODO(synk): add BlockSpec tiling over T/B (and vmem_limit_bytes) before
    # scaling shapes up; whole-array VMEM residency is only OK at this size.
    return pl.pallas_call(
        bilstm_fused_kernel,
        out_shape=jax.ShapeDtypeStruct((B, C), jnp.float32),
        in_specs=[vmem] * 12,
        out_specs=vmem,
        scratch_shapes=[pltpu.VMEM((T, B, H2), jnp.float32)],
    )(gx_step, whh_blk, p["w_lin"], p["b_lin"], p["w_attn"], p["b_attn"],
      p["w1"], p["b1"], p["w2"], p["b2"], p["w3"], p["b3"])


# ----------------------------------------------------------------------------
# Pure-JAX reference (mirrors the PyTorch forward) for a correctness check.
# ----------------------------------------------------------------------------
def reference_forward(tokens_tb, embedding, p):
    H = p["w_hh_f"].shape[0]
    embed = embedding[tokens_tb]                                     # [T, B, E]

    def lstm_dir(x_seq, w_ih, w_hh, b):
        T, B, _ = x_seq.shape
        h = jnp.zeros((B, H), jnp.float32)
        c = jnp.zeros((B, H), jnp.float32)
        outs = []
        for t in range(T):
            gates = x_seq[t] @ w_ih + h @ w_hh + b
            i = jax.nn.sigmoid(gates[:, 0 * H:1 * H])
            f = jax.nn.sigmoid(gates[:, 1 * H:2 * H])
            g = jnp.tanh(gates[:, 2 * H:3 * H])
            o = jax.nn.sigmoid(gates[:, 3 * H:4 * H])
            c = f * c + i * g
            h = o * jnp.tanh(c)
            outs.append(h)
        return jnp.stack(outs, axis=0)                               # [T, B, H]

    out_f = lstm_dir(embed, p["w_ih_f"], p["w_hh_f"], p["b_f"])
    out_b = lstm_dir(embed[::-1], p["w_ih_b"], p["w_hh_b"], p["b_b"])[::-1]
    seq = jnp.concatenate([out_f, out_b], axis=-1)                   # [T, B, 2H]
    seq_bt = jnp.transpose(seq, (1, 0, 2))                           # [B, T, 2H]
    y = jnp.tanh(seq_bt @ p["w_lin"] + p["b_lin"])                   # [B, T, 2H]
    scores = jnp.sum(y * p["w_attn"][0], axis=-1) + p["b_attn"][0, 0]  # [B, T]
    alpha = jax.nn.softmax(scores, axis=-1)
    ctx = jnp.einsum("bt,btd->bd", alpha, y)                         # [B, 2H]
    z = jax.nn.relu(ctx @ p["w1"] + p["b1"])
    z = jax.nn.relu(z @ p["w2"] + p["b2"])
    return z @ p["w3"] + p["b3"]


if __name__ == "__main__":
    jax.config.update("jax_default_matmul_precision", "highest")

    V, E, H, T, B, C = 50, 16, 32, 8, 2, 5

    key = jax.random.PRNGKey(0)
    ks = jax.random.split(key, 17)

    def init(k, shape, scale=0.1):
        return jax.random.normal(k, shape, dtype=jnp.float32) * scale

    # Weights stored pre-transposed for y = x @ W + b (PyTorch stores W^T);
    # biases are b_ih + b_hh folded together, PyTorch gate order (i, f, g, o).
    embedding = init(ks[0], (V, E), 0.5)
    params = dict(
        w_ih_f=init(ks[1], (E, 4 * H)), w_hh_f=init(ks[2], (H, 4 * H)),
        b_f=init(ks[3], (1, 4 * H)),
        w_ih_b=init(ks[4], (E, 4 * H)), w_hh_b=init(ks[5], (H, 4 * H)),
        b_b=init(ks[6], (1, 4 * H)),
        w_lin=init(ks[7], (2 * H, 2 * H)), b_lin=init(ks[8], (1, 2 * H)),
        w_attn=init(ks[9], (1, 2 * H)), b_attn=init(ks[10], (1, 1)),
        w1=init(ks[11], (2 * H, 192)), b1=init(ks[12], (1, 192)),
        w2=init(ks[13], (192, 84)), b2=init(ks[14], (1, 84)),
        w3=init(ks[15], (84, C)), b3=init(ks[16], (1, C)),
    )

    tokens = jax.random.randint(jax.random.PRNGKey(42), (T, B), 0, V,
                                dtype=jnp.int32)

    logits = jax.block_until_ready(
        jax.jit(bilstm_net_forward)(tokens, embedding, params))
    ref = jax.block_until_ready(
        jax.jit(reference_forward)(tokens, embedding, params))

    assert logits.shape == (B, C)
    assert bool(jnp.all(jnp.isfinite(logits)))
    np.testing.assert_allclose(np.asarray(logits), np.asarray(ref),
                               rtol=2e-2, atol=2e-2)
    print("KERNEL_OK")
</pallas_src>

<mosaic_0001>
module attributes {stable_mosaic.version = 11 : i64} {
  func.func @bilstm_fused_kernel(%arg0: memref<8x2x256xf32, #tpu.memory_space<vmem>>, %arg1: memref<64x256xf32, #tpu.memory_space<vmem>>, %arg2: memref<64x64xf32, #tpu.memory_space<vmem>>, %arg3: memref<1x64xf32, #tpu.memory_space<vmem>>, %arg4: memref<1x64xf32, #tpu.memory_space<vmem>>, %arg5: memref<1x1xf32, #tpu.memory_space<vmem>>, %arg6: memref<64x192xf32, #tpu.memory_space<vmem>>, %arg7: memref<1x192xf32, #tpu.memory_space<vmem>>, %arg8: memref<192x84xf32, #tpu.memory_space<vmem>>, %arg9: memref<1x84xf32, #tpu.memory_space<vmem>>, %arg10: memref<84x5xf32, #tpu.memory_space<vmem>>, %arg11: memref<1x5xf32, #tpu.memory_space<vmem>>, %arg12: memref<2x5xf32, #tpu.memory_space<vmem>>, %arg13: memref<8x2x64xf32, #tpu.memory_space<vmem>>) attributes {dimension_semantics = [], scalar_prefetch = 0 : i64, scratch_operands = 1 : i64, tpu.core_type = #tpu.core_type<tc>} {
    %c0 = arith.constant 0 : index
    %c0_0 = arith.constant 0 : index
    %0 = vector.load %arg1[%c0, %c0_0] : memref<64x256xf32, #tpu.memory_space<vmem>>, vector<64x256xf32>
    %cst = arith.constant 0.000000e+00 : f32
    %1 = vector.broadcast %cst : f32 to vector<2x64xf32>
    %c0_1 = arith.constant 0 : index
    %c0_2 = arith.constant 0 : index
    %c0_3 = arith.constant 0 : index
    %2 = vector.load %arg0[%c0_1, %c0_2, %c0_3] : memref<8x2x256xf32, #tpu.memory_space<vmem>>, vector<1x2x256xf32>
    %3 = vector.shape_cast %2 : vector<1x2x256xf32> to vector<2x256xf32>
    %4 = vector.extract_strided_slice %3 {offsets = [0, 0], sizes = [2, 64], strides = [1, 1]} : vector<2x256xf32> to vector<2x64xf32>
    %5 = arith.negf %4 : vector<2x64xf32>
    %6 = math.exp %5 : vector<2x64xf32>
    %cst_4 = arith.constant 1.000000e+00 : f32
    %7 = vector.broadcast %cst_4 : f32 to vector<2x64xf32>
    %8 = arith.addf %7, %6 : vector<2x64xf32>
    %9 = arith.divf %7, %8 : vector<2x64xf32>
    %10 = vector.extract_strided_slice %3 {offsets = [0, 64], sizes = [2, 64], strides = [1, 1]} : vector<2x256xf32> to vector<2x64xf32>
    %11 = arith.negf %10 : vector<2x64xf32>
    %12 = math.exp %11 : vector<2x64xf32>
    %cst_5 = arith.constant 1.000000e+00 : f32
    %13 = vector.broadcast %cst_5 : f32 to vector<2x64xf32>
    %14 = arith.addf %13, %12 : vector<2x64xf32>
    %15 = arith.divf %13, %14 : vector<2x64xf32>
    %16 = vector.extract_strided_slice %3 {offsets = [0, 128], sizes = [2, 64], strides = [1, 1]} : vector<2x256xf32> to vector<2x64xf32>
    %17 = math.tanh %16 : vector<2x64xf32>
    %18 = vector.extract_strided_slice %3 {offsets = [0, 192], sizes = [2, 64], strides = [1, 1]} : vector<2x256xf32> to vector<2x64xf32>
    %19 = arith.negf %18 : vector<2x64xf32>
    %20 = math.exp %19 : vector<2x64xf32>
    %cst_6 = arith.constant 1.000000e+00 : f32
    %21 = vector.broadcast %cst_6 : f32 to vector<2x64xf32>
    %22 = arith.addf %21, %20 : vector<2x64xf32>
    %23 = arith.divf %21, %22 : vector<2x64xf32>
    %24 = arith.mulf %15, %1 : vector<2x64xf32>
    %25 = arith.mulf %9, %17 : vector<2x64xf32>
    %26 = arith.addf %24, %25 : vector<2x64xf32>
    %27 = math.tanh %26 : vector<2x64xf32>
    %28 = arith.mulf %23, %27 : vector<2x64xf32>
    %29 = vector.extract_strided_slice %28 {offsets = [0, 0], sizes = [2, 32], strides = [1, 1]} : vector<2x64xf32> to vector<2x32xf32>
    %c0_7 = arith.constant 0 : index
    %c0_8 = arith.constant 0 : index
    %c0_9 = arith.constant 0 : index
    %30 = vector.load %arg13[%c0_7, %c0_8, %c0_9] : memref<8x2x64xf32, #tpu.memory_space<vmem>>, vector<1x2x32xf32>
    %31 = vector.shape_cast %30 : vector<1x2x32xf32> to vector<2x32xf32>
    %32 = vector.shape_cast %29 : vector<2x32xf32> to vector<1x2x32xf32>
    tpu.vector_store %arg13[%c0_7, %c0_8, %c0_9], %32 {strides = array<i32>} : memref<8x2x64xf32, #tpu.memory_space<vmem>>, vector<1x2x32xf32>,
    %33 = vector.extract_strided_slice %28 {offsets = [0, 32], sizes = [2, 32], strides = [1, 1]} : vector<2x64xf32> to vector<2x32xf32>
    %c7 = arith.constant 7 : index
    %c0_10 = arith.constant 0 : index
    %c32 = arith.constant 32 : index
    %34 = vector.load %arg13[%c7, %c0_10, %c32] : memref<8x2x64xf32, #tpu.memory_space<vmem>>, vector<1x2x32xf32>
    %35 = vector.shape_cast %34 : vector<1x2x32xf32> to vector<2x32xf32>
    %36 = vector.shape_cast %33 : vector<2x32xf32> to vector<1x2x32xf32>
    tpu.vector_store %arg13[%c7, %c0_10, %c32], %36 {strides = array<i32>} : memref<8x2x64xf32, #tpu.memory_space<vmem>>, vector<1x2x32xf32>,
    %c1 = arith.constant 1 : index
    %c0_11 = arith.constant 0 : index
    %c0_12 = arith.constant 0 : index
    %37 = vector.load %arg0[%c1, %c0_11, %c0_12] : memref<8x2x256xf32, #tpu.memory_space<vmem>>, vector<1x2x256xf32>
    %38 = vector.shape_cast %37 : vector<1x2x256xf32> to vector<2x256xf32>
    %cst_13 = arith.constant dense<0.000000e+00> : vector<2x256xf32>
    %39 = tpu.matmul %28, %0, %cst_13 {dimension_numbers = #tpu.dot_dimension_numbers<[1], [0], [0], [1], [0, 0, 1, 1], [], []>, precision = #tpu.contract_precision<fp32>} : vector<2x64xf32>, vector<64x256xf32>, vector<2x256xf32> -> vector<2x256xf32>
    %40 = arith.addf %38, %39 : vector<2x256xf32>
    %41 = vector.extract_strided_slice %40 {offsets = [0, 0], sizes = [2, 64], strides = [1, 1]} : vector<2x256xf32> to vector<2x64xf32>
    %42 = arith.negf %41 : vector<2x64xf32>
    %43 = math.exp %42 : vector<2x64xf32>
    %cst_14 = arith.constant 1.000000e+00 : f32
    %44 = vector.broadcast %cst_14 : f32 to vector<2x64xf32>
    %45 = arith.addf %44, %43 : vector<2x64xf32>
    %46 = arith.divf %44, %45 : vector<2x64xf32>
    %47 = vector.extract_strided_slice %40 {offsets = [0, 64], sizes = [2, 64], strides = [1, 1]} : vector<2x256xf32> to vector<2x64xf32>
    %48 = arith.negf %47 : vector<2x64xf32>
    %49 = math.exp %48 : vector<2x64xf32>
    %cst_15 = arith.constant 1.000000e+00 : f32
    %50 = vector.broadcast %cst_15 : f32 to vector<2x64xf32>
    %51 = arith.addf %50, %49 : vector<2x64xf32>
    %52 = arith.divf %50, %51 : vector<2x64xf32>
    %53 = vector.extract_strided_slice %40 {offsets = [0, 128], sizes = [2, 64], strides = [1, 1]} : vector<2x256xf32> to vector<2x64xf32>
    %54 = math.tanh %53 : vector<2x64xf32>
    %55 = vector.extract_strided_slice %40 {offsets = [0, 192], sizes = [2, 64], strides = [1, 1]} : vector<2x256xf32> to vector<2x64xf32>
    %56 = arith.negf %55 : vector<2x64xf32>
    %57 = math.exp %56 : vector<2x64xf32>
    %cst_16 = arith.constant 1.000000e+00 : f32
    %58 = vector.broadcast %cst_16 : f32 to vector<2x64xf32>
    %59 = arith.addf %58, %57 : vector<2x64xf32>
    %60 = arith.divf %58, %59 : vector<2x64xf32>
    %61 = arith.mulf %52, %26 : vector<2x64xf32>
    %62 = arith.mulf %46, %54 : vector<2x64xf32>
    %63 = arith.addf %61, %62 : vector<2x64xf32>
    %64 = math.tanh %63 : vector<2x64xf32>
    %65 = arith.mulf %60, %64 : vector<2x64xf32>
    %66 = vector.extract_strided_slice %65 {offsets = [0, 0], sizes = [2, 32], strides = [1, 1]} : vector<2x64xf32> to vector<2x32xf32>
    %c1_17 = arith.constant 1 : index
    %c0_18 = arith.constant 0 : index
    %c0_19 = arith.constant 0 : index
    %67 = vector.load %arg13[%c1_17, %c0_18, %c0_19] : memref<8x2x64xf32, #tpu.memory_space<vmem>>, vector<1x2x32xf32>
    %68 = vector.shape_cast %67 : vector<1x2x32xf32> to vector<2x32xf32>
    %69 = vector.shape_cast %66 : vector<2x32xf32> to vector<1x2x32xf32>
    tpu.vector_store %arg13[%c1_17, %c0_18, %c0_19], %69 {strides = array<i32>} : memref<8x2x64xf32, #tpu.memory_space<vmem>>, vector<1x2x32xf32>,
    %70 = vector.extract_strided_slice %65 {offsets = [0, 32], sizes = [2, 32], strides = [1, 1]} : vector<2x64xf32> to vector<2x32xf32>
    %c6 = arith.constant 6 : index
    %c0_20 = arith.constant 0 : index
    %c32_21 = arith.constant 32 : index
    %71 = vector.load %arg13[%c6, %c0_20, %c32_21] : memref<8x2x64xf32, #tpu.memory_space<vmem>>, vector<1x2x32xf32>
    %72 = vector.shape_cast %71 : vector<1x2x32xf32> to vector<2x32xf32>
    %73 = vector.shape_cast %70 : vector<2x32xf32> to vector<1x2x32xf32>
    tpu.vector_store %arg13[%c6, %c0_20, %c32_21], %73 {strides = array<i32>} : memref<8x2x64xf32, #tpu.memory_space<vmem>>, vector<1x2x32xf32>,
    %c2 = arith.constant 2 : index
    %c0_22 = arith.constant 0 : index
    %c0_23 = arith.constant 0 : index
    %74 = vector.load %arg0[%c2, %c0_22, %c0_23] : memref<8x2x256xf32, #tpu.memory_space<vmem>>, vector<1x2x256xf32>
    %75 = vector.shape_cast %74 : vector<1x2x256xf32> to vector<2x256xf32>
    %cst_24 = arith.constant dense<0.000000e+00> : vector<2x256xf32>
    %76 = tpu.matmul %65, %0, %cst_24 {dimension_numbers = #tpu.dot_dimension_numbers<[1], [0], [0], [1], [0, 0, 1, 1], [], []>, precision = #tpu.contract_precision<fp32>} : vector<2x64xf32>, vector<64x256xf32>, vector<2x256xf32> -> vector<2x256xf32>
    %77 = arith.addf %75, %76 : vector<2x256xf32>
    %78 = vector.extract_strided_slice %77 {offsets = [0, 0], sizes = [2, 64], strides = [1, 1]} : vector<2x256xf32> to vector<2x64xf32>
    %79 = arith.negf %78 : vector<2x64xf32>
    %80 = math.exp %79 : vector<2x64xf32>
    %cst_25 = arith.constant 1.000000e+00 : f32
    %81 = vector.broadcast %cst_25 : f32 to vector<2x64xf32>
    %82 = arith.addf %81, %80 : vector<2x64xf32>
    %83 = arith.divf %81, %82 : vector<2x64xf32>
    %84 = vector.extract_strided_slice %77 {offsets = [0, 64], sizes = [2, 64], strides = [1, 1]} : vector<2x256xf32> to vector<2x64xf32>
    %85 = arith.negf %84 : vector<2x64xf32>
    %86 = math.exp %85 : vector<2x64xf32>
    %cst_26 = arith.constant 1.000000e+00 : f32
    %87 = vector.broadcast %cst_26 : f32 to vector<2x64xf32>
    %88 = arith.addf %87, %86 : vector<2x64xf32>
    %89 = arith.divf %87, %88 : vector<2x64xf32>
    %90 = vector.extract_strided_slice %77 {offsets = [0, 128], sizes = [2, 64], strides = [1, 1]} : vector<2x256xf32> to vector<2x64xf32>
    %91 = math.tanh %90 : vector<2x64xf32>
    %92 = vector.extract_strided_slice %77 {offsets = [0, 192], sizes = [2, 64], strides = [1, 1]} : vector<2x256xf32> to vector<2x64xf32>
    %93 = arith.negf %92 : vector<2x64xf32>
    %94 = math.exp %93 : vector<2x64xf32>
    %cst_27 = arith.constant 1.000000e+00 : f32
    %95 = vector.broadcast %cst_27 : f32 to vector<2x64xf32>
    %96 = arith.addf %95, %94 : vector<2x64xf32>
    %97 = arith.divf %95, %96 : vector<2x64xf32>
    %98 = arith.mulf %89, %63 : vector<2x64xf32>
    %99 = arith.mulf %83, %91 : vector<2x64xf32>
    %100 = arith.addf %98, %99 : vector<2x64xf32>
    %101 = math.tanh %100 : vector<2x64xf32>
    %102 = arith.mulf %97, %101 : vector<2x64xf32>
    %103 = vector.extract_strided_slice %102 {offsets = [0, 0], sizes = [2, 32], strides = [1, 1]} : vector<2x64xf32> to vector<2x32xf32>
    %c2_28 = arith.constant 2 : index
    %c0_29 = arith.constant 0 : index
    %c0_30 = arith.constant 0 : index
    %104 = vector.load %arg13[%c2_28, %c0_29, %c0_30] : memref<8x2x64xf32, #tpu.memory_space<vmem>>, vector<1x2x32xf32>
    %105 = vector.shape_cast %104 : vector<1x2x32xf32> to vector<2x32xf32>
    %106 = vector.shape_cast %103 : vector<2x32xf32> to vector<1x2x32xf32>
    tpu.vector_store %arg13[%c2_28, %c0_29, %c0_30], %106 {strides = array<i32>} : memref<8x2x64xf32, #tpu.memory_space<vmem>>, vector<1x2x32xf32>,
    %107 = vector.extract_strided_slice %102 {offsets = [0, 32], sizes = [2, 32], strides = [1, 1]} : vector<2x64xf32> to vector<2x32xf32>
    %c5 = arith.constant 5 : index
    %c0_31 = arith.constant 0 : index
    %c32_32 = arith.constant 32 : index
    %108 = vector.load %arg13[%c5, %c0_31, %c32_32] : memref<8x2x64xf32, #tpu.memory_space<vmem>>, vector<1x2x32xf32>
    %109 = vector.shape_cast %108 : vector<1x2x32xf32> to vector<2x32xf32>
    %110 = vector.shape_cast %107 : vector<2x32xf32> to vector<1x2x32xf32>
    tpu.vector_store %arg13[%c5, %c0_31, %c32_32], %110 {strides = array<i32>} : memref<8x2x64xf32, #tpu.memory_space<vmem>>, vector<1x2x32xf32>,
    %c3 = arith.constant 3 : index
    %c0_33 = arith.constant 0 : index
    %c0_34 = arith.constant 0 : index
    %111 = vector.load %arg0[%c3, %c0_33, %c0_34] : memref<8x2x256xf32, #tpu.memory_space<vmem>>, vector<1x2x256xf32>
    %112 = vector.shape_cast %111 : vector<1x2x256xf32> to vector<2x256xf32>
    %cst_35 = arith.constant dense<0.000000e+00> : vector<2x256xf32>
    %113 = tpu.matmul %102, %0, %cst_35 {dimension_numbers = #tpu.dot_dimension_numbers<[1], [0], [0], [1], [0, 0, 1, 1], [], []>, precision = #tpu.contract_precision<fp32>} : vector<2x64xf32>, vector<64x256xf32>, vector<2x256xf32> -> vector<2x256xf32>
    %114 = arith.addf %112, %113 : vector<2x256xf32>
    %115 = vector.extract_strided_slice %114 {offsets = [0, 0], sizes = [2, 64], strides = [1, 1]} : vector<2x256xf32> to vector<2x64xf32>
    %116 = arith.negf %115 : vector<2x64xf32>
    %117 = math.exp %116 : vector<2x64xf32>
    %cst_36 = arith.constant 1.000000e+00 : f32
    %118 = vector.broadcast %cst_36 : f32 to vector<2x64xf32>
    %119 = arith.addf %118, %117 : vector<2x64xf32>
    %120 = arith.divf %118, %119 : vector<2x64xf32>
    %121 = vector.extract_strided_slice %114 {offsets = [0, 64], sizes = [2, 64], strides = [1, 1]} : vector<2x256xf32> to vector<2x64xf32>
    %122 = arith.negf %121 : vector<2x64xf32>
    %123 = math.exp %122 : vector<2x64xf32>
    %cst_37 = arith.constant 1.000000e+00 : f32
    %124 = vector.broadcast %cst_37 : f32 to vector<2x64xf32>
    %125 = arith.addf %124, %123 : vector<2x64xf32>
    %126 = arith.divf %124, %125 : vector<2x64xf32>
    %127 = vector.extract_strided_slice %114 {offsets = [0, 128], sizes = [2, 64], strides = [1, 1]} : vector<2x256xf32> to vector<2x64xf32>
    %128 = math.tanh %127 : vector<2x64xf32>
    %129 = vector.extract_strided_slice %114 {offsets = [0, 192], sizes = [2, 64], strides = [1, 1]} : vector<2x256xf32> to vector<2x64xf32>
    %130 = arith.negf %129 : vector<2x64xf32>
    %131 = math.exp %130 : vector<2x64xf32>
    %cst_38 = arith.constant 1.000000e+00 : f32
    %132 = vector.broadcast %cst_38 : f32 to vector<2x64xf32>
    %133 = arith.addf %132, %131 : vector<2x64xf32>
    %134 = arith.divf %132, %133 : vector<2x64xf32>
    %135 = arith.mulf %126, %100 : vector<2x64xf32>
    %136 = arith.mulf %120, %128 : vector<2x64xf32>
    %137 = arith.addf %135, %136 : vector<2x64xf32>
    %138 = math.tanh %137 : vector<2x64xf32>
    %139 = arith.mulf %134, %138 : vector<2x64xf32>
    %140 = vector.extract_strided_slice %139 {offsets = [0, 0], sizes = [2, 32], strides = [1, 1]} : vector<2x64xf32> to vector<2x32xf32>
    %c3_39 = arith.constant 3 : index
    %c0_40 = arith.constant 0 : index
    %c0_41 = arith.constant 0 : index
    %141 = vector.load %arg13[%c3_39, %c0_40, %c0_41] : memref<8x2x64xf32, #tpu.memory_space<vmem>>, vector<1x2x32xf32>
    %142 = vector.shape_cast %141 : vector<1x2x32xf32> to vector<2x32xf32>
    %143 = vector.shape_cast %140 : vector<2x32xf32> to vector<1x2x32xf32>
    tpu.vector_store %arg13[%c3_39, %c0_40, %c0_41], %143 {strides = array<i32>} : memref<8x2x64xf32, #tpu.memory_space<vmem>>, vector<1x2x32xf32>,
    %144 = vector.extract_strided_slice %139 {offsets = [0, 32], sizes = [2, 32], strides = [1, 1]} : vector<2x64xf32> to vector<2x32xf32>
    %c4 = arith.constant 4 : index
    %c0_42 = arith.constant 0 : index
    %c32_43 = arith.constant 32 : index
    %145 = vector.load %arg13[%c4, %c0_42, %c32_43] : memref<8x2x64xf32, #tpu.memory_space<vmem>>, vector<1x2x32xf32>
    %146 = vector.shape_cast %145 : vector<1x2x32xf32> to vector<2x32xf32>
    %147 = vector.shape_cast %144 : vector<2x32xf32> to vector<1x2x32xf32>
    tpu.vector_store %arg13[%c4, %c0_42, %c32_43], %147 {strides = array<i32>} : memref<8x2x64xf32, #tpu.memory_space<vmem>>, vector<1x2x32xf32>,
    %c4_44 = arith.constant 4 : index
    %c0_45 = arith.constant 0 : index
    %c0_46 = arith.constant 0 : index
    %148 = vector.load %arg0[%c4_44, %c0_45, %c0_46] : memref<8x2x256xf32, #tpu.memory_space<vmem>>, vector<1x2x256xf32>
    %149 = vector.shape_cast %148 : vector<1x2x256xf32> to vector<2x256xf32>
    %cst_47 = arith.constant dense<0.000000e+00> : vector<2x256xf32>
    %150 = tpu.matmul %139, %0, %cst_47 {dimension_numbers = #tpu.dot_dimension_numbers<[1], [0], [0], [1], [0, 0, 1, 1], [], []>, precision = #tpu.contract_precision<fp32>} : vector<2x64xf32>, vector<64x256xf32>, vector<2x256xf32> -> vector<2x256xf32>
    %151 = arith.addf %149, %150 : vector<2x256xf32>
    %152 = vector.extract_strided_slice %151 {offsets = [0, 0], sizes = [2, 64], strides = [1, 1]} : vector<2x256xf32> to vector<2x64xf32>
    %153 = arith.negf %152 : vector<2x64xf32>
    %154 = math.exp %153 : vector<2x64xf32>
    %cst_48 = arith.constant 1.000000e+00 : f32
    %155 = vector.broadcast %cst_48 : f32 to vector<2x64xf32>
    %156 = arith.addf %155, %154 : vector<2x64xf32>
    %157 = arith.divf %155, %156 : vector<2x64xf32>
    %158 = vector.extract_strided_slice %151 {offsets = [0, 64], sizes = [2, 64], strides = [1, 1]} : vector<2x256xf32> to vector<2x64xf32>
    %159 = arith.negf %158 : vector<2x64xf32>
    %160 = math.exp %159 : vector<2x64xf32>
    %cst_49 = arith.constant 1.000000e+00 : f32
    %161 = vector.broadcast %cst_49 : f32 to vector<2x64xf32>
    %162 = arith.addf %161, %160 : vector<2x64xf32>
    %163 = arith.divf %161, %162 : vector<2x64xf32>
    %164 = vector.extract_strided_slice %151 {offsets = [0, 128], sizes = [2, 64], strides = [1, 1]} : vector<2x256xf32> to vector<2x64xf32>
    %165 = math.tanh %164 : vector<2x64xf32>
    %166 = vector.extract_strided_slice %151 {offsets = [0, 192], sizes = [2, 64], strides = [1, 1]} : vector<2x256xf32> to vector<2x64xf32>
    %167 = arith.negf %166 : vector<2x64xf32>
    %168 = math.exp %167 : vector<2x64xf32>
    %cst_50 = arith.constant 1.000000e+00 : f32
    %169 = vector.broadcast %cst_50 : f32 to vector<2x64xf32>
    %170 = arith.addf %169, %168 : vector<2x64xf32>
    %171 = arith.divf %169, %170 : vector<2x64xf32>
    %172 = arith.mulf %163, %137 : vector<2x64xf32>
    %173 = arith.mulf %157, %165 : vector<2x64xf32>
    %174 = arith.addf %172, %173 : vector<2x64xf32>
    %175 = math.tanh %174 : vector<2x64xf32>
    %176 = arith.mulf %171, %175 : vector<2x64xf32>
    %177 = vector.extract_strided_slice %176 {offsets = [0, 0], sizes = [2, 32], strides = [1, 1]} : vector<2x64xf32> to vector<2x32xf32>
    %c4_51 = arith.constant 4 : index
    %c0_52 = arith.constant 0 : index
    %c0_53 = arith.constant 0 : index
    %178 = vector.load %arg13[%c4_51, %c0_52, %c0_53] : memref<8x2x64xf32, #tpu.memory_space<vmem>>, vector<1x2x32xf32>
    %179 = vector.shape_cast %178 : vector<1x2x32xf32> to vector<2x32xf32>
    %180 = vector.shape_cast %177 : vector<2x32xf32> to vector<1x2x32xf32>
    tpu.vector_store %arg13[%c4_51, %c0_52, %c0_53], %180 {strides = array<i32>} : memref<8x2x64xf32, #tpu.memory_space<vmem>>, vector<1x2x32xf32>,
    %181 = vector.extract_strided_slice %176 {offsets = [0, 32], sizes = [2, 32], strides = [1, 1]} : vector<2x64xf32> to vector<2x32xf32>
    %c3_54 = arith.constant 3 : index
    %c0_55 = arith.constant 0 : index
    %c32_56 = arith.constant 32 : index
    %182 = vector.load %arg13[%c3_54, %c0_55, %c32_56] : memref<8x2x64xf32, #tpu.memory_space<vmem>>, vector<1x2x32xf32>
    %183 = vector.shape_cast %182 : vector<1x2x32xf32> to vector<2x32xf32>
    %184 = vector.shape_cast %181 : vector<2x32xf32> to vector<1x2x32xf32>
    tpu.vector_store %arg13[%c3_54, %c0_55, %c32_56], %184 {strides = array<i32>} : memref<8x2x64xf32, #tpu.memory_space<vmem>>, vector<1x2x32xf32>,
    %c5_57 = arith.constant 5 : index
    %c0_58 = arith.constant 0 : index
    %c0_59 = arith.constant 0 : index
    %185 = vector.load %arg0[%c5_57, %c0_58, %c0_59] : memref<8x2x256xf32, #tpu.memory_space<vmem>>, vector<1x2x256xf32>
    %186 = vector.shape_cast %185 : vector<1x2x256xf32> to vector<2x256xf32>
    %cst_60 = arith.constant dense<0.000000e+00> : vector<2x256xf32>
    %187 = tpu.matmul %176, %0, %cst_60 {dimension_numbers = #tpu.dot_dimension_numbers<[1], [0], [0], [1], [0, 0, 1, 1], [], []>, precision = #tpu.contract_precision<fp32>} : vector<2x64xf32>, vector<64x256xf32>, vector<2x256xf32> -> vector<2x256xf32>
    %188 = arith.addf %186, %187 : vector<2x256xf32>
    %189 = vector.extract_strided_slice %188 {offsets = [0, 0], sizes = [2, 64], strides = [1, 1]} : vector<2x256xf32> to vector<2x64xf32>
    %190 = arith.negf %189 : vector<2x64xf32>
    %191 = math.exp %190 : vector<2x64xf32>
    %cst_61 = arith.constant 1.000000e+00 : f32
    %192 = vector.broadcast %cst_61 : f32 to vector<2x64xf32>
    %193 = arith.addf %192, %191 : vector<2x64xf32>
    %194 = arith.divf %192, %193 : vector<2x64xf32>
    %195 = vector.extract_strided_slice %188 {offsets = [0, 64], sizes = [2, 64], strides = [1, 1]} : vector<2x256xf32> to vector<2x64xf32>
    %196 = arith.negf %195 : vector<2x64xf32>
    %197 = math.exp %196 : vector<2x64xf32>
    %cst_62 = arith.constant 1.000000e+00 : f32
    %198 = vector.broadcast %cst_62 : f32 to vector<2x64xf32>
    %199 = arith.addf %198, %197 : vector<2x64xf32>
    %200 = arith.divf %198, %199 : vector<2x64xf32>
    %201 = vector.extract_strided_slice %188 {offsets = [0, 128], sizes = [2, 64], strides = [1, 1]} : vector<2x256xf32> to vector<2x64xf32>
    %202 = math.tanh %201 : vector<2x64xf32>
    %203 = vector.extract_strided_slice %188 {offsets = [0, 192], sizes = [2, 64], strides = [1, 1]} : vector<2x256xf32> to vector<2x64xf32>
    %204 = arith.negf %203 : vector<2x64xf32>
    %205 = math.exp %204 : vector<2x64xf32>
    %cst_63 = arith.constant 1.000000e+00 : f32
    %206 = vector.broadcast %cst_63 : f32 to vector<2x64xf32>
    %207 = arith.addf %206, %205 : vector<2x64xf32>
    %208 = arith.divf %206, %207 : vector<2x64xf32>
    %209 = arith.mulf %200, %174 : vector<2x64xf32>
    %210 = arith.mulf %194, %202 : vector<2x64xf32>
    %211 = arith.addf %209, %210 : vector<2x64xf32>
    %212 = math.tanh %211 : vector<2x64xf32>
    %213 = arith.mulf %208, %212 : vector<2x64xf32>
    %214 = vector.extract_strided_slice %213 {offsets = [0, 0], sizes = [2, 32], strides = [1, 1]} : vector<2x64xf32> to vector<2x32xf32>
    %c5_64 = arith.constant 5 : index
    %c0_65 = arith.constant 0 : index
    %c0_66 = arith.constant 0 : index
    %215 = vector.load %arg13[%c5_64, %c0_65, %c0_66] : memref<8x2x64xf32, #tpu.memory_space<vmem>>, vector<1x2x32xf32>
    %216 = vector.shape_cast %215 : vector<1x2x32xf32> to vector<2x32xf32>
    %217 = vector.shape_cast %214 : vector<2x32xf32> to vector<1x2x32xf32>
    tpu.vector_store %arg13[%c5_64, %c0_65, %c0_66], %217 {strides = array<i32>} : memref<8x2x64xf32, #tpu.memory_space<vmem>>, vector<1x2x32xf32>,
    %218 = vector.extract_strided_slice %213 {offsets = [0, 32], sizes = [2, 32], strides = [1, 1]} : vector<2x64xf32> to vector<2x32xf32>
    %c2_67 = arith.constant 2 : index
    %c0_68 = arith.constant 0 : index
    %c32_69 = arith.constant 32 : index
    %219 = vector.load %arg13[%c2_67, %c0_68, %c32_69] : memref<8x2x64xf32, #tpu.memory_space<vmem>>, vector<1x2x32xf32>
    %220 = vector.shape_cast %219 : vector<1x2x32xf32> to vector<2x32xf32>
    %221 = vector.shape_cast %218 : vector<2x32xf32> to vector<1x2x32xf32>
    tpu.vector_store %arg13[%c2_67, %c0_68, %c32_69], %221 {strides = array<i32>} : memref<8x2x64xf32, #tpu.memory_space<vmem>>, vector<1x2x32xf32>,
    %c6_70 = arith.constant 6 : index
    %c0_71 = arith.constant 0 : index
    %c0_72 = arith.constant 0 : index
    %222 = vector.load %arg0[%c6_70, %c0_71, %c0_72] : memref<8x2x256xf32, #tpu.memory_space<vmem>>, vector<1x2x256xf32>
    %223 = vector.shape_cast %222 : vector<1x2x256xf32> to vector<2x256xf32>
    %cst_73 = arith.constant dense<0.000000e+00> : vector<2x256xf32>
    %224 = tpu.matmul %213, %0, %cst_73 {dimension_numbers = #tpu.dot_dimension_numbers<[1], [0], [0], [1], [0, 0, 1, 1], [], []>, precision = #tpu.contract_precision<fp32>} : vector<2x64xf32>, vector<64x256xf32>, vector<2x256xf32> -> vector<2x256xf32>
    %225 = arith.addf %223, %224 : vector<2x256xf32>
    %226 = vector.extract_strided_slice %225 {offsets = [0, 0], sizes = [2, 64], strides = [1, 1]} : vector<2x256xf32> to vector<2x64xf32>
    %227 = arith.negf %226 : vector<2x64xf32>
    %228 = math.exp %227 : vector<2x64xf32>
    %cst_74 = arith.constant 1.000000e+00 : f32
    %229 = vector.broadcast %cst_74 : f32 to vector<2x64xf32>
    %230 = arith.addf %229, %228 : vector<2x64xf32>
    %231 = arith.divf %229, %230 : vector<2x64xf32>
    %232 = vector.extract_strided_slice %225 {offsets = [0, 64], sizes = [2, 64], strides = [1, 1]} : vector<2x256xf32> to vector<2x64xf32>
    %233 = arith.negf %232 : vector<2x64xf32>
    %234 = math.exp %233 : vector<2x64xf32>
    %cst_75 = arith.constant 1.000000e+00 : f32
    %235 = vector.broadcast %cst_75 : f32 to vector<2x64xf32>
    %236 = arith.addf %235, %234 : vector<2x64xf32>
    %237 = arith.divf %235, %236 : vector<2x64xf32>
    %238 = vector.extract_strided_slice %225 {offsets = [0, 128], sizes = [2, 64], strides = [1, 1]} : vector<2x256xf32> to vector<2x64xf32>
    %239 = math.tanh %238 : vector<2x64xf32>
    %240 = vector.extract_strided_slice %225 {offsets = [0, 192], sizes = [2, 64], strides = [1, 1]} : vector<2x256xf32> to vector<2x64xf32>
    %241 = arith.negf %240 : vector<2x64xf32>
    %242 = math.exp %241 : vector<2x64xf32>
    %cst_76 = arith.constant 1.000000e+00 : f32
    %243 = vector.broadcast %cst_76 : f32 to vector<2x64xf32>
    %244 = arith.addf %243, %242 : vector<2x64xf32>
    %245 = arith.divf %243, %244 : vector<2x64xf32>
    %246 = arith.mulf %237, %211 : vector<2x64xf32>
    %247 = arith.mulf %231, %239 : vector<2x64xf32>
    %248 = arith.addf %246, %247 : vector<2x64xf32>
    %249 = math.tanh %248 : vector<2x64xf32>
    %250 = arith.mulf %245, %249 : vector<2x64xf32>
    %251 = vector.extract_strided_slice %250 {offsets = [0, 0], sizes = [2, 32], strides = [1, 1]} : vector<2x64xf32> to vector<2x32xf32>
    %c6_77 = arith.constant 6 : index
    %c0_78 = arith.constant 0 : index
    %c0_79 = arith.constant 0 : index
    %252 = vector.load %arg13[%c6_77, %c0_78, %c0_79] : memref<8x2x64xf32, #tpu.memory_space<vmem>>, vector<1x2x32xf32>
    %253 = vector.shape_cast %252 : vector<1x2x32xf32> to vector<2x32xf32>
    %254 = vector.shape_cast %251 : vector<2x32xf32> to vector<1x2x32xf32>
    tpu.vector_store %arg13[%c6_77, %c0_78, %c0_79], %254 {strides = array<i32>} : memref<8x2x64xf32, #tpu.memory_space<vmem>>, vector<1x2x32xf32>,
    %255 = vector.extract_strided_slice %250 {offsets = [0, 32], sizes = [2, 32], strides = [1, 1]} : vector<2x64xf32> to vector<2x32xf32>
    %c1_80 = arith.constant 1 : index
    %c0_81 = arith.constant 0 : index
    %c32_82 = arith.constant 32 : index
    %256 = vector.load %arg13[%c1_80, %c0_81, %c32_82] : memref<8x2x64xf32, #tpu.memory_space<vmem>>, vector<1x2x32xf32>
    %257 = vector.shape_cast %256 : vector<1x2x32xf32> to vector<2x32xf32>
    %258 = vector.shape_cast %255 : vector<2x32xf32> to vector<1x2x32xf32>
    tpu.vector_store %arg13[%c1_80, %c0_81, %c32_82], %258 {strides = array<i32>} : memref<8x2x64xf32, #tpu.memory_space<vmem>>, vector<1x2x32xf32>,
    %c7_83 = arith.constant 7 : index
    %c0_84 = arith.constant 0 : index
    %c0_85 = arith.constant 0 : index
    %259 = vector.load %arg0[%c7_83, %c0_84, %c0_85] : memref<8x2x256xf32, #tpu.memory_space<vmem>>, vector<1x2x256xf32>
    %260 = vector.shape_cast %259 : vector<1x2x256xf32> to vector<2x256xf32>
    %cst_86 = arith.constant dense<0.000000e+00> : vector<2x256xf32>
    %261 = tpu.matmul %250, %0, %cst_86 {dimension_numbers = #tpu.dot_dimension_numbers<[1], [0], [0], [1], [0, 0, 1, 1], [], []>, precision = #tpu.contract_precision<fp32>} : vector<2x64xf32>, vector<64x256xf32>, vector<2x256xf32> -> vector<2x256xf32>
    %262 = arith.addf %260, %261 : vector<2x256xf32>
    %263 = vector.extract_strided_slice %262 {offsets = [0, 0], sizes = [2, 64], strides = [1, 1]} : vector<2x256xf32> to vector<2x64xf32>
    %264 = arith.negf %263 : vector<2x64xf32>
    %265 = math.exp %264 : vector<2x64xf32>
    %cst_87 = arith.constant 1.000000e+00 : f32
    %266 = vector.broadcast %cst_87 : f32 to vector<2x64xf32>
    %267 = arith.addf %266, %265 : vector<2x64xf32>
    %268 = arith.divf %266, %267 : vector<2x64xf32>
    %269 = vector.extract_strided_slice %262 {offsets = [0, 64], sizes = [2, 64], strides = [1, 1]} : vector<2x256xf32> to vector<2x64xf32>
    %270 = arith.negf %269 : vector<2x64xf32>
    %271 = math.exp %270 : vector<2x64xf32>
    %cst_88 = arith.constant 1.000000e+00 : f32
    %272 = vector.broadcast %cst_88 : f32 to vector<2x64xf32>
    %273 = arith.addf %272, %271 : vector<2x64xf32>
    %274 = arith.divf %272, %273 : vector<2x64xf32>
    %275 = vector.extract_strided_slice %262 {offsets = [0, 128], sizes = [2, 64], strides = [1, 1]} : vector<2x256xf32> to vector<2x64xf32>
    %276 = math.tanh %275 : vector<2x64xf32>
    %277 = vector.extract_strided_slice %262 {offsets = [0, 192], sizes = [2, 64], strides = [1, 1]} : vector<2x256xf32> to vector<2x64xf32>
    %278 = arith.negf %277 : vector<2x64xf32>
    %279 = math.exp %278 : vector<2x64xf32>
    %cst_89 = arith.constant 1.000000e+00 : f32
    %280 = vector.broadcast %cst_89 : f32 to vector<2x64xf32>
    %281 = arith.addf %280, %279 : vector<2x64xf32>
    %282 = arith.divf %280, %281 : vector<2x64xf32>
    %283 = arith.mulf %274, %248 : vector<2x64xf32>
    %284 = arith.mulf %268, %276 : vector<2x64xf32>
    %285 = arith.addf %283, %284 : vector<2x64xf32>
    %286 = math.tanh %285 : vector<2x64xf32>
    %287 = arith.mulf %282, %286 : vector<2x64xf32>
    %288 = vector.extract_strided_slice %287 {offsets = [0, 0], sizes = [2, 32], strides = [1, 1]} : vector<2x64xf32> to vector<2x32xf32>
    %c7_90 = arith.constant 7 : index
    %c0_91 = arith.constant 0 : index
    %c0_92 = arith.constant 0 : index
    %289 = vector.load %arg13[%c7_90, %c0_91, %c0_92] : memref<8x2x64xf32, #tpu.memory_space<vmem>>, vector<1x2x32xf32>
    %290 = vector.shape_cast %289 : vector<1x2x32xf32> to vector<2x32xf32>
    %291 = vector.shape_cast %288 : vector<2x32xf32> to vector<1x2x32xf32>
    tpu.vector_store %arg13[%c7_90, %c0_91, %c0_92], %291 {strides = array<i32>} : memref<8x2x64xf32, #tpu.memory_space<vmem>>, vector<1x2x32xf32>,
    %292 = vector.extract_strided_slice %287 {offsets = [0, 32], sizes = [2, 32], strides = [1, 1]} : vector<2x64xf32> to vector<2x32xf32>
    %c0_93 = arith.constant 0 : index
    %c0_94 = arith.constant 0 : index
    %c32_95 = arith.constant 32 : index
    %293 = vector.load %arg13[%c0_93, %c0_94, %c32_95] : memref<8x2x64xf32, #tpu.memory_space<vmem>>, vector<1x2x32xf32>
    %294 = vector.shape_cast %293 : vector<1x2x32xf32> to vector<2x32xf32>
    %295 = vector.shape_cast %292 : vector<2x32xf32> to vector<1x2x32xf32>
    tpu.vector_store %arg13[%c0_93, %c0_94, %c32_95], %295 {strides = array<i32>} : memref<8x2x64xf32, #tpu.memory_space<vmem>>, vector<1x2x32xf32>,
    %c0_96 = arith.constant 0 : index
    %c0_97 = arith.constant 0 : index
    %296 = vector.load %arg2[%c0_96, %c0_97] : memref<64x64xf32, #tpu.memory_space<vmem>>, vector<64x64xf32>
    %c0_98 = arith.constant 0 : index
    %c0_99 = arith.constant 0 : index
    %297 = vector.load %arg3[%c0_98, %c0_99] : memref<1x64xf32, #tpu.memory_space<vmem>>, vector<1x64xf32>
    %c0_100 = arith.constant 0 : index
    %c0_101 = arith.constant 0 : index
    %298 = vector.load %arg4[%c0_100, %c0_101] : memref<1x64xf32, #tpu.memory_space<vmem>>, vector<1x64xf32>
    %c0_102 = arith.constant 0 : index
    %c0_103 = arith.constant 0 : index
    %299 = vector.load %arg5[%c0_102, %c0_103] : memref<1x1xf32, #tpu.memory_space<vmem>>, vector<1x1xf32>
    %cst_104 = arith.constant 0xFF800000 : f32
    %300 = vector.broadcast %cst_104 : f32 to vector<2x1xf32>
    %cst_105 = arith.constant 0.000000e+00 : f32
    %301 = vector.broadcast %cst_105 : f32 to vector<2x1xf32>
    %cst_106 = arith.constant 0.000000e+00 : f32
    %302 = vector.broadcast %cst_106 : f32 to vector<2x64xf32>
    %c0_107 = arith.constant 0 : index
    %c0_108 = arith.constant 0 : index
    %c0_109 = arith.constant 0 : index
    %303 = vector.load %arg13[%c0_107, %c0_108, %c0_109] : memref<8x2x64xf32, #tpu.memory_space<vmem>>, vector<1x2x64xf32>
    %304 = vector.shape_cast %303 : vector<1x2x64xf32> to vector<2x64xf32>
    %cst_110 = arith.constant dense<0.000000e+00> : vector<2x64xf32>
    %305 = tpu.matmul %304, %296, %cst_110 {dimension_numbers = #tpu.dot_dimension_numbers<[1], [0], [0], [1], [0, 0, 1, 1], [], []>, precision = #tpu.contract_precision<fp32>} : vector<2x64xf32>, vector<64x64xf32>, vector<2x64xf32> -> vector<2x64xf32>
    %306 = vector.broadcast %297 : vector<1x64xf32> to vector<2x64xf32>
    %307 = arith.addf %305, %306 : vector<2x64xf32>
    %308 = math.tanh %307 : vector<2x64xf32>
    %309 = vector.broadcast %298 : vector<1x64xf32> to vector<2x64xf32>
    %310 = arith.mulf %308, %309 : vector<2x64xf32>
    %cst_111 = arith.constant dense<0.000000e+00> : vector<2xf32>
    %311 = vector.multi_reduction <add>, %310, %cst_111 [1] : vector<2x64xf32> to vector<2xf32>
    %312 = vector.shape_cast %311 : vector<2xf32> to vector<2x1xf32>
    %313 = vector.broadcast %299 : vector<1x1xf32> to vector<2x1xf32>
    %314 = arith.addf %312, %313 : vector<2x1xf32>
    %315 = arith.maximumf %300, %314 : vector<2x1xf32>
    %316 = arith.subf %300, %315 : vector<2x1xf32>
    %317 = math.exp %316 : vector<2x1xf32>
    %318 = arith.subf %314, %315 : vector<2x1xf32>
    %319 = math.exp %318 : vector<2x1xf32>
    %320 = arith.mulf %317, %301 : vector<2x1xf32>
    %321 = arith.addf %320, %319 : vector<2x1xf32>
    %322 = vector.broadcast %317 : vector<2x1xf32> to vector<2x64xf32>
    %323 = arith.mulf %322, %302 : vector<2x64xf32>
    %324 = vector.broadcast %319 : vector<2x1xf32> to vector<2x64xf32>
    %325 = arith.mulf %324, %308 : vector<2x64xf32>
    %326 = arith.addf %323, %325 : vector<2x64xf32>
    %c1_112 = arith.constant 1 : index
    %c0_113 = arith.constant 0 : index
    %c0_114 = arith.constant 0 : index
    %327 = vector.load %arg13[%c1_112, %c0_113, %c0_114] : memref<8x2x64xf32, #tpu.memory_space<vmem>>, vector<1x2x64xf32>
    %328 = vector.shape_cast %327 : vector<1x2x64xf32> to vector<2x64xf32>
    %cst_115 = arith.constant dense<0.000000e+00> : vector<2x64xf32>
    %329 = tpu.matmul %328, %296, %cst_115 {dimension_numbers = #tpu.dot_dimension_numbers<[1], [0], [0], [1], [0, 0, 1, 1], [], []>, precision = #tpu.contract_precision<fp32>} : vector<2x64xf32>, vector<64x64xf32>, vector<2x64xf32> -> vector<2x64xf32>
    %330 = vector.broadcast %297 : vector<1x64xf32> to vector<2x64xf32>
    %331 = arith.addf %329, %330 : vector<2x64xf32>
    %332 = math.tanh %331 : vector<2x64xf32>
    %333 = vector.broadcast %298 : vector<1x64xf32> to vector<2x64xf32>
    %334 = arith.mulf %332, %333 : vector<2x64xf32>
    %cst_116 = arith.constant dense<0.000000e+00> : vector<2xf32>
    %335 = vector.multi_reduction <add>, %334, %cst_116 [1] : vector<2x64xf32> to vector<2xf32>
    %336 = vector.shape_cast %335 : vector<2xf32> to vector<2x1xf32>
    %337 = vector.broadcast %299 : vector<1x1xf32> to vector<2x1xf32>
    %338 = arith.addf %336, %337 : vector<2x1xf32>
    %339 = arith.maximumf %315, %338 : vector<2x1xf32>
    %340 = arith.subf %315, %339 : vector<2x1xf32>
    %341 = math.exp %340 : vector<2x1xf32>
    %342 = arith.subf %338, %339 : vector<2x1xf32>
    %343 = math.exp %342 : vector<2x1xf32>
    %344 = arith.mulf %341, %321 : vector<2x1xf32>
    %345 = arith.addf %344, %343 : vector<2x1xf32>
    %346 = vector.broadcast %341 : vector<2x1xf32> to vector<2x64xf32>
    %347 = arith.mulf %346, %326 : vector<2x64xf32>
    %348 = vector.broadcast %343 : vector<2x1xf32> to vector<2x64xf32>
    %349 = arith.mulf %348, %332 : vector<2x64xf32>
    %350 = arith.addf %347, %349 : vector<2x64xf32>
    %c2_117 = arith.constant 2 : index
    %c0_118 = arith.constant 0 : index
    %c0_119 = arith.constant 0 : index
    %351 = vector.load %arg13[%c2_117, %c0_118, %c0_119] : memref<8x2x64xf32, #tpu.memory_space<vmem>>, vector<1x2x64xf32>
    %352 = vector.shape_cast %351 : vector<1x2x64xf32> to vector<2x64xf32>
    %cst_120 = arith.constant dense<0.000000e+00> : vector<2x64xf32>
    %353 = tpu.matmul %352, %296, %cst_120 {dimension_numbers = #tpu.dot_dimension_numbers<[1], [0], [0], [1], [0, 0, 1, 1], [], []>, precision = #tpu.contract_precision<fp32>} : vector<2x64xf32>, vector<64x64xf32>, vector<2x64xf32> -> vector<2x64xf32>
    %354 = vector.broadcast %297 : vector<1x64xf32> to vector<2x64xf32>
    %355 = arith.addf %353, %354 : vector<2x64xf32>
    %356 = math.tanh %355 : vector<2x64xf32>
    %357 = vector.broadcast %298 : vector<1x64xf32> to vector<2x64xf32>
    %358 = arith.mulf %356, %357 : vector<2x64xf32>
    %cst_121 = arith.constant dense<0.000000e+00> : vector<2xf32>
    %359 = vector.multi_reduction <add>, %358, %cst_121 [1] : vector<2x64xf32> to vector<2xf32>
    %360 = vector.shape_cast %359 : vector<2xf32> to vector<2x1xf32>
    %361 = vector.broadcast %299 : vector<1x1xf32> to vector<2x1xf32>
    %362 = arith.addf %360, %361 : vector<2x1xf32>
    %363 = arith.maximumf %339, %362 : vector<2x1xf32>
    %364 = arith.subf %339, %363 : vector<2x1xf32>
    %365 = math.exp %364 : vector<2x1xf32>
    %366 = arith.subf %362, %363 : vector<2x1xf32>
    %367 = math.exp %366 : vector<2x1xf32>
    %368 = arith.mulf %365, %345 : vector<2x1xf32>
    %369 = arith.addf %368, %367 : vector<2x1xf32>
    %370 = vector.broadcast %365 : vector<2x1xf32> to vector<2x64xf32>
    %371 = arith.mulf %370, %350 : vector<2x64xf32>
    %372 = vector.broadcast %367 : vector<2x1xf32> to vector<2x64xf32>
    %373 = arith.mulf %372, %356 : vector<2x64xf32>
    %374 = arith.addf %371, %373 : vector<2x64xf32>
    %c3_122 = arith.constant 3 : index
    %c0_123 = arith.constant 0 : index
    %c0_124 = arith.constant 0 : index
    %375 = vector.load %arg13[%c3_122, %c0_123, %c0_124] : memref<8x2x64xf32, #tpu.memory_space<vmem>>, vector<1x2x64xf32>
    %376 = vector.shape_cast %375 : vector<1x2x64xf32> to vector<2x64xf32>
    %cst_125 = arith.constant dense<0.000000e+00> : vector<2x64xf32>
    %377 = tpu.matmul %376, %296, %cst_125 {dimension_numbers = #tpu.dot_dimension_numbers<[1], [0], [0], [1], [0, 0, 1, 1], [], []>, precision = #tpu.contract_precision<fp32>} : vector<2x64xf32>, vector<64x64xf32>, vector<2x64xf32> -> vector<2x64xf32>
    %378 = vector.broadcast %297 : vector<1x64xf32> to vector<2x64xf32>
    %379 = arith.addf %377, %378 : vector<2x64xf32>
    %380 = math.tanh %379 : vector<2x64xf32>
    %381 = vector.broadcast %298 : vector<1x64xf32> to vector<2x64xf32>
    %382 = arith.mulf %380, %381 : vector<2x64xf32>
    %cst_126 = arith.constant dense<0.000000e+00> : vector<2xf32>
    %383 = vector.multi_reduction <add>, %382, %cst_126 [1] : vector<2x64xf32> to vector<2xf32>
    %384 = vector.shape_cast %383 : vector<2xf32> to vector<2x1xf32>
    %385 = vector.broadcast %299 : vector<1x1xf32> to vector<2x1xf32>
    %386 = arith.addf %384, %385 : vector<2x1xf32>
    %387 = arith.maximumf %363, %386 : vector<2x1xf32>
    %388 = arith.subf %363, %387 : vector<2x1xf32>
    %389 = math.exp %388 : vector<2x1xf32>
    %390 = arith.subf %386, %387 : vector<2x1xf32>
    %391 = math.exp %390 : vector<2x1xf32>
    %392 = arith.mulf %389, %369 : vector<2x1xf32>
    %393 = arith.addf %392, %391 : vector<2x1xf32>
    %394 = vector.broadcast %389 : vector<2x1xf32> to vector<2x64xf32>
    %395 = arith.mulf %394, %374 : vector<2x64xf32>
    %396 = vector.broadcast %391 : vector<2x1xf32> to vector<2x64xf32>
    %397 = arith.mulf %396, %380 : vector<2x64xf32>
    %398 = arith.addf %395, %397 : vector<2x64xf32>
    %c4_127 = arith.constant 4 : index
    %c0_128 = arith.constant 0 : index
    %c0_129 = arith.constant 0 : index
    %399 = vector.load %arg13[%c4_127, %c0_128, %c0_129] : memref<8x2x64xf32, #tpu.memory_space<vmem>>, vector<1x2x64xf32>
    %400 = vector.shape_cast %399 : vector<1x2x64xf32> to vector<2x64xf32>
    %cst_130 = arith.constant dense<0.000000e+00> : vector<2x64xf32>
    %401 = tpu.matmul %400, %296, %cst_130 {dimension_numbers = #tpu.dot_dimension_numbers<[1], [0], [0], [1], [0, 0, 1, 1], [], []>, precision = #tpu.contract_precision<fp32>} : vector<2x64xf32>, vector<64x64xf32>, vector<2x64xf32> -> vector<2x64xf32>
    %402 = vector.broadcast %297 : vector<1x64xf32> to vector<2x64xf32>
    %403 = arith.addf %401, %402 : vector<2x64xf32>
    %404 = math.tanh %403 : vector<2x64xf32>
    %405 = vector.broadcast %298 : vector<1x64xf32> to vector<2x64xf32>
    %406 = arith.mulf %404, %405 : vector<2x64xf32>
    %cst_131 = arith.constant dense<0.000000e+00> : vector<2xf32>
    %407 = vector.multi_reduction <add>, %406, %cst_131 [1] : vector<2x64xf32> to vector<2xf32>
    %408 = vector.shape_cast %407 : vector<2xf32> to vector<2x1xf32>
    %409 = vector.broadcast %299 : vector<1x1xf32> to vector<2x1xf32>
    %410 = arith.addf %408, %409 : vector<2x1xf32>
    %411 = arith.maximumf %387, %410 : vector<2x1xf32>
    %412 = arith.subf %387, %411 : vector<2x1xf32>
    %413 = math.exp %412 : vector<2x1xf32>
    %414 = arith.subf %410, %411 : vector<2x1xf32>
    %415 = math.exp %414 : vector<2x1xf32>
    %416 = arith.mulf %413, %393 : vector<2x1xf32>
    %417 = arith.addf %416, %415 : vector<2x1xf32>
    %418 = vector.broadcast %413 : vector<2x1xf32> to vector<2x64xf32>
    %419 = arith.mulf %418, %398 : vector<2x64xf32>
    %420 = vector.broadcast %415 : vector<2x1xf32> to vector<2x64xf32>
    %421 = arith.mulf %420, %404 : vector<2x64xf32>
    %422 = arith.addf %419, %421 : vector<2x64xf32>
    %c5_132 = arith.constant 5 : index
    %c0_133 = arith.constant 0 : index
    %c0_134 = arith.constant 0 : index
    %423 = vector.load %arg13[%c5_132, %c0_133, %c0_134] : memref<8x2x64xf32, #tpu.memory_space<vmem>>, vector<1x2x64xf32>
    %424 = vector.shape_cast %423 : vector<1x2x64xf32> to vector<2x64xf32>
    %cst_135 = arith.constant dense<0.000000e+00> : vector<2x64xf32>
    %425 = tpu.matmul %424, %296, %cst_135 {dimension_numbers = #tpu.dot_dimension_numbers<[1], [0], [0], [1], [0, 0, 1, 1], [], []>, precision = #tpu.contract_precision<fp32>} : vector<2x64xf32>, vector<64x64xf32>, vector<2x64xf32> -> vector<2x64xf32>
    %426 = vector.broadcast %297 : vector<1x64xf32> to vector<2x64xf32>
    %427 = arith.addf %425, %426 : vector<2x64xf32>
    %428 = math.tanh %427 : vector<2x64xf32>
    %429 = vector.broadcast %298 : vector<1x64xf32> to vector<2x64xf32>
    %430 = arith.mulf %428, %429 : vector<2x64xf32>
    %cst_136 = arith.constant dense<0.000000e+00> : vector<2xf32>
    %431 = vector.multi_reduction <add>, %430, %cst_136 [1] : vector<2x64xf32> to vector<2xf32>
    %432 = vector.shape_cast %431 : vector<2xf32> to vector<2x1xf32>
    %433 = vector.broadcast %299 : vector<1x1xf32> to vector<2x1xf32>
    %434 = arith.addf %432, %433 : vector<2x1xf32>
    %435 = arith.maximumf %411, %434 : vector<2x1xf32>
    %436 = arith.subf %411, %435 : vector<2x1xf32>
    %437 = math.exp %436 : vector<2x1xf32>
    %438 = arith.subf %434, %435 : vector<2x1xf32>
    %439 = math.exp %438 : vector<2x1xf32>
    %440 = arith.mulf %437, %417 : vector<2x1xf32>
    %441 = arith.addf %440, %439 : vector<2x1xf32>
    %442 = vector.broadcast %437 : vector<2x1xf32> to vector<2x64xf32>
    %443 = arith.mulf %442, %422 : vector<2x64xf32>
    %444 = vector.broadcast %439 : vector<2x1xf32> to vector<2x64xf32>
    %445 = arith.mulf %444, %428 : vector<2x64xf32>
    %446 = arith.addf %443, %445 : vector<2x64xf32>
    %c6_137 = arith.constant 6 : index
    %c0_138 = arith.constant 0 : index
    %c0_139 = arith.constant 0 : index
    %447 = vector.load %arg13[%c6_137, %c0_138, %c0_139] : memref<8x2x64xf32, #tpu.memory_space<vmem>>, vector<1x2x64xf32>
    %448 = vector.shape_cast %447 : vector<1x2x64xf32> to vector<2x64xf32>
    %cst_140 = arith.constant dense<0.000000e+00> : vector<2x64xf32>
    %449 = tpu.matmul %448, %296, %cst_140 {dimension_numbers = #tpu.dot_dimension_numbers<[1], [0], [0], [1], [0, 0, 1, 1], [], []>, precision = #tpu.contract_precision<fp32>} : vector<2x64xf32>, vector<64x64xf32>, vector<2x64xf32> -> vector<2x64xf32>
    %450 = vector.broadcast %297 : vector<1x64xf32> to vector<2x64xf32>
    %451 = arith.addf %449, %450 : vector<2x64xf32>
    %452 = math.tanh %451 : vector<2x64xf32>
    %453 = vector.broadcast %298 : vector<1x64xf32> to vector<2x64xf32>
    %454 = arith.mulf %452, %453 : vector<2x64xf32>
    %cst_141 = arith.constant dense<0.000000e+00> : vector<2xf32>
    %455 = vector.multi_reduction <add>, %454, %cst_141 [1] : vector<2x64xf32> to vector<2xf32>
    %456 = vector.shape_cast %455 : vector<2xf32> to vector<2x1xf32>
    %457 = vector.broadcast %299 : vector<1x1xf32> to vector<2x1xf32>
    %458 = arith.addf %456, %457 : vector<2x1xf32>
    %459 = arith.maximumf %435, %458 : vector<2x1xf32>
    %460 = arith.subf %435, %459 : vector<2x1xf32>
    %461 = math.exp %460 : vector<2x1xf32>
    %462 = arith.subf %458, %459 : vector<2x1xf32>
    %463 = math.exp %462 : vector<2x1xf32>
    %464 = arith.mulf %461, %441 : vector<2x1xf32>
    %465 = arith.addf %464, %463 : vector<2x1xf32>
    %466 = vector.broadcast %461 : vector<2x1xf32> to vector<2x64xf32>
    %467 = arith.mulf %466, %446 : vector<2x64xf32>
    %468 = vector.broadcast %463 : vector<2x1xf32> to vector<2x64xf32>
    %469 = arith.mulf %468, %452 : vector<2x64xf32>
    %470 = arith.addf %467, %469 : vector<2x64xf32>
    %c7_142 = arith.constant 7 : index
    %c0_143 = arith.constant 0 : index
    %c0_144 = arith.constant 0 : index
    %471 = vector.load %arg13[%c7_142, %c0_143, %c0_144] : memref<8x2x64xf32, #tpu.memory_space<vmem>>, vector<1x2x64xf32>
    %472 = vector.shape_cast %471 : vector<1x2x64xf32> to vector<2x64xf32>
    %cst_145 = arith.constant dense<0.000000e+00> : vector<2x64xf32>
    %473 = tpu.matmul %472, %296, %cst_145 {dimension_numbers = #tpu.dot_dimension_numbers<[1], [0], [0], [1], [0, 0, 1, 1], [], []>, precision = #tpu.contract_precision<fp32>} : vector<2x64xf32>, vector<64x64xf32>, vector<2x64xf32> -> vector<2x64xf32>
    %474 = vector.broadcast %297 : vector<1x64xf32> to vector<2x64xf32>
    %475 = arith.addf %473, %474 : vector<2x64xf32>
    %476 = math.tanh %475 : vector<2x64xf32>
    %477 = vector.broadcast %298 : vector<1x64xf32> to vector<2x64xf32>
    %478 = arith.mulf %476, %477 : vector<2x64xf32>
    %cst_146 = arith.constant dense<0.000000e+00> : vector<2xf32>
    %479 = vector.multi_reduction <add>, %478, %cst_146 [1] : vector<2x64xf32> to vector<2xf32>
    %480 = vector.shape_cast %479 : vector<2xf32> to vector<2x1xf32>
    %481 = vector.broadcast %299 : vector<1x1xf32> to vector<2x1xf32>
    %482 = arith.addf %480, %481 : vector<2x1xf32>
    %483 = arith.maximumf %459, %482 : vector<2x1xf32>
    %484 = arith.subf %459, %483 : vector<2x1xf32>
    %485 = math.exp %484 : vector<2x1xf32>
    %486 = arith.subf %482, %483 : vector<2x1xf32>
    %487 = math.exp %486 : vector<2x1xf32>
    %488 = arith.mulf %485, %465 : vector<2x1xf32>
    %489 = arith.addf %488, %487 : vector<2x1xf32>
    %490 = vector.broadcast %485 : vector<2x1xf32> to vector<2x64xf32>
    %491 = arith.mulf %490, %470 : vector<2x64xf32>
    %492 = vector.broadcast %487 : vector<2x1xf32> to vector<2x64xf32>
    %493 = arith.mulf %492, %476 : vector<2x64xf32>
    %494 = arith.addf %491, %493 : vector<2x64xf32>
    %495 = vector.broadcast %489 : vector<2x1xf32> to vector<2x64xf32>
    %496 = arith.divf %494, %495 : vector<2x64xf32>
    %c0_147 = arith.constant 0 : index
    %c0_148 = arith.constant 0 : index
    %497 = vector.load %arg6[%c0_147, %c0_148] : memref<64x192xf32, #tpu.memory_space<vmem>>, vector<64x192xf32>
    %cst_149 = arith.constant dense<0.000000e+00> : vector<2x192xf32>
    %498 = tpu.matmul %496, %497, %cst_149 {dimension_numbers = #tpu.dot_dimension_numbers<[1], [0], [0], [1], [0, 0, 1, 1], [], []>, precision = #tpu.contract_precision<fp32>} : vector<2x64xf32>, vector<64x192xf32>, vector<2x192xf32> -> vector<2x192xf32>
    %c0_150 = arith.constant 0 : index
    %c0_151 = arith.constant 0 : index
    %499 = vector.load %arg7[%c0_150, %c0_151] : memref<1x192xf32, #tpu.memory_space<vmem>>, vector<1x192xf32>
    %500 = vector.broadcast %499 : vector<1x192xf32> to vector<2x192xf32>
    %501 = arith.addf %498, %500 : vector<2x192xf32>
    %cst_152 = arith.constant 0.000000e+00 : f32
    %502 = vector.broadcast %cst_152 : f32 to vector<2x192xf32>
    %503 = arith.maximumf %501, %502 : vector<2x192xf32>
    %c0_153 = arith.constant 0 : index
    %c0_154 = arith.constant 0 : index
    %504 = vector.load %arg8[%c0_153, %c0_154] : memref<192x84xf32, #tpu.memory_space<vmem>>, vector<192x84xf32>
    %cst_155 = arith.constant dense<0.000000e+00> : vector<2x84xf32>
    %505 = tpu.matmul %503, %504, %cst_155 {dimension_numbers = #tpu.dot_dimension_numbers<[1], [0], [0], [1], [0, 0, 1, 1], [], []>, precision = #tpu.contract_precision<fp32>} : vector<2x192xf32>, vector<192x84xf32>, vector<2x84xf32> -> vector<2x84xf32>
    %c0_156 = arith.constant 0 : index
    %c0_157 = arith.constant 0 : index
    %506 = vector.load %arg9[%c0_156, %c0_157] : memref<1x84xf32, #tpu.memory_space<vmem>>, vector<1x84xf32>
    %507 = vector.broadcast %506 : vector<1x84xf32> to vector<2x84xf32>
    %508 = arith.addf %505, %507 : vector<2x84xf32>
    %cst_158 = arith.constant 0.000000e+00 : f32
    %509 = vector.broadcast %cst_158 : f32 to vector<2x84xf32>
    %510 = arith.maximumf %508, %509 : vector<2x84xf32>
    %c0_159 = arith.constant 0 : index
    %c0_160 = arith.constant 0 : index
    %511 = vector.load %arg10[%c0_159, %c0_160] : memref<84x5xf32, #tpu.memory_space<vmem>>, vector<84x5xf32>
    %cst_161 = arith.constant dense<0.000000e+00> : vector<2x5xf32>
    %512 = tpu.matmul %510, %511, %cst_161 {dimension_numbers = #tpu.dot_dimension_numbers<[1], [0], [0], [1], [0, 0, 1, 1], [], []>, precision = #tpu.contract_precision<fp32>} : vector<2x84xf32>, vector<84x5xf32>, vector<2x5xf32> -> vector<2x5xf32>
    %c0_162 = arith.constant 0 : index
    %c0_163 = arith.constant 0 : index
    %513 = vector.load %arg11[%c0_162, %c0_163] : memref<1x5xf32, #tpu.memory_space<vmem>>, vector<1x5xf32>
    %514 = vector.broadcast %513 : vector<1x5xf32> to vector<2x5xf32>
    %515 = arith.addf %512, %514 : vector<2x5xf32>
    %c0_164 = arith.constant 0 : index
    %c0_165 = arith.constant 0 : index
    %516 = vector.load %arg12[%c0_164, %c0_165] : memref<2x5xf32, #tpu.memory_space<vmem>>, vector<2x5xf32>
    tpu.vector_store %arg12[%c0_164, %c0_165], %515 {strides = array<i32>} : memref<2x5xf32, #tpu.memory_space<vmem>>, vector<2x5xf32>,
    return
  }
}

</mosaic_0001>

<bundles_post_ra>
// kernel: bilstm_net_forward.1
= control target key start
LH: loop header
LB: loop body
LE: loop exit
PB: predicated region body
PF: predicated region fallthrough
CT: control target
= control target key end

     0   :  { %s10428_s0 = inlined_call_operand.vmem [shape: f32[8,2,256], index: 0, kind: input, shape index: {}]   ;;  %s10429_s1 = inlined_call_operand.vmem [shape: f32[64,256], index: 1, kind: input, shape index: {}]   ;;  %s10430_s2 = inlined_call_operand.vmem [shape: f32[64,64], index: 2, kind: input, shape index: {}]   ;;  %s10431_s3 = inlined_call_operand.vmem [shape: f32[1,64], index: 3, kind: input, shape index: {}]   ;;  %s10432_s4 = inlined_call_operand.vmem [shape: f32[1,64], index: 4, kind: input, shape index: {}]   ;;  %s10433_s5 = inlined_call_operand.<no memory space> [shape: f32[1,1], index: 5, kind: input, shape index: {}]   ;;  %s10434_s6 = inlined_call_operand.vmem [shape: f32[64,192], index: 6, kind: input, shape index: {}]   ;;  %s10435_s7 = inlined_call_operand.vmem [shape: f32[1,192], index: 7, kind: input, shape index: {}]   ;;  %s10436_s8 = inlined_call_operand.vmem [shape: f32[192,84], index: 8, kind: input, shape index: {}]   ;;  %s10437_s9 = inlined_call_operand.vmem [shape: f32[1,84], index: 9, kind: input, shape index: {}]   ;;  %s10438_s10 = inlined_call_operand.vmem [shape: f32[84,5], index: 10, kind: input, shape index: {}]   ;;  %s10439_s11 = inlined_call_operand.vmem [shape: f32[1,5], index: 11, kind: input, shape index: {}]   ;;  %s10440_s12 = inlined_call_operand.hbm [shape: f32[2,5], index: 12, kind: output, shape index: {}]  }
   0x1   :  { %v17_v0 = vstv %s10433_s5 }
   0x2   :  { %18 = vst [vmem:[#allocation3] sm:$0x1] %v17_v0 }
   0x3   :  { %v60_v1 = vld [vmem:[%s10428_s0] sm:$0xf] }
   0x4   :  { %v7575_v2 = vmul.f32 -1.442695, %v60_v1 }
   0x6   :  { %7609 = vpow2.f32 %v7575_v2 }
   0x7   :  { %19 = vsyncpa [#allocation5], 0  ;;  %v81_v5 = vrot.slane %v60_v1, 2  ;;  %s7781_s5 = smov 64   ;;  %v58_v18 = vld [vmem:[%s10429_s1 + $0x70] sm:$0xff]  ;;  %v56_v19 = vld [vmem:[%s10429_s1 + $0x60] sm:$0xff] }
   0x8   :  { %v54_v20 = vld [vmem:[%s10429_s1 + $0x50] sm:$0xff]  ;;  %v7866_v21 = vand.u32 4294901760, %v58_v18  ;;  %v7868_v22 = vand.u32 4294901760, %v56_v19  ;;  %v52_v24 = vld [vmem:[%s10429_s1 + $0x40] sm:$0xff]  ;;  %v59_v52 = vld [vmem:[%s10429_s1 + $0x78] sm:$0xff]  ;;  %vm120_vm8 = vcmask 254976  }
   0x9   :  { %v7870_v23 = vand.u32 4294901760, %v54_v20  ;;  %v50_v25 = vld [vmem:[%s10429_s1 + $0x30] sm:$0xff]  ;;  %v48_v26 = vld [vmem:[%s10429_s1 + $0x20] sm:$0xff]  ;;  %v7881_v27 = vand.u32 4294901760, %v52_v24  ;;  %v57_v53 = vld [vmem:[%s10429_s1 + $0x68] sm:$0xff]  ;;  %v7979_v62 = vand.u32 4294901760, %v59_v52 }
   0xa   :  { %v7883_v28 = vand.u32 4294901760, %v50_v25  ;;  %v7885_v29 = vand.u32 4294901760, %v48_v26  ;;  %v46_v30 = vld [vmem:[%s10429_s1 + $0x10] sm:$0xff]  ;;  %v44_v31 = vld [vmem:[%s10429_s1] sm:$0xff]  ;;  %v7894_v32 = vsub.f32 %v58_v18, %v7866_v21  ;;  %v7897_v33 = vsub.f32 %v56_v19, %v7868_v22  ;;  %272 = vmatpush.msra.mxu3 %v7866_v21  ;;  %140 = vmatpush.msra.mxu0 %v7866_v21  ;;  %s7783_s16 = smov [#allocation4]   ;;  %s7566_s18 = sshll.u32 %s10440_s12, 4  ;;  %s7567_s18 = int_to_ptr.hbm [resolvable:$true] %s7566_s18 }
   0xb   :  { %v7900_v34 = vsub.f32 %v54_v20, %v7870_v23  ;;  %v7904_v35 = vand.u32 4294901760, %v46_v30  ;;  %v7907_v36 = vsub.f32 %v52_v24, %v7881_v27  ;;  %v7915_v39 = vand.u32 4294901760, %v44_v31 }
   0xc   :  { %v7610_v3 = vpop.eup %7609  ;;  %10507 = vst [vmem:[#allocation7_spill] sm:$0xff] %v7883_v28  ;;  %v7910_v37 = vsub.f32 %v50_v25, %v7883_v28  ;;  %v7913_v38 = vsub.f32 %v48_v26, %v7885_v29  ;;  %v7918_v40 = vand.u32 4294901760, %v7894_v32  ;;  %v7921_v41 = vand.u32 4294901760, %v7897_v33  ;;  %235 = vmatpush.msra.mxu2 %v7894_v32  ;;  %274 = vmatpush.msra.mxu3 %v7868_v22  ;;  %v53_v26 = vld [vmem:[%s10429_s1 + $0x48] sm:$0xff] }
   0xd   :  { %v64_v4 = vadd.f32 1.0, %v7610_v3  ;;  %10508 = vst [vmem:[#allocation8_spill] sm:$0xff] %v7885_v29  ;;  %v7925_v42 = vand.u32 4294901760, %v7900_v34  ;;  %v7929_v43 = vand.u32 4294901760, %v7907_v36  ;;  %142 = vmatpush.msra.mxu0 %v7868_v22  ;;  %v7936_v45 = vsub.f32 %v46_v30, %v7904_v35 }
   0xe   :  { %10509 = vst [vmem:[#allocation9_spill] sm:$0xff] %v7904_v35  ;;  %v7932_v44 = vand.u32 4294901760, %v7910_v37  ;;  %v175_v47 = vsub.f32 %v7894_v32, %v7918_v40  ;;  %v181_v48 = vsub.f32 %v7897_v33, %v7921_v41  ;;  %238 = vmatpush.msra.mxu2 %v7897_v33  ;;  %276 = vmatpush.msra.mxu3 %v7870_v23  ;;  %v7947_v50 = vand.u32 4294901760, %v7913_v38 }
   0xf   :  { %7611 = vrcp.f32 %v64_v4  ;;  %v76_v8 = vand.u32 2147483648, %v64_v4  ;;  %vm70_vm0 = vweird.f32 %v64_v4  ;;  %v74_v10 = vand.u32 2147483647, %v64_v4  ;;  %10510 = vst [vmem:[#allocation10_spill] sm:$0xff] %v7913_v38  ;;  %144 = vmatpush.msra.mxu0 %v7870_v23 }
  0x10   :  { %7613 = vtanh.f32 %v81_v5  ;;  %10511 = vst [vmem:[#allocation11_spill] sm:$0xff] %v7915_v39  ;;  %v187_v49 = vsub.f32 %v7900_v34, %v7925_v42  ;;  %v7951_v51 = vsub.f32 %v44_v31, %v7915_v39  ;;  %v7959_v54 = vand.u32 4294901760, %v175_v47  ;;  %241 = vmatpush.msra.mxu2 %v7900_v34  ;;  %278 = vmatpush.msra.mxu3 %v7881_v27 }
  0x11   :  { %v77_v12 = vor.u32 1.1754944e-38, %v76_v8  ;;  %vm75_vm3 = vcmp.eq.f32.partialorder %v74_v10, 8.507059e+37  ;;  %10512 = vst [vmem:[#allocation12_spill] sm:$0xff] %v7918_v40  ;;  %v7961_v55 = vand.u32 4294901760, %v181_v48  ;;  %v193_v56 = vsub.f32 %v7907_v36, %v7929_v43  ;;  %146 = vmatpush.msra.mxu0 %v7881_v27 }
  0x12   :  { %10513 = vst [vmem:[#allocation13_spill] sm:$0xff] %v7921_v41  ;;  %v199_v58 = vsub.f32 %v7910_v37, %v7932_v44  ;;  %v7970_v59 = vand.u32 4294901760, %v7936_v45  ;;  %177 = vmatpush.msra.mxu1 %v7959_v54  ;;  %v7976_v61 = vand.u32 4294901760, %v187_v49  ;;  %244 = vmatpush.msra.mxu2 %v7907_v36  ;;  %v7981_v63 = vand.u32 4294901760, %v57_v53 }
  0x13   :  { %10514 = vst [vmem:[#allocation14_spill] sm:$0xff] %v7925_v42  ;;  %v205_v0 = vsub.f32 %v7913_v38, %v7947_v50  ;;  %280 = vmatpush.msra.mxu3 %v7883_v28  ;;  %148 = vmatpush.msra.mxu0 %v7883_v28  ;;  %v7992_v2 = vand.u32 4294901760, %v193_v56  ;;  %v7996_v3 = vsub.f32 %v59_v52, %v7979_v62  ;;  %v8072_v30 = vand.u32 4294901760, %v53_v26  ;;  %v49_v52 = vld [vmem:[%s10429_s1 + $0x28] sm:$0xff] }
  0x14   :  { %10515 = vst [vmem:[#allocation15_spill] sm:$0xff] %v7929_v43  ;;  %183 = vmatpush.msra.mxu1 %v7961_v55  ;;  %247 = vmatpush.msra.mxu2 %v7910_v37  ;;  %v8004_v5 = vand.u32 4294901760, %v199_v58  ;;  %v8098_v58 = vand.u32 4294901760, %v49_v52  ;;  %vm127_vm9 = vcmask 523264   ;;  %vm123_vm10 = vcmask 517376  }
  0x15   :  { %v7612_v6 = vpop.eup %7611  ;;  %10516 = vst [vmem:[#allocation16_spill] sm:$0xff] %v7932_v44  ;;  %282 = vmatpush.msra.mxu3 %v7885_v29  ;;  %150 = vmatpush.msra.mxu0 %v7885_v29  ;;  %v8087_v49 = vsub.f32 %v53_v26, %v8072_v30  ;;  %vm608_vm11 = vcmask 1041408  }
  0x16   :  { %v66_v7 = vmul.f32 %v7612_v6, %v64_v4  ;;  %vm71_vm1 = vweird.f32 %v7612_v6  ;;  %v7614_v14 = vpop.eup %7613  ;;  %10517 = vst [vmem:[#allocation17_spill] sm:$0xff] %v7936_v45  ;;  %v7999_v4 = vsub.f32 %v57_v53, %v7981_v63  ;;  %189 = vmatpush.msra.mxu1 %v7976_v61  ;;  %250 = vmatpush.msra.mxu2 %v7913_v38 }
  0x17   :  { %vm72_vm2 = vmor %vm70_vm0, %vm71_vm1  ;;  %10518 = vst [vmem:[#allocation18_spill] sm:$0xff] %v7947_v50  ;;  %284 = vmatpush.msra.mxu3 %v7904_v35  ;;  %152 = vmatpush.msra.mxu0 %v7904_v35 }
  0x18   :  { %v67_v9 = vsub.f32 1.0, %v66_v7  ;;  %10519 = vst [vmem:[#allocation19_spill] sm:$0xff] %v7951_v51  ;;  %v8010_v7 = vand.u32 4294901760, %v7996_v3  ;;  %v8013_v8 = vand.u32 4294901760, %v7999_v4  ;;  %195 = vmatpush.msra.mxu1 %v7992_v2  ;;  %253 = vmatpush.msra.mxu2 %v7936_v45 }
  0x19   :  { %10520 = vst [vmem:[#allocation20_spill] sm:$0xff] %v7970_v59  ;;  %286 = vmatpush.msra.mxu3 %v7915_v39  ;;  %154 = vmatpush.msra.mxu0 %v7915_v39 }
  0x1a   :  { %v68_v11 = vmul.f32 %v7612_v6, %v67_v9  ;;  %v8018_v9 = vand.u32 4294901760, %v205_v0  ;;  %201 = vmatpush.msra.mxu1 %v8004_v5  ;;  %256 = vmatpush.msra.mxu2 %v7951_v51 }
  0x1b   :  { %305 = vmatpush.msrb.mxu0 %v7918_v40 }
  0x1c   :  { %v69_v13 = vadd.f32 %v7612_v6, %v68_v11  ;;  %v412_v11 = vsub.f32 %v7996_v3, %v8010_v7  ;;  %377 = vmatpush.msrb.mxu2 %v7979_v62  ;;  %207 = vmatpush.msra.mxu1 %v8018_v9 }
  0x1d   :  { %309 = vmatpush.msrb.mxu0 %v7921_v41 }
  0x1e   :  { %v73_v15 = vsel %vm72_vm2, %v7612_v6, %v69_v13  ;;  %v211_v6 = vsub.f32 %v7936_v45, %v7970_v59  ;;  %379 = vmatpush.msrb.mxu2 %v7981_v63 }
  0x1f   :  { %v78_v16 = vsel %vm75_vm3, %v77_v12, %v73_v15  ;;  %v418_v12 = vsub.f32 %v7999_v4, %v8013_v8  ;;  %v8033_v15 = vand.u32 4294901760, %v412_v11  ;;  %313 = vmatpush.msrb.mxu0 %v7925_v42 }
  0x20   :  { %v108_v17 = vmul.f32 %v7614_v14, %v78_v16  ;;  %v107_v46 = vmul.f32 0.0, %v78_v16  ;;  %v8030_v14 = vand.u32 4294901760, %v211_v6  ;;  %v55_v16 = vld [vmem:[%s10429_s1 + $0x58] sm:$0xff] }
  0x21   :  { %10524 = vst [vmem:[#allocation24_spill] sm:$0xff] %v8033_v15  ;;  %414 = vmatpush.msrb.mxu3 %v8033_v15  ;;  %v8047_v19 = vand.u32 4294901760, %v55_v16  ;;  %317 = vmatpush.msrb.mxu0 %v7929_v43  ;;  %v47_v6 = vld [vmem:[%s10429_s1 + $0x18] sm:$0xff] }
  0x22   :  { %110 = vrot.lane.b32.xlu0 %v108_v17, %s7781_s5  ;;  %10523 = vst [vmem:[#allocation23_spill] sm:$0xff] %v8030_v14  ;;  %v8038_v17 = vand.u32 4294901760, %v418_v12  ;;  %213 = vmatpush.msra.mxu1 %v8030_v14 }
  0x23   :  { %381 = vmatpush.msrb.mxu2 %v8047_v19  ;;  %321 = vmatpush.msrb.mxu0 %v7932_v44  ;;  %v8075_v31 = vsub.f32 %v55_v16, %v8047_v19 }
  0x24   :  { %10525 = vst [vmem:[#allocation25_spill] sm:$0xff] %v8038_v17  ;;  %420 = vmatpush.msrb.mxu3 %v8038_v17 }
  0x25   :  { %325 = vmatpush.msrb.mxu0 %v7947_v50  ;;  %383 = vmatpush.msrb.mxu2 %v8072_v30  ;;  %v8082_v47 = vand.u32 4294901760, %v8075_v31 }
  0x27   :  { %329 = vmatpush.msrb.mxu0 %v7970_v59  ;;  %v424_v56 = vsub.f32 %v8075_v31, %v8082_v47 }
  0x2a   :  { %84 = vrot.lane.b32.xlu0 %v60_v1, %s7781_s5  ;;  %v7987_v1 = vand.u32 4294901760, %v7951_v51 }
  0x2c   :  { %10522 = vst [vmem:[#allocation22_spill] sm:$0xff] %v7987_v1  ;;  %v217_v10 = vsub.f32 %v7951_v51, %v7987_v1  ;;  %333 = vmatpush.msrb.mxu0 %v7987_v1 }
  0x2e   :  { %v8043_v18 = vand.u32 4294901760, %v217_v10  ;;  %v8106_v10 = vand.u32 4294901760, %v424_v56 }
  0x30   :  { %10526 = vst [vmem:[#allocation26_spill] sm:$0xff] %v8043_v18  ;;  %219 = vmatpush.msra.mxu1 %v8043_v18  ;;  %426 = vmatpush.msrb.mxu3 %v8106_v10 }
  0x31   :  { %10527 = vst [vmem:[#allocation27_spill] sm:$0xff] %v8106_v10 }
  0x32   :  { %348 = vmatpush.msrb.mxu1 %v7866_v21 }
  0x34   :  { %350 = vmatpush.msrb.mxu1 %v7868_v22 }
  0x36   :  { %352 = vmatpush.msrb.mxu1 %v7870_v23 }
  0x38   :  { %354 = vmatpush.msrb.mxu1 %v7881_v27 }
  0x3a   :  { %356 = vmatpush.msrb.mxu1 %v7883_v28 }
  0x3c   :  { %358 = vmatpush.msrb.mxu1 %v7885_v29 }
  0x3e   :  { %360 = vmatpush.msrb.mxu1 %v7904_v35 }
  0x40   :  { %362 = vmatpush.msrb.mxu1 %v7915_v39 }
  0x94   :  { %v111_v57 = vpop.permute.xlu0 %110 }
  0x95   :  { %v7973_v60 = vadd.f32 %v111_v57, %v107_v46  ;;  %v51_v46 = vld [vmem:[%s10429_s1 + $0x38] sm:$0xff]  ;;  %v8096_v57 = vand.u32 4294901760, %v8087_v49 }
  0x96   :  { %v8084_v48 = vand.u32 4294901760, %v51_v46 }
  0x97   :  { %10521 = vst [vmem:[#allocation21_spill] sm:$0xff] %v7973_v60  ;;  %7615 = vtanh.f32 %v7973_v60  ;;  %v430_v11 = vsub.f32 %v8087_v49, %v8096_v57 }
  0x98   :  { %385 = vmatpush.msrb.mxu2 %v8084_v48  ;;  %v8101_v0 = vsub.f32 %v51_v46, %v8084_v48 }
  0x9a   :  { %387 = vmatpush.msrb.mxu2 %v8098_v58  ;;  %v8112_v12 = vand.u32 4294901760, %v8101_v0 }
  0x9c   :  { %v85_v20 = vpop.permute.xlu0 %84  ;;  %v436_v26 = vsub.f32 %v8101_v0, %v8112_v12 }
  0x9d   :  { %v7616_v13 = vpop.eup %7615  ;;  %v86_v24 = vrot.slane %v85_v20, 2  ;;  %v8117_v20 = vsub.f32 %v49_v52, %v8098_v58 }
  0x9e   :  { %116 = vrot.lane.b32.xlu1 %v7616_v13, %s7781_s5  ;;  %v8114_v13 = vand.u32 4294901760, %v47_v6  ;;  %v8137_v56 = vand.u32 4294901760, %v436_v26 }
  0x9f   :  { %v7576_v25 = vmul.f32 -1.442695, %v86_v24  ;;  %v45_v24 = vld [vmem:[%s10429_s1 + $0x8] sm:$0xff]  ;;  %v8134_v52 = vand.u32 4294901760, %v8117_v20 }
  0xa0   :  { %389 = vmatpush.msrb.mxu2 %v8114_v13  ;;  %v8128_v46 = vand.u32 4294901760, %v45_v24  ;;  %10529 = vst [vmem:[#allocation29_spill] sm:$0xff] %v8137_v56 }
  0xa1   :  { %7617 = vpow2.f32 %v7576_v25  ;;  %v8123_v25 = vand.u32 4294901760, %v430_v11 }
  0xa2   :  { %391 = vmatpush.msrb.mxu2 %v8128_v46  ;;  %v8144_v60 = vsub.f32 %v45_v24, %v8128_v46 }
  0xa3   :  { %10528 = vst [vmem:[#allocation28_spill] sm:$0xff] %v8123_v25  ;;  %432 = vmatpush.msrb.mxu3 %v8123_v25 }
  0xa4   :  { %v8152_v26 = vand.u32 4294901760, %v8144_v60 }
  0xa5   :  { %438 = vmatpush.msrb.mxu3 %v8137_v56 }
  0xa6   :  { %v454_v24 = vsub.f32 %v8144_v60, %v8152_v26 }
  0xa7   :  { %v7618_v53 = vpop.eup %7617 }
  0xa8   :  { %v91_v16 = vadd.f32 1.0, %v7618_v53  ;;  %v8131_v53 = vsub.f32 %v47_v6, %v8114_v13  ;;  %v442_v6 = vsub.f32 %v8117_v20, %v8134_v52  ;;  %v8161_v44 = vand.u32 4294901760, %v454_v24 }
  0xaa   :  { %v8141_v11 = vand.u32 4294901760, %v8131_v53  ;;  %7619 = vrcp.f32 %v91_v16  ;;  %v8154_v59 = vand.u32 4294901760, %v442_v6  ;;  %10532 = vst [vmem:[#allocation32_spill] sm:$0xff] %v8161_v44  ;;  %vm97_vm4 = vweird.f32 %v91_v16 }
  0xab   :  { %v103_v6 = vand.u32 2147483648, %v91_v16  ;;  %v101_v41 = vand.u32 2147483647, %v91_v16 }
  0xac   :  { %v448_v1 = vsub.f32 %v8131_v53, %v8141_v11  ;;  %10530 = vst [vmem:[#allocation30_spill] sm:$0xff] %v8154_v59  ;;  %444 = vmatpush.msrb.mxu3 %v8154_v59 }
  0xad   :  { %v104_v10 = vor.u32 1.1754944e-38, %v103_v6  ;;  %vm102_vm7 = vcmp.eq.f32.partialorder %v101_v41, 8.507059e+37  ;;  %v10539_v6 = vld [vmem:[#allocation15_spill] sm:$0xff] }
  0xae   :  { %v8156_v50 = vand.u32 4294901760, %v448_v1 }
  0xb0   :  { %10531 = vst [vmem:[#allocation31_spill] sm:$0xff] %v8156_v50  ;;  %v7620_v43 = vpop.eup %7619  ;;  %450 = vmatpush.msrb.mxu3 %v8156_v50 }
  0xb1   :  { %v93_v56 = vmul.f32 %v7620_v43, %v91_v16  ;;  %vm98_vm5 = vweird.f32 %v7620_v43  ;;  %v10537_v16 = vld [vmem:[#allocation14_spill] sm:$0xff] }
  0xb2   :  { %456 = vmatpush.msrb.mxu3 %v8161_v44  ;;  %vm99_vm6 = vmor %vm97_vm4, %vm98_vm5 }
  0xb3   :  { %v94_v42 = vsub.f32 1.0, %v93_v56 }
  0xb5   :  { %v95_v25 = vmul.f32 %v7620_v43, %v94_v42 }
  0xb7   :  { %v96_v1 = vadd.f32 %v7620_v43, %v95_v25  ;;  %v10538_v25 = vld [vmem:[#allocation29_spill] sm:$0xff] }
  0xb9   :  { %v100_v40 = vsel %vm99_vm6, %v7620_v43, %v96_v1  ;;  %v10540_v1 = vld [vmem:[#allocation30_spill] sm:$0xff] }
  0xba   :  { %v105_v59 = vsel %vm102_vm7, %v104_v10, %v100_v40  ;;  %v10536_v10 = vld [vmem:[#allocation28_spill] sm:$0xff] }
 0x110   :  { %v117_v24 = vpop.permute.xlu1 %116 }
 0x111   :  { %v119_v50 = vmul.f32 %v117_v24, %v105_v59  ;;  %v10535_v59 = vld [vmem:[#allocation13_spill] sm:$0xff]  ;;  %v10541_v24 = vld [vmem:[#allocation16_spill] sm:$0xff] }
 0x113   :  { %121 = vst.msk [vmem:[#allocation2] sm:$0x3] %vm120_vm8, %v119_v50  ;;  %v129_v56 = vsel %vm127_vm9, %v119_v50, 0 }
 0x114   :  { %124 = vst.msk [vmem:[#allocation2 + $0xe] sm:$0x3] %vm123_vm10, %v119_v50  ;;  %v155_v42 = vand.u32 4294901760, %v129_v56  ;;  %v10534_v50 = vld [vmem:[#allocation27_spill] sm:$0xff] }
 0x116   :  { %v156_v44 = vsub.f32 %v129_v56, %v155_v42  ;;  %221 = vmatmul.f32.vlgmr.msra.gmra.mxu1 %v155_v42  ;;  %v10542_v56 = vld [vmem:[#allocation31_spill] sm:$0xff] }
 0x117   :  { %509 = vmatpush.msra.mxu1 %v7979_v62 }
 0x118   :  { %259 = vmatmul.f32.vlgmr.msra.gmra.mxu2 %v156_v44  ;;  %v157_v43 = vand.u32 4294901760, %v156_v44 }
 0x119   :  { %511 = vmatpush.msra.mxu1 %v7981_v63  ;;  %542 = vmatpush.msra.mxu2 %v8010_v7 }
 0x11a   :  { %290 = vmatmul.f32.vlgmr.msra.gmra.mxu3 %v157_v43  ;;  %v158_v40 = vsub.f32 %v156_v44, %v157_v43 }
 0x11b   :  { %513 = vmatpush.msra.mxu1 %v8047_v19  ;;  %546 = vmatpush.msra.mxu2 %v8013_v8 }
 0x11c   :  { %585 = vmatpush.msra.mxu3 %v7979_v62  ;;  %v159_v41 = vand.u32 4294901760, %v158_v40  ;;  %v10545_v40 = vld [vmem:[#allocation20_spill] sm:$0xff] }
 0x11d   :  { %515 = vmatpush.msra.mxu1 %v8072_v30  ;;  %550 = vmatpush.msra.mxu2 %v8082_v47 }
 0x11e   :  { %587 = vmatpush.msra.mxu3 %v7981_v63  ;;  %160 = vmatmul.f32.vlgmr.msra.gmra.mxu0 %v159_v41 }
 0x11f   :  { %364 = vmatmul.f32.vlgmr.msrb.gmra.mxu1 %v155_v42  ;;  %472 = vmatpush.msra.mxu0 %v7996_v3 }
 0x120   :  { %517 = vmatpush.msra.mxu1 %v8084_v48  ;;  %554 = vmatpush.msra.mxu2 %v8096_v57 }
 0x121   :  { %589 = vmatpush.msra.mxu3 %v8047_v19  ;;  %397 = vmatmul.f32.vlgmr.msrb.gmra.mxu2 %v159_v41  ;;  %v10546_v41 = vld [vmem:[#allocation22_spill] sm:$0xff] }
 0x122   :  { %475 = vmatpush.msra.mxu0 %v7999_v4  ;;  %519 = vmatpush.msra.mxu1 %v8098_v58 }
 0x123   :  { %558 = vmatpush.msra.mxu2 %v8112_v12  ;;  %591 = vmatpush.msra.mxu3 %v8072_v30 }
 0x124   :  { %458 = vmatmul.f32.vlgmr.msrb.gmra.mxu3 %v155_v42  ;;  %478 = vmatpush.msra.mxu0 %v8075_v31 }
 0x125   :  { %521 = vmatpush.msra.mxu1 %v8114_v13  ;;  %562 = vmatpush.msra.mxu2 %v8134_v52 }
 0x126   :  { %593 = vmatpush.msra.mxu3 %v8084_v48  ;;  %481 = vmatpush.msra.mxu0 %v8087_v49 }
 0x127   :  { %523 = vmatpush.msra.mxu1 %v8128_v46  ;;  %566 = vmatpush.msra.mxu2 %v8141_v11 }
 0x128   :  { %595 = vmatpush.msra.mxu3 %v8098_v58  ;;  %335 = vmatmul.f32.vlgmr.msrb.gmra.mxu0 %v155_v42 }
 0x129   :  { %527 = vmatmul.f32.vlgmr.msra.gmra.mxu1 %v157_v43  ;;  %484 = vmatpush.msra.mxu0 %v8101_v0  ;;  %v10544_v43 = vld [vmem:[#allocation32_spill] sm:$0xff] }
 0x12a   :  { %570 = vmatpush.msra.mxu2 %v8152_v26  ;;  %597 = vmatpush.msra.mxu3 %v8114_v13 }
 0x12b   :  { %572 = vmatmul.f32.vlgmr.msra.gmra.mxu2 %v155_v42  ;;  %487 = vmatpush.msra.mxu0 %v8117_v20 }
 0x12c   :  { %599 = vmatpush.msra.mxu3 %v8128_v46  ;;  %726 = vmatpush.msrb.mxu1 %v7959_v54 }
 0x12d   :  { %601 = vmatmul.f32.vlgmr.msra.gmra.mxu3 %v155_v42  ;;  %490 = vmatpush.msra.mxu0 %v8131_v53  ;;  %v10543_v42 = vld [vmem:[#allocation18_spill] sm:$0xff] }
 0x12e   :  { %732 = vmatpush.msrb.mxu1 %v7961_v55  ;;  %784 = vmatpush.msrb.mxu2 %v7894_v32 }
 0x12f   :  { %493 = vmatpush.msra.mxu0 %v8144_v60  ;;  %821 = vmatpush.msrb.mxu3 %v7866_v21 }
 0x130   :  { %496 = vmatmul.f32.vlgmr.msra.gmra.mxu0 %v156_v44  ;;  %738 = vmatpush.msrb.mxu1 %v7976_v61  ;;  %v10533_v44 = vld [vmem:[#allocation12_spill] sm:$0xff] }
 0x131   :  { %787 = vmatpush.msrb.mxu2 %v7897_v33  ;;  %823 = vmatpush.msrb.mxu3 %v7868_v22 }
 0x132   :  { %744 = vmatpush.msrb.mxu1 %v7992_v2  ;;  %689 = vmatpush.msrb.mxu0 %v7866_v21 }
 0x133   :  { %790 = vmatpush.msrb.mxu2 %v7900_v34  ;;  %825 = vmatpush.msrb.mxu3 %v7870_v23 }
 0x134   :  { %750 = vmatpush.msrb.mxu1 %v8004_v5  ;;  %691 = vmatpush.msrb.mxu0 %v7868_v22 }
 0x135   :  { %793 = vmatpush.msrb.mxu2 %v7907_v36  ;;  %827 = vmatpush.msrb.mxu3 %v7881_v27 }
 0x136   :  { %756 = vmatpush.msrb.mxu1 %v8018_v9  ;;  %693 = vmatpush.msrb.mxu0 %v7870_v23 }
 0x137   :  { %796 = vmatpush.msrb.mxu2 %v7910_v37  ;;  %829 = vmatpush.msrb.mxu3 %v7883_v28 }
 0x138   :  { %762 = vmatpush.msrb.mxu1 %v8030_v14  ;;  %695 = vmatpush.msrb.mxu0 %v7881_v27 }
 0x139   :  { %799 = vmatpush.msrb.mxu2 %v7913_v38  ;;  %831 = vmatpush.msrb.mxu3 %v7885_v29 }
 0x13a   :  { %768 = vmatpush.msrb.mxu1 %v8043_v18  ;;  %697 = vmatpush.msrb.mxu0 %v7883_v28 }
 0x13b   :  { %802 = vmatpush.msrb.mxu2 %v7936_v45  ;;  %833 = vmatpush.msrb.mxu3 %v7904_v35 }
 0x13c   :  { %897 = vmatpush.msra.mxu1 %v7866_v21  ;;  %699 = vmatpush.msrb.mxu0 %v7885_v29 }
 0x13d   :  { %805 = vmatpush.msrb.mxu2 %v7951_v51  ;;  %835 = vmatpush.msrb.mxu3 %v7915_v39 }
 0x13e   :  { %899 = vmatpush.msra.mxu1 %v7868_v22  ;;  %701 = vmatpush.msrb.mxu0 %v7904_v35 }
 0x13f   :  { %926 = vmatpush.msra.mxu2 %v7979_v62  ;;  %963 = vmatpush.msra.mxu3 %v8033_v15 }
 0x140   :  { %901 = vmatpush.msra.mxu1 %v7870_v23  ;;  %703 = vmatpush.msrb.mxu0 %v7915_v39 }
 0x141   :  { %928 = vmatpush.msra.mxu2 %v7981_v63  ;;  %969 = vmatpush.msra.mxu3 %v8038_v17 }
 0x142   :  { %903 = vmatpush.msra.mxu1 %v7881_v27  ;;  %854 = vmatpush.msra.mxu0 %v10533_v44 }
 0x143   :  { %930 = vmatpush.msra.mxu2 %v8047_v19  ;;  %975 = vmatpush.msra.mxu3 %v10534_v50 }
 0x144   :  { %905 = vmatpush.msra.mxu1 %v7883_v28  ;;  %858 = vmatpush.msra.mxu0 %v10535_v59 }
 0x145   :  { %932 = vmatpush.msra.mxu2 %v8072_v30  ;;  %981 = vmatpush.msra.mxu3 %v10536_v10 }
 0x146   :  { %907 = vmatpush.msra.mxu1 %v7885_v29  ;;  %862 = vmatpush.msra.mxu0 %v10537_v16 }
 0x147   :  { %934 = vmatpush.msra.mxu2 %v8084_v48  ;;  %987 = vmatpush.msra.mxu3 %v10538_v25 }
 0x148   :  { %909 = vmatpush.msra.mxu1 %v7904_v35  ;;  %866 = vmatpush.msra.mxu0 %v10539_v6 }
 0x149   :  { %936 = vmatpush.msra.mxu2 %v8098_v58  ;;  %993 = vmatpush.msra.mxu3 %v10540_v1 }
 0x14a   :  { %911 = vmatpush.msra.mxu1 %v7915_v39  ;;  %870 = vmatpush.msra.mxu0 %v10541_v24 }
 0x14b   :  { %938 = vmatpush.msra.mxu2 %v8114_v13  ;;  %999 = vmatpush.msra.mxu3 %v10542_v56 }
 0x14c   :  { %874 = vmatpush.msra.mxu0 %v10543_v42 }
 0x14d   :  { %940 = vmatpush.msra.mxu2 %v8128_v46  ;;  %1005 = vmatpush.msra.mxu3 %v10544_v43 }
 0x14e   :  { %878 = vmatpush.msra.mxu0 %v10545_v40 }
 0x150   :  { %882 = vmatpush.msra.mxu0 %v10546_v41 }
 0x193   :  { %v222_v6 = vpop.f32.mrf.mxu1 }
 0x19b   :  { %v161_v25 = vpop.f32.mrf.mxu0  ;;  %v260_v16 = vpop.f32.mrf.mxu2 }
 0x19c   :  { %v365_v59 = vpop.f32.mrf.mxu1  ;;  %v223_v24 = vadd.f32 %v222_v6, %v161_v25  ;;  %v7577_v25 = vld [vmem:[%s10428_s0 + $0x4] sm:$0xf] }
 0x19d   :  { %v291_v10 = vpop.f32.mrf.mxu3 }
 0x19e   :  { %v261_v17 = vadd.f32 %v260_v16, %v223_v24 }
 0x1a0   :  { %v292_v51 = vadd.f32 %v291_v10, %v261_v17 }
 0x1a4   :  { %v398_v50 = vpop.f32.mrf.mxu2 }
 0x1a5   :  { %v336_v1 = vpop.f32.mrf.mxu0 }
 0x1a6   :  { %v528_v42 = vpop.f32.mrf.mxu1  ;;  %v337_v40 = vadd.f32 %v336_v1, %v292_v51 }
 0x1a7   :  { %v459_v44 = vpop.f32.mrf.mxu3 }
 0x1a8   :  { %v460_v15 = vadd.f32 %v459_v44, %v398_v50  ;;  %v366_v29 = vadd.f32 %v365_v59, %v337_v40 }
 0x1ad   :  { %v497_v56 = vpop.f32.mrf.mxu0 }
 0x1ae   :  { %v498_v39 = vadd.f32 %v497_v56, %v460_v15  ;;  %v573_v35 = vpop.f32.mrf.mxu2 }
 0x1b0   :  { %v529_v43 = vadd.f32 %v528_v42, %v498_v39  ;;  %v602_v41 = vpop.f32.mrf.mxu3  ;;  %v10547_v42 = vld [vmem:[#allocation21_spill] sm:$0xff] }
 0x1b2   :  { %v574_v45 = vadd.f32 %v573_v35, %v529_v43 }
 0x1b4   :  { %v603_v18 = vadd.f32 %v602_v41, %v574_v45 }
 0x1b6   :  { %v607_v38 = vrot.slane %v603_v18, 6 }
 0x1b8   :  { %v609_v16 = vsel %vm608_vm11, %v366_v29, %v607_v38 }
 0x1b9   :  { %v611_v44 = vadd.f32 %v7577_v25, %v609_v16 }
 0x1bb   :  { %635 = vrot.lane.b32.xlu2 %v611_v44, %s7781_s5  ;;  %v7578_v15 = vmul.f32 -1.442695, %v611_v44  ;;  %v632_v51 = vrot.slane %v611_v44, 2 }
 0x1bd   :  { %7621 = vpow2.f32 %v7578_v15 }
 0x1c3   :  { %v7622_v39 = vpop.eup %7621 }
 0x1c4   :  { %v615_v17 = vadd.f32 1.0, %v7622_v39 }
 0x1c6   :  { %7623 = vrcp.f32 %v615_v17  ;;  %v627_v18 = vand.u32 2147483648, %v615_v17  ;;  %v625_v10 = vand.u32 2147483647, %v615_v17  ;;  %vm621_vm13 = vweird.f32 %v615_v17 }
 0x1c7   :  { %7625 = vtanh.f32 %v632_v51 }
 0x1c8   :  { %v628_v29 = vor.u32 1.1754944e-38, %v627_v18  ;;  %vm626_vm15 = vcmp.eq.f32.partialorder %v625_v10, 8.507059e+37 }
 0x1cc   :  { %v7624_v35 = vpop.eup %7623 }
 0x1cd   :  { %v617_v45 = vmul.f32 %v7624_v35, %v615_v17  ;;  %vm622_vm12 = vweird.f32 %v7624_v35  ;;  %v7626_v1 = vpop.eup %7625 }
 0x1ce   :  { %vm623_vm14 = vmor %vm621_vm13, %vm622_vm12 }
 0x1cf   :  { %v618_v50 = vsub.f32 1.0, %v617_v45 }
 0x1d1   :  { %v619_v59 = vmul.f32 %v7624_v35, %v618_v50 }
 0x1d3   :  { %v620_v6 = vadd.f32 %v7624_v35, %v619_v59 }
 0x1d5   :  { %v624_v38 = vsel %vm623_vm14, %v7624_v35, %v620_v6 }
 0x1d6   :  { %v629_v24 = vsel %vm626_vm15, %v628_v29, %v624_v38 }
 0x1d7   :  { %v659_v56 = vmul.f32 %v7626_v1, %v629_v24  ;;  %v658_v43 = vmul.f32 %v629_v24, %v10547_v42 }
 0x1d9   :  { %661 = vrot.lane.b32.xlu1 %v659_v56, %s7781_s5 }
 0x215   :  { %v636_v16 = vpop.permute.xlu2 %635 }
 0x216   :  { %v637_v44 = vrot.slane %v636_v16, 2 }
 0x218   :  { %v7579_v15 = vmul.f32 -1.442695, %v637_v44  ;;  %v10548_v44 = vld [vmem:[#allocation10_spill] sm:$0xff] }
 0x24b   :  { %v662_v40 = vpop.permute.xlu1 %661 }
 0x24c   :  { %v8271_v41 = vadd.f32 %v662_v40, %v658_v43 }
 0x24e   :  { %7627 = vtanh.f32 %v8271_v41 }
 0x24f   :  { %7629 = vpow2.f32 %v7579_v15  ;;  %v10549_v15 = vld [vmem:[#allocation8_spill] sm:$0xff] }
 0x254   :  { %v7628_v25 = vpop.eup %7627 }
 0x255   :  { %667 = vrot.lane.b32.xlu2 %v7628_v25, %s7781_s5  ;;  %v7630_v39 = vpop.eup %7629 }
 0x256   :  { %v642_v17 = vadd.f32 1.0, %v7630_v39  ;;  %v10550_v39 = vld [vmem:[#allocation26_spill] sm:$0xff] }
 0x258   :  { %7631 = vrcp.f32 %v642_v17  ;;  %v654_v59 = vand.u32 2147483648, %v642_v17  ;;  %vm648_vm1 = vweird.f32 %v642_v17  ;;  %v652_v10 = vand.u32 2147483647, %v642_v17 }
 0x25a   :  { %v655_v29 = vor.u32 1.1754944e-38, %v654_v59  ;;  %vm653_vm3 = vcmp.eq.f32.partialorder %v652_v10, 8.507059e+37  ;;  %v10557_v59 = vld [vmem:[#allocation12_spill] sm:$0xff]  ;;  %v10558_v10 = vld [vmem:[#allocation27_spill] sm:$0xff] }
 0x25e   :  { %v7632_v35 = vpop.eup %7631 }
 0x25f   :  { %v644_v51 = vmul.f32 %v7632_v35, %v642_v17  ;;  %vm649_vm0 = vweird.f32 %v7632_v35  ;;  %v10551_v17 = vld [vmem:[#allocation17_spill] sm:$0xff] }
 0x260   :  { %vm650_vm2 = vmor %vm648_vm1, %vm649_vm0 }
 0x261   :  { %v645_v45 = vsub.f32 1.0, %v644_v51  ;;  %v10553_v51 = vld [vmem:[#allocation19_spill] sm:$0xff] }
 0x263   :  { %v646_v50 = vmul.f32 %v7632_v35, %v645_v45  ;;  %v10554_v45 = vld [vmem:[#allocation11_spill] sm:$0xff] }
 0x265   :  { %v647_v18 = vadd.f32 %v7632_v35, %v646_v50  ;;  %v10555_v50 = vld [vmem:[#allocation24_spill] sm:$0xff] }
 0x267   :  { %v651_v6 = vsel %vm650_vm2, %v7632_v35, %v647_v18  ;;  %v10552_v35 = vld [vmem:[#allocation9_spill] sm:$0xff] }
 0x268   :  { %v656_v38 = vsel %vm653_vm3, %v655_v29, %v651_v6  ;;  %v10556_v18 = vld [vmem:[#allocation25_spill] sm:$0xff]  ;;  %v10560_v29 = vld [vmem:[#allocation28_spill] sm:$0xff] }
 0x269   :  { %v10559_v6 = vld [vmem:[#allocation13_spill] sm:$0xff] }
 0x2af   :  { %v668_v1 = vpop.permute.xlu2 %667 }
 0x2b0   :  { %v670_v24 = vmul.f32 %v668_v1, %v656_v38  ;;  %v10561_v38 = vld [vmem:[#allocation14_spill] sm:$0xff]  ;;  %v10562_v1 = vld [vmem:[#allocation29_spill] sm:$0xff] }
 0x2b2   :  { %672 = vst.msk [vmem:[#allocation2 + $0x2] sm:$0x3] %vm120_vm8, %v670_v24  ;;  %v678_v56 = vsel %vm127_vm9, %v670_v24, 0 }
 0x2b3   :  { %674 = vst.msk [vmem:[#allocation2 + $0xc] sm:$0x3] %vm123_vm10, %v670_v24  ;;  %v704_v42 = vand.u32 4294901760, %v678_v56  ;;  %v10563_v24 = vld [vmem:[#allocation15_spill] sm:$0xff] }
 0x2b5   :  { %v705_v43 = vsub.f32 %v678_v56, %v704_v42  ;;  %770 = vmatmul.f32.vlgmr.msrb.gmra.mxu1 %v704_v42  ;;  %v10564_v56 = vld [vmem:[#allocation30_spill] sm:$0xff] }
 0x2b6   :  { %1058 = vmatpush.msrb.mxu1 %v7979_v62 }
 0x2b7   :  { %808 = vmatmul.f32.vlgmr.msrb.gmra.mxu2 %v705_v43  ;;  %v706_v40 = vand.u32 4294901760, %v705_v43 }
 0x2b8   :  { %1060 = vmatpush.msrb.mxu1 %v7981_v63  ;;  %1091 = vmatpush.msrb.mxu2 %v8010_v7 }
 0x2b9   :  { %839 = vmatmul.f32.vlgmr.msrb.gmra.mxu3 %v706_v40  ;;  %v707_v25 = vsub.f32 %v705_v43, %v706_v40 }
 0x2ba   :  { %1062 = vmatpush.msrb.mxu1 %v8047_v19  ;;  %1095 = vmatpush.msrb.mxu2 %v8013_v8 }
 0x2bb   :  { %1134 = vmatpush.msrb.mxu3 %v7979_v62  ;;  %v708_v16 = vand.u32 4294901760, %v707_v25  ;;  %v10568_v25 = vld [vmem:[#allocation32_spill] sm:$0xff] }
 0x2bc   :  { %1064 = vmatpush.msrb.mxu1 %v8072_v30  ;;  %1099 = vmatpush.msrb.mxu2 %v8082_v47 }
 0x2bd   :  { %1136 = vmatpush.msrb.mxu3 %v7981_v63  ;;  %709 = vmatmul.f32.vlgmr.msrb.gmra.mxu0 %v708_v16 }
 0x2be   :  { %913 = vmatmul.f32.vlgmr.msra.gmra.mxu1 %v704_v42  ;;  %1021 = vmatpush.msrb.mxu0 %v7996_v3 }
 0x2bf   :  { %1066 = vmatpush.msrb.mxu1 %v8084_v48  ;;  %1103 = vmatpush.msrb.mxu2 %v8096_v57 }
 0x2c0   :  { %1138 = vmatpush.msrb.mxu3 %v8047_v19  ;;  %946 = vmatmul.f32.vlgmr.msra.gmra.mxu2 %v708_v16  ;;  %v10569_v16 = vld [vmem:[#allocation20_spill] sm:$0xff] }
 0x2c1   :  { %1024 = vmatpush.msrb.mxu0 %v7999_v4  ;;  %1068 = vmatpush.msrb.mxu1 %v8098_v58 }
 0x2c2   :  { %1107 = vmatpush.msrb.mxu2 %v8112_v12  ;;  %1140 = vmatpush.msrb.mxu3 %v8072_v30 }
 0x2c3   :  { %1007 = vmatmul.f32.vlgmr.msra.gmra.mxu3 %v704_v42  ;;  %1027 = vmatpush.msrb.mxu0 %v8075_v31 }
 0x2c4   :  { %1070 = vmatpush.msrb.mxu1 %v8114_v13  ;;  %1111 = vmatpush.msrb.mxu2 %v8134_v52 }
 0x2c5   :  { %1142 = vmatpush.msrb.mxu3 %v8084_v48  ;;  %1030 = vmatpush.msrb.mxu0 %v8087_v49 }
 0x2c6   :  { %1072 = vmatpush.msrb.mxu1 %v8128_v46  ;;  %1115 = vmatpush.msrb.mxu2 %v8141_v11 }
 0x2c7   :  { %1144 = vmatpush.msrb.mxu3 %v8098_v58  ;;  %884 = vmatmul.f32.vlgmr.msra.gmra.mxu0 %v704_v42 }
 0x2c8   :  { %1076 = vmatmul.f32.vlgmr.msrb.gmra.mxu1 %v706_v40  ;;  %1033 = vmatpush.msrb.mxu0 %v8101_v0  ;;  %v10567_v40 = vld [vmem:[#allocation18_spill] sm:$0xff] }
 0x2c9   :  { %1119 = vmatpush.msrb.mxu2 %v8152_v26  ;;  %1146 = vmatpush.msrb.mxu3 %v8114_v13 }
 0x2ca   :  { %1121 = vmatmul.f32.vlgmr.msrb.gmra.mxu2 %v704_v42  ;;  %1036 = vmatpush.msrb.mxu0 %v8117_v20 }
 0x2cb   :  { %1148 = vmatpush.msrb.mxu3 %v8128_v46  ;;  %1274 = vmatpush.msra.mxu1 %v7959_v54 }
 0x2cc   :  { %1150 = vmatmul.f32.vlgmr.msrb.gmra.mxu3 %v704_v42  ;;  %1039 = vmatpush.msrb.mxu0 %v8131_v53  ;;  %v10565_v42 = vld [vmem:[#allocation16_spill] sm:$0xff] }
 0x2cd   :  { %1280 = vmatpush.msra.mxu1 %v7961_v55  ;;  %1332 = vmatpush.msra.mxu2 %v7894_v32 }
 0x2ce   :  { %1042 = vmatpush.msrb.mxu0 %v8144_v60  ;;  %1369 = vmatpush.msra.mxu3 %v7866_v21 }
 0x2cf   :  { %1045 = vmatmul.f32.vlgmr.msrb.gmra.mxu0 %v705_v43  ;;  %1286 = vmatpush.msra.mxu1 %v7976_v61  ;;  %v10566_v43 = vld [vmem:[#allocation31_spill] sm:$0xff] }
 0x2d0   :  { %1335 = vmatpush.msra.mxu2 %v7897_v33  ;;  %1371 = vmatpush.msra.mxu3 %v7868_v22 }
 0x2d1   :  { %1292 = vmatpush.msra.mxu1 %v7992_v2  ;;  %1237 = vmatpush.msra.mxu0 %v7866_v21 }
 0x2d2   :  { %1338 = vmatpush.msra.mxu2 %v7900_v34  ;;  %1373 = vmatpush.msra.mxu3 %v7870_v23 }
 0x2d3   :  { %1298 = vmatpush.msra.mxu1 %v8004_v5  ;;  %1239 = vmatpush.msra.mxu0 %v7868_v22 }
 0x2d4   :  { %1341 = vmatpush.msra.mxu2 %v7907_v36  ;;  %1375 = vmatpush.msra.mxu3 %v7881_v27 }
 0x2d5   :  { %1304 = vmatpush.msra.mxu1 %v8018_v9  ;;  %1241 = vmatpush.msra.mxu0 %v7870_v23 }
 0x2d6   :  { %1344 = vmatpush.msra.mxu2 %v7910_v37  ;;  %1377 = vmatpush.msra.mxu3 %v7883_v28 }
 0x2d7   :  { %1310 = vmatpush.msra.mxu1 %v8030_v14  ;;  %1243 = vmatpush.msra.mxu0 %v7881_v27 }
 0x2d8   :  { %1347 = vmatpush.msra.mxu2 %v10548_v44  ;;  %1379 = vmatpush.msra.mxu3 %v10549_v15 }
 0x2d9   :  { %1316 = vmatpush.msra.mxu1 %v10550_v39  ;;  %1245 = vmatpush.msra.mxu0 %v7883_v28 }
 0x2da   :  { %1350 = vmatpush.msra.mxu2 %v10551_v17  ;;  %1381 = vmatpush.msra.mxu3 %v10552_v35 }
 0x2db   :  { %1445 = vmatpush.msrb.mxu1 %v7866_v21  ;;  %1247 = vmatpush.msra.mxu0 %v10549_v15 }
 0x2dc   :  { %1353 = vmatpush.msra.mxu2 %v10553_v51  ;;  %1383 = vmatpush.msra.mxu3 %v10554_v45 }
 0x2dd   :  { %1447 = vmatpush.msrb.mxu1 %v7868_v22  ;;  %1249 = vmatpush.msra.mxu0 %v10552_v35 }
 0x2de   :  { %1474 = vmatpush.msrb.mxu2 %v7979_v62  ;;  %1511 = vmatpush.msrb.mxu3 %v10555_v50 }
 0x2df   :  { %1449 = vmatpush.msrb.mxu1 %v7870_v23  ;;  %1251 = vmatpush.msra.mxu0 %v10554_v45 }
 0x2e0   :  { %1476 = vmatpush.msrb.mxu2 %v7981_v63  ;;  %1517 = vmatpush.msrb.mxu3 %v10556_v18 }
 0x2e1   :  { %1451 = vmatpush.msrb.mxu1 %v7881_v27  ;;  %1402 = vmatpush.msrb.mxu0 %v10557_v59 }
 0x2e2   :  { %1478 = vmatpush.msrb.mxu2 %v8047_v19  ;;  %1523 = vmatpush.msrb.mxu3 %v10558_v10 }
 0x2e3   :  { %1453 = vmatpush.msrb.mxu1 %v7883_v28  ;;  %1406 = vmatpush.msrb.mxu0 %v10559_v6  ;;  %v7580_v28 = vld [vmem:[%s10428_s0 + $0x8] sm:$0xf] }
 0x2e4   :  { %1480 = vmatpush.msrb.mxu2 %v8072_v30  ;;  %1529 = vmatpush.msrb.mxu3 %v10560_v29 }
 0x2e5   :  { %1455 = vmatpush.msrb.mxu1 %v10549_v15  ;;  %1410 = vmatpush.msrb.mxu0 %v10561_v38 }
 0x2e6   :  { %1482 = vmatpush.msrb.mxu2 %v8084_v48  ;;  %1535 = vmatpush.msrb.mxu3 %v10562_v1  ;;  %v10570_v1 = vld [vmem:[#allocation22_spill] sm:$0xff] }
 0x2e7   :  { %1457 = vmatpush.msrb.mxu1 %v10552_v35  ;;  %1414 = vmatpush.msrb.mxu0 %v10563_v24 }
 0x2e8   :  { %1484 = vmatpush.msrb.mxu2 %v8098_v58  ;;  %1541 = vmatpush.msrb.mxu3 %v10564_v56 }
 0x2e9   :  { %1459 = vmatpush.msrb.mxu1 %v10554_v45  ;;  %1418 = vmatpush.msrb.mxu0 %v10565_v42 }
 0x2ea   :  { %1486 = vmatpush.msrb.mxu2 %v8114_v13  ;;  %1547 = vmatpush.msrb.mxu3 %v10566_v43 }
 0x2eb   :  { %1422 = vmatpush.msrb.mxu0 %v10567_v40 }
 0x2ec   :  { %1488 = vmatpush.msrb.mxu2 %v8128_v46  ;;  %1553 = vmatpush.msrb.mxu3 %v10568_v25 }
 0x2ed   :  { %1426 = vmatpush.msrb.mxu0 %v10569_v16 }
 0x2ef   :  { %1430 = vmatpush.msrb.mxu0 %v10570_v1 }
 0x332   :  { %v771_v24 = vpop.f32.mrf.mxu1 }
 0x33a   :  { %v710_v38 = vpop.f32.mrf.mxu0  ;;  %v809_v29 = vpop.f32.mrf.mxu2 }
 0x33b   :  { %v914_v10 = vpop.f32.mrf.mxu1  ;;  %v772_v42 = vadd.f32 %v771_v24, %v710_v38 }
 0x33c   :  { %v840_v6 = vpop.f32.mrf.mxu3 }
 0x33d   :  { %v810_v50 = vadd.f32 %v809_v29, %v772_v42 }
 0x33f   :  { %v841_v35 = vadd.f32 %v840_v6, %v810_v50 }
 0x343   :  { %v947_v59 = vpop.f32.mrf.mxu2 }
 0x344   :  { %v885_v56 = vpop.f32.mrf.mxu0 }
 0x345   :  { %v1077_v40 = vpop.f32.mrf.mxu1  ;;  %v886_v16 = vadd.f32 %v885_v56, %v841_v35 }
 0x346   :  { %v1008_v18 = vpop.f32.mrf.mxu3 }
 0x347   :  { %v1009_v45 = vadd.f32 %v1008_v18, %v947_v59  ;;  %v915_v44 = vadd.f32 %v914_v10, %v886_v16 }
 0x34c   :  { %v1046_v43 = vpop.f32.mrf.mxu0 }
 0x34d   :  { %v1047_v51 = vadd.f32 %v1046_v43, %v1009_v45  ;;  %v1122_v17 = vpop.f32.mrf.mxu2 }
 0x34f   :  { %v1078_v25 = vadd.f32 %v1077_v40, %v1047_v51  ;;  %v1151_v1 = vpop.f32.mrf.mxu3 }
 0x351   :  { %v1123_v39 = vadd.f32 %v1122_v17, %v1078_v25 }
 0x353   :  { %v1152_v15 = vadd.f32 %v1151_v1, %v1123_v39 }
 0x355   :  { %v1156_v14 = vrot.slane %v1152_v15, 6 }
 0x357   :  { %v1157_v38 = vsel %vm608_vm11, %v915_v44, %v1156_v14 }
 0x358   :  { %v1159_v29 = vadd.f32 %v7580_v28, %v1157_v38 }
 0x35a   :  { %1183 = vrot.lane.b32.xlu1 %v1159_v29, %s7781_s5  ;;  %v7581_v45 = vmul.f32 -1.442695, %v1159_v29  ;;  %v1180_v17 = vrot.slane %v1159_v29, 2 }
 0x35c   :  { %7633 = vpow2.f32 %v7581_v45 }
 0x362   :  { %v7634_v50 = vpop.eup %7633 }
 0x363   :  { %v1163_v51 = vadd.f32 1.0, %v7634_v50 }
 0x365   :  { %7635 = vrcp.f32 %v1163_v51  ;;  %v1175_v15 = vand.u32 2147483648, %v1163_v51  ;;  %v1173_v10 = vand.u32 2147483647, %v1163_v51  ;;  %vm1169_vm5 = vweird.f32 %v1163_v51 }
 0x366   :  { %7637 = vtanh.f32 %v1180_v17 }
 0x367   :  { %v1176_v28 = vor.u32 1.1754944e-38, %v1175_v15  ;;  %vm1174_vm7 = vcmp.eq.f32.partialorder %v1173_v10, 8.507059e+37 }
 0x36b   :  { %v7636_v35 = vpop.eup %7635 }
 0x36c   :  { %v1165_v18 = vmul.f32 %v7636_v35, %v1163_v51  ;;  %vm1170_vm4 = vweird.f32 %v7636_v35  ;;  %v7638_v44 = vpop.eup %7637 }
 0x36d   :  { %vm1171_vm6 = vmor %vm1169_vm5, %vm1170_vm4 }
 0x36e   :  { %v1166_v39 = vsub.f32 1.0, %v1165_v18 }
 0x370   :  { %v1167_v59 = vmul.f32 %v7636_v35, %v1166_v39 }
 0x372   :  { %v1168_v6 = vadd.f32 %v7636_v35, %v1167_v59 }
 0x374   :  { %v1172_v14 = vsel %vm1171_vm6, %v7636_v35, %v1168_v6 }
 0x375   :  { %v1177_v1 = vsel %vm1174_vm7, %v1176_v28, %v1172_v14 }
 0x376   :  { %v1207_v24 = vmul.f32 %v7638_v44, %v1177_v1  ;;  %v1206_v56 = vmul.f32 %v1177_v1, %v8271_v41 }
 0x378   :  { %1209 = vrot.lane.b32.xlu0 %v1207_v24, %s7781_s5 }
 0x3cc   :  { %v1184_v25 = vpop.permute.xlu1 %1183 }
 0x3cd   :  { %v1185_v16 = vrot.slane %v1184_v25, 2  ;;  %v10572_v25 = vld [vmem:[#allocation23_spill] sm:$0xff] }
 0x3cf   :  { %v7582_v38 = vmul.f32 -1.442695, %v1185_v16  ;;  %v10573_v16 = vld [vmem:[#allocation10_spill] sm:$0xff] }
 0x3ea   :  { %v1210_v42 = vpop.permute.xlu0 %1209 }
 0x3eb   :  { %v8381_v43 = vadd.f32 %v1210_v42, %v1206_v56 }
 0x3ed   :  { %7639 = vtanh.f32 %v8381_v43 }
 0x3ee   :  { %7641 = vpow2.f32 %v7582_v38  ;;  %v10574_v38 = vld [vmem:[#allocation8_spill] sm:$0xff] }
 0x3f3   :  { %v7640_v40 = vpop.eup %7639 }
 0x3f4   :  { %1215 = vrot.lane.b32.xlu2 %v7640_v40, %s7781_s5  ;;  %v7642_v29 = vpop.eup %7641  ;;  %v10571_v40 = vld [vmem:[#allocation7_spill] sm:$0xff] }
 0x3f5   :  { %v1190_v45 = vadd.f32 1.0, %v7642_v29  ;;  %v10575_v29 = vld [vmem:[#allocation26_spill] sm:$0xff] }
 0x3f7   :  { %7643 = vrcp.f32 %v1190_v45  ;;  %v1202_v18 = vand.u32 2147483648, %v1190_v45  ;;  %vm1196_vm13 = vweird.f32 %v1190_v45  ;;  %v1200_v39 = vand.u32 2147483647, %v1190_v45 }
 0x3f9   :  { %v1203_v59 = vor.u32 1.1754944e-38, %v1202_v18  ;;  %vm1201_vm15 = vcmp.eq.f32.partialorder %v1200_v39, 8.507059e+37  ;;  %v10582_v18 = vld [vmem:[#allocation12_spill] sm:$0xff]  ;;  %v10583_v39 = vld [vmem:[#allocation27_spill] sm:$0xff] }
 0x3fd   :  { %v7644_v50 = vpop.eup %7643 }
 0x3fe   :  { %v1192_v51 = vmul.f32 %v7644_v50, %v1190_v45  ;;  %vm1197_vm12 = vweird.f32 %v7644_v50  ;;  %v10576_v45 = vld [vmem:[#allocation17_spill] sm:$0xff] }
 0x3ff   :  { %vm1198_vm14 = vmor %vm1196_vm13, %vm1197_vm12 }
 0x400   :  { %v1193_v35 = vsub.f32 1.0, %v1192_v51  ;;  %v10578_v51 = vld [vmem:[#allocation19_spill] sm:$0xff] }
 0x402   :  { %v1194_v17 = vmul.f32 %v7644_v50, %v1193_v35  ;;  %v10579_v35 = vld [vmem:[#allocation11_spill] sm:$0xff] }
 0x404   :  { %v1195_v41 = vadd.f32 %v7644_v50, %v1194_v17  ;;  %v10580_v17 = vld [vmem:[#allocation24_spill] sm:$0xff] }
 0x406   :  { %v1199_v15 = vsel %vm1198_vm14, %v7644_v50, %v1195_v41  ;;  %v10577_v50 = vld [vmem:[#allocation9_spill] sm:$0xff] }
 0x407   :  { %v1204_v10 = vsel %vm1201_vm15, %v1203_v59, %v1199_v15  ;;  %v10581_v41 = vld [vmem:[#allocation25_spill] sm:$0xff]  ;;  %v10585_v59 = vld [vmem:[#allocation28_spill] sm:$0xff] }
 0x408   :  { %v10584_v15 = vld [vmem:[#allocation13_spill] sm:$0xff] }
 0x44e   :  { %v1216_v6 = vpop.permute.xlu2 %1215 }
 0x44f   :  { %v1218_v28 = vmul.f32 %v1216_v6, %v1204_v10  ;;  %v10586_v10 = vld [vmem:[#allocation14_spill] sm:$0xff]  ;;  %v10587_v6 = vld [vmem:[#allocation29_spill] sm:$0xff] }
 0x451   :  { %1220 = vst.msk [vmem:[#allocation2 + $0x4] sm:$0x3] %vm120_vm8, %v1218_v28  ;;  %v1226_v14 = vsel %vm127_vm9, %v1218_v28, 0 }
 0x452   :  { %1222 = vst.msk [vmem:[#allocation2 + $0xa] sm:$0x3] %vm123_vm10, %v1218_v28  ;;  %v1252_v44 = vand.u32 4294901760, %v1226_v14  ;;  %v10588_v28 = vld [vmem:[#allocation15_spill] sm:$0xff] }
 0x454   :  { %v1253_v1 = vsub.f32 %v1226_v14, %v1252_v44  ;;  %1318 = vmatmul.f32.vlgmr.msra.gmra.mxu1 %v1252_v44  ;;  %v10589_v14 = vld [vmem:[#allocation30_spill] sm:$0xff] }
 0x455   :  { %1606 = vmatpush.msra.mxu1 %v7979_v62 }
 0x456   :  { %1356 = vmatmul.f32.vlgmr.msra.gmra.mxu2 %v1253_v1  ;;  %v1254_v24 = vand.u32 4294901760, %v1253_v1 }
 0x457   :  { %1608 = vmatpush.msra.mxu1 %v7981_v63  ;;  %1639 = vmatpush.msra.mxu2 %v8010_v7 }
 0x458   :  { %1387 = vmatmul.f32.vlgmr.msra.gmra.mxu3 %v1254_v24  ;;  %v1255_v56 = vsub.f32 %v1253_v1, %v1254_v24 }
 0x459   :  { %1610 = vmatpush.msra.mxu1 %v8047_v19  ;;  %1643 = vmatpush.msra.mxu2 %v8013_v8 }
 0x45a   :  { %1682 = vmatpush.msra.mxu3 %v7979_v62  ;;  %v1256_v42 = vand.u32 4294901760, %v1255_v56  ;;  %v10593_v56 = vld [vmem:[#allocation32_spill] sm:$0xff] }
 0x45b   :  { %1612 = vmatpush.msra.mxu1 %v8072_v30  ;;  %1647 = vmatpush.msra.mxu2 %v8082_v47 }
 0x45c   :  { %1684 = vmatpush.msra.mxu3 %v7981_v63  ;;  %1257 = vmatmul.f32.vlgmr.msra.gmra.mxu0 %v1256_v42 }
 0x45d   :  { %1461 = vmatmul.f32.vlgmr.msrb.gmra.mxu1 %v1252_v44  ;;  %1569 = vmatpush.msra.mxu0 %v7996_v3 }
 0x45e   :  { %1614 = vmatpush.msra.mxu1 %v8084_v48  ;;  %1651 = vmatpush.msra.mxu2 %v8096_v57 }
 0x45f   :  { %1686 = vmatpush.msra.mxu3 %v8047_v19  ;;  %1494 = vmatmul.f32.vlgmr.msrb.gmra.mxu2 %v1256_v42  ;;  %v10594_v42 = vld [vmem:[#allocation20_spill] sm:$0xff] }
 0x460   :  { %1572 = vmatpush.msra.mxu0 %v7999_v4  ;;  %1616 = vmatpush.msra.mxu1 %v8098_v58 }
 0x461   :  { %1655 = vmatpush.msra.mxu2 %v8112_v12  ;;  %1688 = vmatpush.msra.mxu3 %v8072_v30 }
 0x462   :  { %1555 = vmatmul.f32.vlgmr.msrb.gmra.mxu3 %v1252_v44  ;;  %1575 = vmatpush.msra.mxu0 %v8075_v31 }
 0x463   :  { %1618 = vmatpush.msra.mxu1 %v8114_v13  ;;  %1659 = vmatpush.msra.mxu2 %v8134_v52 }
 0x464   :  { %1690 = vmatpush.msra.mxu3 %v8084_v48  ;;  %1578 = vmatpush.msra.mxu0 %v8087_v49 }
 0x465   :  { %1620 = vmatpush.msra.mxu1 %v8128_v46  ;;  %1663 = vmatpush.msra.mxu2 %v8141_v11 }
 0x466   :  { %1692 = vmatpush.msra.mxu3 %v8098_v58  ;;  %1432 = vmatmul.f32.vlgmr.msrb.gmra.mxu0 %v1252_v44 }
 0x467   :  { %1624 = vmatmul.f32.vlgmr.msra.gmra.mxu1 %v1254_v24  ;;  %1581 = vmatpush.msra.mxu0 %v8101_v0  ;;  %v10592_v24 = vld [vmem:[#allocation18_spill] sm:$0xff] }
 0x468   :  { %1667 = vmatpush.msra.mxu2 %v8152_v26  ;;  %1694 = vmatpush.msra.mxu3 %v8114_v13 }
 0x469   :  { %1669 = vmatmul.f32.vlgmr.msra.gmra.mxu2 %v1252_v44  ;;  %1584 = vmatpush.msra.mxu0 %v8117_v20 }
 0x46a   :  { %1696 = vmatpush.msra.mxu3 %v8128_v46  ;;  %1822 = vmatpush.msrb.mxu1 %v7959_v54 }
 0x46b   :  { %1698 = vmatmul.f32.vlgmr.msra.gmra.mxu3 %v1252_v44  ;;  %1587 = vmatpush.msra.mxu0 %v8131_v53  ;;  %v10590_v44 = vld [vmem:[#allocation16_spill] sm:$0xff] }
 0x46c   :  { %1828 = vmatpush.msrb.mxu1 %v7961_v55  ;;  %1880 = vmatpush.msrb.mxu2 %v7894_v32 }
 0x46d   :  { %1590 = vmatpush.msra.mxu0 %v8144_v60  ;;  %1917 = vmatpush.msrb.mxu3 %v7866_v21 }
 0x46e   :  { %1593 = vmatmul.f32.vlgmr.msra.gmra.mxu0 %v1253_v1  ;;  %1834 = vmatpush.msrb.mxu1 %v7976_v61  ;;  %v10591_v1 = vld [vmem:[#allocation31_spill] sm:$0xff] }
 0x46f   :  { %1883 = vmatpush.msrb.mxu2 %v7897_v33  ;;  %1919 = vmatpush.msrb.mxu3 %v7868_v22 }
 0x470   :  { %1840 = vmatpush.msrb.mxu1 %v7992_v2  ;;  %1785 = vmatpush.msrb.mxu0 %v7866_v21 }
 0x471   :  { %1886 = vmatpush.msrb.mxu2 %v7900_v34  ;;  %1921 = vmatpush.msrb.mxu3 %v7870_v23 }
 0x472   :  { %1846 = vmatpush.msrb.mxu1 %v8004_v5  ;;  %1787 = vmatpush.msrb.mxu0 %v7868_v22 }
 0x473   :  { %1889 = vmatpush.msrb.mxu2 %v7907_v36  ;;  %1923 = vmatpush.msrb.mxu3 %v7881_v27 }
 0x474   :  { %1852 = vmatpush.msrb.mxu1 %v8018_v9  ;;  %1789 = vmatpush.msrb.mxu0 %v7870_v23 }
 0x475   :  { %1892 = vmatpush.msrb.mxu2 %v7910_v37  ;;  %1925 = vmatpush.msrb.mxu3 %v10571_v40 }
 0x476   :  { %1858 = vmatpush.msrb.mxu1 %v10572_v25  ;;  %1791 = vmatpush.msrb.mxu0 %v7881_v27 }
 0x477   :  { %1895 = vmatpush.msrb.mxu2 %v10573_v16  ;;  %1927 = vmatpush.msrb.mxu3 %v10574_v38 }
 0x478   :  { %1864 = vmatpush.msrb.mxu1 %v10575_v29  ;;  %1793 = vmatpush.msrb.mxu0 %v10571_v40 }
 0x479   :  { %1898 = vmatpush.msrb.mxu2 %v10576_v45  ;;  %1929 = vmatpush.msrb.mxu3 %v10577_v50 }
 0x47a   :  { %1993 = vmatpush.msra.mxu1 %v7866_v21  ;;  %1795 = vmatpush.msrb.mxu0 %v10574_v38 }
 0x47b   :  { %1901 = vmatpush.msrb.mxu2 %v10578_v51  ;;  %1931 = vmatpush.msrb.mxu3 %v10579_v35 }
 0x47c   :  { %1995 = vmatpush.msra.mxu1 %v7868_v22  ;;  %1797 = vmatpush.msrb.mxu0 %v10577_v50 }
 0x47d   :  { %2022 = vmatpush.msra.mxu2 %v7979_v62  ;;  %2059 = vmatpush.msra.mxu3 %v10580_v17 }
 0x47e   :  { %1997 = vmatpush.msra.mxu1 %v7870_v23  ;;  %1799 = vmatpush.msrb.mxu0 %v10579_v35 }
 0x47f   :  { %2024 = vmatpush.msra.mxu2 %v7981_v63  ;;  %2065 = vmatpush.msra.mxu3 %v10581_v41 }
 0x480   :  { %1999 = vmatpush.msra.mxu1 %v7881_v27  ;;  %1950 = vmatpush.msra.mxu0 %v10582_v18 }
 0x481   :  { %2026 = vmatpush.msra.mxu2 %v8047_v19  ;;  %2071 = vmatpush.msra.mxu3 %v10583_v39 }
 0x482   :  { %2001 = vmatpush.msra.mxu1 %v10571_v40  ;;  %1954 = vmatpush.msra.mxu0 %v10584_v15  ;;  %v7583_v40 = vld [vmem:[%s10428_s0 + $0xc] sm:$0xf] }
 0x483   :  { %2028 = vmatpush.msra.mxu2 %v8072_v30  ;;  %2077 = vmatpush.msra.mxu3 %v10585_v59 }
 0x484   :  { %2003 = vmatpush.msra.mxu1 %v10574_v38  ;;  %1958 = vmatpush.msra.mxu0 %v10586_v10 }
 0x485   :  { %2030 = vmatpush.msra.mxu2 %v8084_v48  ;;  %2083 = vmatpush.msra.mxu3 %v10587_v6  ;;  %v10595_v6 = vld [vmem:[#allocation22_spill] sm:$0xff] }
 0x486   :  { %2005 = vmatpush.msra.mxu1 %v10577_v50  ;;  %1962 = vmatpush.msra.mxu0 %v10588_v28 }
 0x487   :  { %2032 = vmatpush.msra.mxu2 %v8098_v58  ;;  %2089 = vmatpush.msra.mxu3 %v10589_v14 }
 0x488   :  { %2007 = vmatpush.msra.mxu1 %v10579_v35  ;;  %1966 = vmatpush.msra.mxu0 %v10590_v44 }
 0x489   :  { %2034 = vmatpush.msra.mxu2 %v8114_v13  ;;  %2095 = vmatpush.msra.mxu3 %v10591_v1 }
 0x48a   :  { %1970 = vmatpush.msra.mxu0 %v10592_v24 }
 0x48b   :  { %2036 = vmatpush.msra.mxu2 %v8128_v46  ;;  %2101 = vmatpush.msra.mxu3 %v10593_v56 }
 0x48c   :  { %1974 = vmatpush.msra.mxu0 %v10594_v42 }
 0x48e   :  { %1978 = vmatpush.msra.mxu0 %v10595_v6 }
 0x4d1   :  { %v1319_v28 = vpop.f32.mrf.mxu1 }
 0x4d9   :  { %v1258_v10 = vpop.f32.mrf.mxu0  ;;  %v1357_v59 = vpop.f32.mrf.mxu2 }
 0x4da   :  { %v1462_v39 = vpop.f32.mrf.mxu1  ;;  %v1320_v44 = vadd.f32 %v1319_v28, %v1258_v10 }
 0x4db   :  { %v1388_v15 = vpop.f32.mrf.mxu3 }
 0x4dc   :  { %v1358_v17 = vadd.f32 %v1357_v59, %v1320_v44 }
 0x4de   :  { %v1389_v50 = vadd.f32 %v1388_v15, %v1358_v17 }
 0x4e2   :  { %v1495_v18 = vpop.f32.mrf.mxu2 }
 0x4e3   :  { %v1433_v14 = vpop.f32.mrf.mxu0 }
 0x4e4   :  { %v1625_v24 = vpop.f32.mrf.mxu1  ;;  %v1434_v42 = vadd.f32 %v1433_v14, %v1389_v50 }
 0x4e5   :  { %v1556_v41 = vpop.f32.mrf.mxu3 }
 0x4e6   :  { %v1557_v35 = vadd.f32 %v1556_v41, %v1495_v18  ;;  %v1463_v16 = vadd.f32 %v1462_v39, %v1434_v42 }
 0x4eb   :  { %v1594_v1 = vpop.f32.mrf.mxu0 }
 0x4ec   :  { %v1595_v51 = vadd.f32 %v1594_v1, %v1557_v35  ;;  %v1670_v45 = vpop.f32.mrf.mxu2 }
 0x4ee   :  { %v1626_v56 = vadd.f32 %v1625_v24, %v1595_v51  ;;  %v1699_v6 = vpop.f32.mrf.mxu3 }
 0x4f0   :  { %v1671_v29 = vadd.f32 %v1670_v45, %v1626_v56 }
 0x4f2   :  { %v1700_v38 = vadd.f32 %v1699_v6, %v1671_v29 }
 0x4f4   :  { %v1704_v25 = vrot.slane %v1700_v38, 6 }
 0x4f6   :  { %v1705_v10 = vsel %vm608_vm11, %v1463_v16, %v1704_v25 }
 0x4f7   :  { %v1707_v59 = vadd.f32 %v7583_v40, %v1705_v10 }
 0x4f9   :  { %1731 = vrot.lane.b32.xlu1 %v1707_v59, %s7781_s5  ;;  %v7584_v35 = vmul.f32 -1.442695, %v1707_v59  ;;  %v1728_v45 = vrot.slane %v1707_v59, 2 }
 0x4fb   :  { %7645 = vpow2.f32 %v7584_v35 }
 0x501   :  { %v7646_v17 = vpop.eup %7645 }
 0x502   :  { %v1711_v51 = vadd.f32 1.0, %v7646_v17 }
 0x504   :  { %7647 = vrcp.f32 %v1711_v51  ;;  %v1723_v38 = vand.u32 2147483648, %v1711_v51  ;;  %v1721_v39 = vand.u32 2147483647, %v1711_v51  ;;  %vm1717_vm1 = vweird.f32 %v1711_v51 }
 0x505   :  { %7649 = vtanh.f32 %v1728_v45 }
 0x506   :  { %v1724_v40 = vor.u32 1.1754944e-38, %v1723_v38  ;;  %vm1722_vm3 = vcmp.eq.f32.partialorder %v1721_v39, 8.507059e+37 }
 0x50a   :  { %v7648_v50 = vpop.eup %7647 }
 0x50b   :  { %v1713_v41 = vmul.f32 %v7648_v50, %v1711_v51  ;;  %vm1718_vm0 = vweird.f32 %v7648_v50  ;;  %v7650_v16 = vpop.eup %7649 }
 0x50c   :  { %vm1719_vm2 = vmor %vm1717_vm1, %vm1718_vm0 }
 0x50d   :  { %v1714_v29 = vsub.f32 1.0, %v1713_v41 }
 0x50f   :  { %v1715_v18 = vmul.f32 %v7648_v50, %v1714_v29 }
 0x511   :  { %v1716_v15 = vadd.f32 %v7648_v50, %v1715_v18 }
 0x513   :  { %v1720_v25 = vsel %vm1719_vm2, %v7648_v50, %v1716_v15 }
 0x514   :  { %v1725_v6 = vsel %vm1722_vm3, %v1724_v40, %v1720_v25 }
 0x515   :  { %v1755_v28 = vmul.f32 %v7650_v16, %v1725_v6  ;;  %v1754_v14 = vmul.f32 %v1725_v6, %v8381_v43 }
 0x517   :  { %1757 = vrot.lane.b32.xlu0 %v1755_v28, %s7781_s5 }
 0x56b   :  { %v1732_v56 = vpop.permute.xlu1 %1731 }
 0x56c   :  { %v1733_v42 = vrot.slane %v1732_v56, 2  ;;  %v10597_v56 = vld [vmem:[#allocation23_spill] sm:$0xff] }
 0x56e   :  { %v7585_v10 = vmul.f32 -1.442695, %v1733_v42  ;;  %v10598_v42 = vld [vmem:[#allocation10_spill] sm:$0xff] }
 0x589   :  { %v1758_v44 = vpop.permute.xlu0 %1757 }
 0x58a   :  { %v8491_v1 = vadd.f32 %v1758_v44, %v1754_v14 }
 0x58c   :  { %7651 = vtanh.f32 %v8491_v1 }
 0x58d   :  { %7653 = vpow2.f32 %v7585_v10  ;;  %v10599_v10 = vld [vmem:[#allocation8_spill] sm:$0xff] }
 0x592   :  { %v7652_v24 = vpop.eup %7651 }
 0x593   :  { %1763 = vrot.lane.b32.xlu2 %v7652_v24, %s7781_s5  ;;  %v7654_v59 = vpop.eup %7653  ;;  %v10596_v24 = vld [vmem:[#allocation7_spill] sm:$0xff] }
 0x594   :  { %v1738_v35 = vadd.f32 1.0, %v7654_v59  ;;  %v10600_v59 = vld [vmem:[#allocation26_spill] sm:$0xff] }
 0x596   :  { %7655 = vrcp.f32 %v1738_v35  ;;  %v1750_v41 = vand.u32 2147483648, %v1738_v35  ;;  %vm1744_vm5 = vweird.f32 %v1738_v35  ;;  %v1748_v29 = vand.u32 2147483647, %v1738_v35 }
 0x598   :  { %v1751_v18 = vor.u32 1.1754944e-38, %v1750_v41  ;;  %vm1749_vm7 = vcmp.eq.f32.partialorder %v1748_v29, 8.507059e+37  ;;  %v10607_v41 = vld [vmem:[#allocation12_spill] sm:$0xff]  ;;  %v10608_v29 = vld [vmem:[#allocation27_spill] sm:$0xff] }
 0x59c   :  { %v7656_v17 = vpop.eup %7655 }
 0x59d   :  { %v1740_v51 = vmul.f32 %v7656_v17, %v1738_v35  ;;  %vm1745_vm4 = vweird.f32 %v7656_v17  ;;  %v10601_v35 = vld [vmem:[#allocation17_spill] sm:$0xff] }
 0x59e   :  { %vm1746_vm6 = vmor %vm1744_vm5, %vm1745_vm4 }
 0x59f   :  { %v1741_v50 = vsub.f32 1.0, %v1740_v51  ;;  %v10603_v51 = vld [vmem:[#allocation19_spill] sm:$0xff] }
 0x5a1   :  { %v1742_v45 = vmul.f32 %v7656_v17, %v1741_v50  ;;  %v10604_v50 = vld [vmem:[#allocation11_spill] sm:$0xff] }
 0x5a3   :  { %v1743_v43 = vadd.f32 %v7656_v17, %v1742_v45  ;;  %v10605_v45 = vld [vmem:[#allocation24_spill] sm:$0xff] }
 0x5a5   :  { %v1747_v38 = vsel %vm1746_vm6, %v7656_v17, %v1743_v43  ;;  %v10602_v17 = vld [vmem:[#allocation9_spill] sm:$0xff] }
 0x5a6   :  { %v1752_v39 = vsel %vm1749_vm7, %v1751_v18, %v1747_v38  ;;  %v10606_v43 = vld [vmem:[#allocation25_spill] sm:$0xff]  ;;  %v10610_v18 = vld [vmem:[#allocation28_spill] sm:$0xff] }
 0x5a7   :  { %v10609_v38 = vld [vmem:[#allocation13_spill] sm:$0xff] }
 0x5ed   :  { %v1764_v15 = vpop.permute.xlu2 %1763 }
 0x5ee   :  { %v1766_v40 = vmul.f32 %v1764_v15, %v1752_v39  ;;  %v10611_v39 = vld [vmem:[#allocation14_spill] sm:$0xff]  ;;  %v10612_v15 = vld [vmem:[#allocation29_spill] sm:$0xff] }
 0x5f0   :  { %1768 = vst.msk [vmem:[#allocation2 + $0x6] sm:$0x3] %vm120_vm8, %v1766_v40  ;;  %v1774_v25 = vsel %vm127_vm9, %v1766_v40, 0 }
 0x5f1   :  { %1770 = vst.msk [vmem:[#allocation2 + $0x8] sm:$0x3] %vm123_vm10, %v1766_v40  ;;  %v1800_v16 = vand.u32 4294901760, %v1774_v25  ;;  %v10613_v40 = vld [vmem:[#allocation15_spill] sm:$0xff] }
 0x5f3   :  { %v1801_v6 = vsub.f32 %v1774_v25, %v1800_v16  ;;  %1866 = vmatmul.f32.vlgmr.msrb.gmra.mxu1 %v1800_v16  ;;  %v10614_v25 = vld [vmem:[#allocation30_spill] sm:$0xff] }
 0x5f4   :  { %2154 = vmatpush.msrb.mxu1 %v7979_v62 }
 0x5f5   :  { %1904 = vmatmul.f32.vlgmr.msrb.gmra.mxu2 %v1801_v6  ;;  %v1802_v28 = vand.u32 4294901760, %v1801_v6 }
 0x5f6   :  { %2156 = vmatpush.msrb.mxu1 %v7981_v63  ;;  %2187 = vmatpush.msrb.mxu2 %v8010_v7 }
 0x5f7   :  { %1935 = vmatmul.f32.vlgmr.msrb.gmra.mxu3 %v1802_v28  ;;  %v1803_v14 = vsub.f32 %v1801_v6, %v1802_v28 }
 0x5f8   :  { %2158 = vmatpush.msrb.mxu1 %v8047_v19  ;;  %2191 = vmatpush.msrb.mxu2 %v8013_v8 }
 0x5f9   :  { %2230 = vmatpush.msrb.mxu3 %v7979_v62  ;;  %v1804_v44 = vand.u32 4294901760, %v1803_v14  ;;  %v10618_v14 = vld [vmem:[#allocation32_spill] sm:$0xff] }
 0x5fa   :  { %2160 = vmatpush.msrb.mxu1 %v8072_v30  ;;  %2195 = vmatpush.msrb.mxu2 %v8082_v47 }
 0x5fb   :  { %2232 = vmatpush.msrb.mxu3 %v7981_v63  ;;  %1805 = vmatmul.f32.vlgmr.msrb.gmra.mxu0 %v1804_v44 }
 0x5fc   :  { %2009 = vmatmul.f32.vlgmr.msra.gmra.mxu1 %v1800_v16  ;;  %2117 = vmatpush.msrb.mxu0 %v7996_v3 }
 0x5fd   :  { %2162 = vmatpush.msrb.mxu1 %v8084_v48  ;;  %2199 = vmatpush.msrb.mxu2 %v8096_v57 }
 0x5fe   :  { %2234 = vmatpush.msrb.mxu3 %v8047_v19  ;;  %2042 = vmatmul.f32.vlgmr.msra.gmra.mxu2 %v1804_v44  ;;  %v10619_v44 = vld [vmem:[#allocation20_spill] sm:$0xff] }
 0x5ff   :  { %2120 = vmatpush.msrb.mxu0 %v7999_v4  ;;  %2164 = vmatpush.msrb.mxu1 %v8098_v58 }
 0x600   :  { %2203 = vmatpush.msrb.mxu2 %v8112_v12  ;;  %2236 = vmatpush.msrb.mxu3 %v8072_v30 }
 0x601   :  { %2103 = vmatmul.f32.vlgmr.msra.gmra.mxu3 %v1800_v16  ;;  %2123 = vmatpush.msrb.mxu0 %v8075_v31 }
 0x602   :  { %2166 = vmatpush.msrb.mxu1 %v8114_v13  ;;  %2207 = vmatpush.msrb.mxu2 %v8134_v52 }
 0x603   :  { %2238 = vmatpush.msrb.mxu3 %v8084_v48  ;;  %2126 = vmatpush.msrb.mxu0 %v8087_v49 }
 0x604   :  { %2168 = vmatpush.msrb.mxu1 %v8128_v46  ;;  %2211 = vmatpush.msrb.mxu2 %v8141_v11 }
 0x605   :  { %2240 = vmatpush.msrb.mxu3 %v8098_v58  ;;  %1980 = vmatmul.f32.vlgmr.msra.gmra.mxu0 %v1800_v16 }
 0x606   :  { %2172 = vmatmul.f32.vlgmr.msrb.gmra.mxu1 %v1802_v28  ;;  %2129 = vmatpush.msrb.mxu0 %v8101_v0  ;;  %v10617_v28 = vld [vmem:[#allocation18_spill] sm:$0xff] }
 0x607   :  { %2215 = vmatpush.msrb.mxu2 %v8152_v26  ;;  %2242 = vmatpush.msrb.mxu3 %v8114_v13 }
 0x608   :  { %2217 = vmatmul.f32.vlgmr.msrb.gmra.mxu2 %v1800_v16  ;;  %2132 = vmatpush.msrb.mxu0 %v8117_v20 }
 0x609   :  { %2244 = vmatpush.msrb.mxu3 %v8128_v46  ;;  %2368 = vmatpush.msra.mxu1 %v7959_v54 }
 0x60a   :  { %2246 = vmatmul.f32.vlgmr.msrb.gmra.mxu3 %v1800_v16  ;;  %2135 = vmatpush.msrb.mxu0 %v8131_v53  ;;  %v10615_v16 = vld [vmem:[#allocation16_spill] sm:$0xff] }
 0x60b   :  { %2374 = vmatpush.msra.mxu1 %v7961_v55  ;;  %2426 = vmatpush.msra.mxu2 %v7894_v32 }
 0x60c   :  { %2138 = vmatpush.msrb.mxu0 %v8144_v60  ;;  %2463 = vmatpush.msra.mxu3 %v7866_v21 }
 0x60d   :  { %2141 = vmatmul.f32.vlgmr.msrb.gmra.mxu0 %v1801_v6  ;;  %2380 = vmatpush.msra.mxu1 %v7976_v61  ;;  %v10616_v6 = vld [vmem:[#allocation31_spill] sm:$0xff] }
 0x60e   :  { %2429 = vmatpush.msra.mxu2 %v7897_v33  ;;  %2465 = vmatpush.msra.mxu3 %v7868_v22 }
 0x60f   :  { %2386 = vmatpush.msra.mxu1 %v7992_v2  ;;  %2331 = vmatpush.msra.mxu0 %v7866_v21 }
 0x610   :  { %2432 = vmatpush.msra.mxu2 %v7900_v34  ;;  %2467 = vmatpush.msra.mxu3 %v7870_v23 }
 0x611   :  { %2392 = vmatpush.msra.mxu1 %v8004_v5  ;;  %2333 = vmatpush.msra.mxu0 %v7868_v22 }
 0x612   :  { %2435 = vmatpush.msra.mxu2 %v7907_v36  ;;  %2469 = vmatpush.msra.mxu3 %v7881_v27 }
 0x613   :  { %2398 = vmatpush.msra.mxu1 %v8018_v9  ;;  %2335 = vmatpush.msra.mxu0 %v7870_v23 }
 0x614   :  { %2438 = vmatpush.msra.mxu2 %v7910_v37  ;;  %2471 = vmatpush.msra.mxu3 %v10596_v24 }
 0x615   :  { %2404 = vmatpush.msra.mxu1 %v10597_v56  ;;  %2337 = vmatpush.msra.mxu0 %v7881_v27 }
 0x616   :  { %2441 = vmatpush.msra.mxu2 %v10598_v42  ;;  %2473 = vmatpush.msra.mxu3 %v10599_v10 }
 0x617   :  { %2410 = vmatpush.msra.mxu1 %v10600_v59  ;;  %2339 = vmatpush.msra.mxu0 %v10596_v24 }
 0x618   :  { %2444 = vmatpush.msra.mxu2 %v10601_v35  ;;  %2475 = vmatpush.msra.mxu3 %v10602_v17 }
 0x619   :  { %2539 = vmatpush.msrb.mxu1 %v7866_v21  ;;  %2341 = vmatpush.msra.mxu0 %v10599_v10 }
 0x61a   :  { %2447 = vmatpush.msra.mxu2 %v10603_v51  ;;  %2477 = vmatpush.msra.mxu3 %v10604_v50 }
 0x61b   :  { %2541 = vmatpush.msrb.mxu1 %v7868_v22  ;;  %2343 = vmatpush.msra.mxu0 %v10602_v17 }
 0x61c   :  { %2568 = vmatpush.msrb.mxu2 %v7979_v62  ;;  %2605 = vmatpush.msrb.mxu3 %v10605_v45 }
 0x61d   :  { %2543 = vmatpush.msrb.mxu1 %v7870_v23  ;;  %2345 = vmatpush.msra.mxu0 %v10604_v50 }
 0x61e   :  { %2570 = vmatpush.msrb.mxu2 %v7981_v63  ;;  %2611 = vmatpush.msrb.mxu3 %v10606_v43 }
 0x61f   :  { %2545 = vmatpush.msrb.mxu1 %v7881_v27  ;;  %2496 = vmatpush.msrb.mxu0 %v10607_v41 }
 0x620   :  { %2572 = vmatpush.msrb.mxu2 %v8047_v19  ;;  %2617 = vmatpush.msrb.mxu3 %v10608_v29 }
 0x621   :  { %2547 = vmatpush.msrb.mxu1 %v10596_v24  ;;  %2500 = vmatpush.msrb.mxu0 %v10609_v38  ;;  %v7586_v24 = vld [vmem:[%s10428_s0 + $0x10] sm:$0xf] }
 0x622   :  { %2574 = vmatpush.msrb.mxu2 %v8072_v30  ;;  %2623 = vmatpush.msrb.mxu3 %v10610_v18 }
 0x623   :  { %2549 = vmatpush.msrb.mxu1 %v10599_v10  ;;  %2504 = vmatpush.msrb.mxu0 %v10611_v39 }
 0x624   :  { %2576 = vmatpush.msrb.mxu2 %v8084_v48  ;;  %2629 = vmatpush.msrb.mxu3 %v10612_v15  ;;  %v10620_v15 = vld [vmem:[#allocation22_spill] sm:$0xff] }
 0x625   :  { %2551 = vmatpush.msrb.mxu1 %v10602_v17  ;;  %2508 = vmatpush.msrb.mxu0 %v10613_v40 }
 0x626   :  { %2578 = vmatpush.msrb.mxu2 %v8098_v58  ;;  %2635 = vmatpush.msrb.mxu3 %v10614_v25 }
 0x627   :  { %2553 = vmatpush.msrb.mxu1 %v10604_v50  ;;  %2512 = vmatpush.msrb.mxu0 %v10615_v16 }
 0x628   :  { %2580 = vmatpush.msrb.mxu2 %v8114_v13  ;;  %2641 = vmatpush.msrb.mxu3 %v10616_v6 }
 0x629   :  { %2516 = vmatpush.msrb.mxu0 %v10617_v28 }
 0x62a   :  { %2582 = vmatpush.msrb.mxu2 %v8128_v46  ;;  %2647 = vmatpush.msrb.mxu3 %v10618_v14 }
 0x62b   :  { %2520 = vmatpush.msrb.mxu0 %v10619_v44 }
 0x62d   :  { %2524 = vmatpush.msrb.mxu0 %v10620_v15 }
 0x670   :  { %v1867_v40 = vpop.f32.mrf.mxu1 }
 0x678   :  { %v1806_v39 = vpop.f32.mrf.mxu0  ;;  %v1905_v18 = vpop.f32.mrf.mxu2 }
 0x679   :  { %v2010_v29 = vpop.f32.mrf.mxu1  ;;  %v1868_v16 = vadd.f32 %v1867_v40, %v1806_v39 }
 0x67a   :  { %v1936_v38 = vpop.f32.mrf.mxu3 }
 0x67b   :  { %v1906_v45 = vadd.f32 %v1905_v18, %v1868_v16 }
 0x67d   :  { %v1937_v17 = vadd.f32 %v1936_v38, %v1906_v45 }
 0x681   :  { %v2043_v41 = vpop.f32.mrf.mxu2 }
 0x682   :  { %v1981_v25 = vpop.f32.mrf.mxu0 }
 0x683   :  { %v2173_v28 = vpop.f32.mrf.mxu1  ;;  %v1982_v44 = vadd.f32 %v1981_v25, %v1937_v17 }
 0x684   :  { %v2104_v43 = vpop.f32.mrf.mxu3 }
 0x685   :  { %v2105_v50 = vadd.f32 %v2104_v43, %v2043_v41  ;;  %v2011_v42 = vadd.f32 %v2010_v29, %v1982_v44 }
 0x68a   :  { %v2142_v6 = vpop.f32.mrf.mxu0 }
 0x68b   :  { %v2143_v51 = vadd.f32 %v2142_v6, %v2105_v50  ;;  %v2218_v35 = vpop.f32.mrf.mxu2 }
 0x68d   :  { %v2174_v14 = vadd.f32 %v2173_v28, %v2143_v51  ;;  %v2247_v15 = vpop.f32.mrf.mxu3 }
 0x68f   :  { %v2219_v59 = vadd.f32 %v2218_v35, %v2174_v14 }
 0x691   :  { %v2248_v10 = vadd.f32 %v2247_v15, %v2219_v59 }
 0x693   :  { %v2252_v56 = vrot.slane %v2248_v10, 6 }
 0x695   :  { %v2253_v39 = vsel %vm608_vm11, %v2011_v42, %v2252_v56 }
 0x696   :  { %v2255_v18 = vadd.f32 %v7586_v24, %v2253_v39 }
 0x698   :  { %2279 = vrot.lane.b32.xlu1 %v2255_v18, %s7781_s5  ;;  %v7587_v50 = vmul.f32 -1.442695, %v2255_v18  ;;  %v2276_v35 = vrot.slane %v2255_v18, 2 }
 0x69a   :  { %7657 = vpow2.f32 %v7587_v50 }
 0x6a0   :  { %v7658_v45 = vpop.eup %7657 }
 0x6a1   :  { %v2259_v51 = vadd.f32 1.0, %v7658_v45 }
 0x6a3   :  { %7659 = vrcp.f32 %v2259_v51  ;;  %v2271_v10 = vand.u32 2147483648, %v2259_v51  ;;  %v2269_v29 = vand.u32 2147483647, %v2259_v51  ;;  %vm2265_vm13 = vweird.f32 %v2259_v51 }
 0x6a4   :  { %7661 = vtanh.f32 %v2276_v35 }
 0x6a5   :  { %v2272_v24 = vor.u32 1.1754944e-38, %v2271_v10  ;;  %vm2270_vm15 = vcmp.eq.f32.partialorder %v2269_v29, 8.507059e+37 }
 0x6a9   :  { %v7660_v17 = vpop.eup %7659 }
 0x6aa   :  { %v2261_v43 = vmul.f32 %v7660_v17, %v2259_v51  ;;  %vm2266_vm12 = vweird.f32 %v7660_v17  ;;  %v7662_v42 = vpop.eup %7661 }
 0x6ab   :  { %vm2267_vm14 = vmor %vm2265_vm13, %vm2266_vm12 }
 0x6ac   :  { %v2262_v59 = vsub.f32 1.0, %v2261_v43 }
 0x6ae   :  { %v2263_v41 = vmul.f32 %v7660_v17, %v2262_v59 }
 0x6b0   :  { %v2264_v38 = vadd.f32 %v7660_v17, %v2263_v41 }
 0x6b2   :  { %v2268_v56 = vsel %vm2267_vm14, %v7660_v17, %v2264_v38 }
 0x6b3   :  { %v2273_v15 = vsel %vm2270_vm15, %v2272_v24, %v2268_v56 }
 0x6b4   :  { %v2303_v40 = vmul.f32 %v7662_v42, %v2273_v15  ;;  %v2302_v25 = vmul.f32 %v2273_v15, %v8491_v1 }
 0x6b6   :  { %2305 = vrot.lane.b32.xlu0 %v2303_v40, %s7781_s5 }
 0x70a   :  { %v2280_v14 = vpop.permute.xlu1 %2279 }
 0x70b   :  { %v2281_v44 = vrot.slane %v2280_v14, 2  ;;  %v10622_v14 = vld [vmem:[#allocation23_spill] sm:$0xff] }
 0x70d   :  { %v7588_v39 = vmul.f32 -1.442695, %v2281_v44  ;;  %v10623_v44 = vld [vmem:[#allocation10_spill] sm:$0xff] }
 0x728   :  { %v2306_v16 = vpop.permute.xlu0 %2305 }
 0x729   :  { %v8601_v6 = vadd.f32 %v2306_v16, %v2302_v25 }
 0x72b   :  { %7663 = vtanh.f32 %v8601_v6 }
 0x72c   :  { %7665 = vpow2.f32 %v7588_v39  ;;  %v10624_v39 = vld [vmem:[#allocation8_spill] sm:$0xff] }
 0x731   :  { %v7664_v28 = vpop.eup %7663 }
 0x732   :  { %2311 = vrot.lane.b32.xlu2 %v7664_v28, %s7781_s5  ;;  %v7666_v18 = vpop.eup %7665  ;;  %v10621_v28 = vld [vmem:[#allocation7_spill] sm:$0xff] }
 0x733   :  { %v2286_v50 = vadd.f32 1.0, %v7666_v18  ;;  %v10625_v18 = vld [vmem:[#allocation26_spill] sm:$0xff] }
 0x735   :  { %7667 = vrcp.f32 %v2286_v50  ;;  %v2298_v43 = vand.u32 2147483648, %v2286_v50  ;;  %vm2292_vm1 = vweird.f32 %v2286_v50  ;;  %v2296_v59 = vand.u32 2147483647, %v2286_v50 }
 0x737   :  { %v2299_v41 = vor.u32 1.1754944e-38, %v2298_v43  ;;  %vm2297_vm3 = vcmp.eq.f32.partialorder %v2296_v59, 8.507059e+37  ;;  %v10632_v43 = vld [vmem:[#allocation12_spill] sm:$0xff]  ;;  %v10633_v59 = vld [vmem:[#allocation27_spill] sm:$0xff] }
 0x73b   :  { %v7668_v45 = vpop.eup %7667 }
 0x73c   :  { %v2288_v51 = vmul.f32 %v7668_v45, %v2286_v50  ;;  %vm2293_vm0 = vweird.f32 %v7668_v45  ;;  %v10626_v50 = vld [vmem:[#allocation17_spill] sm:$0xff] }
 0x73d   :  { %vm2294_vm2 = vmor %vm2292_vm1, %vm2293_vm0 }
 0x73e   :  { %v2289_v17 = vsub.f32 1.0, %v2288_v51  ;;  %v10628_v51 = vld [vmem:[#allocation19_spill] sm:$0xff] }
 0x740   :  { %v2290_v35 = vmul.f32 %v7668_v45, %v2289_v17  ;;  %v10629_v17 = vld [vmem:[#allocation11_spill] sm:$0xff] }
 0x742   :  { %v2291_v1 = vadd.f32 %v7668_v45, %v2290_v35  ;;  %v10630_v35 = vld [vmem:[#allocation24_spill] sm:$0xff] }
 0x744   :  { %v2295_v10 = vsel %vm2294_vm2, %v7668_v45, %v2291_v1  ;;  %v10627_v45 = vld [vmem:[#allocation9_spill] sm:$0xff] }
 0x745   :  { %v2300_v29 = vsel %vm2297_vm3, %v2299_v41, %v2295_v10  ;;  %v10631_v1 = vld [vmem:[#allocation25_spill] sm:$0xff]  ;;  %v10635_v41 = vld [vmem:[#allocation28_spill] sm:$0xff] }
 0x746   :  { %v10634_v10 = vld [vmem:[#allocation13_spill] sm:$0xff] }
 0x78c   :  { %v2312_v38 = vpop.permute.xlu2 %2311 }
 0x78d   :  { %v2314_v24 = vmul.f32 %v2312_v38, %v2300_v29  ;;  %v10636_v29 = vld [vmem:[#allocation14_spill] sm:$0xff]  ;;  %v10637_v38 = vld [vmem:[#allocation29_spill] sm:$0xff] }
 0x78f   :  { %2315 = vst.msk [vmem:[#allocation2 + $0x8] sm:$0x3] %vm120_vm8, %v2314_v24  ;;  %v2320_v56 = vsel %vm127_vm9, %v2314_v24, 0 }
 0x790   :  { %2316 = vst.msk [vmem:[#allocation2 + $0x6] sm:$0x3] %vm123_vm10, %v2314_v24  ;;  %v2346_v42 = vand.u32 4294901760, %v2320_v56  ;;  %v10638_v24 = vld [vmem:[#allocation15_spill] sm:$0xff] }
 0x792   :  { %v2347_v15 = vsub.f32 %v2320_v56, %v2346_v42  ;;  %2412 = vmatmul.f32.vlgmr.msra.gmra.mxu1 %v2346_v42  ;;  %v10639_v56 = vld [vmem:[#allocation30_spill] sm:$0xff] }
 0x793   :  { %2700 = vmatpush.msra.mxu1 %v7979_v62 }
 0x794   :  { %2450 = vmatmul.f32.vlgmr.msra.gmra.mxu2 %v2347_v15  ;;  %v2348_v40 = vand.u32 4294901760, %v2347_v15 }
 0x795   :  { %2702 = vmatpush.msra.mxu1 %v7981_v63  ;;  %2733 = vmatpush.msra.mxu2 %v8010_v7 }
 0x796   :  { %2481 = vmatmul.f32.vlgmr.msra.gmra.mxu3 %v2348_v40  ;;  %v2349_v25 = vsub.f32 %v2347_v15, %v2348_v40 }
 0x797   :  { %2704 = vmatpush.msra.mxu1 %v8047_v19  ;;  %2737 = vmatpush.msra.mxu2 %v8013_v8 }
 0x798   :  { %2776 = vmatpush.msra.mxu3 %v7979_v62  ;;  %v2350_v16 = vand.u32 4294901760, %v2349_v25  ;;  %v10643_v25 = vld [vmem:[#allocation32_spill] sm:$0xff] }
 0x799   :  { %2706 = vmatpush.msra.mxu1 %v8072_v30  ;;  %2741 = vmatpush.msra.mxu2 %v8082_v47 }
 0x79a   :  { %2778 = vmatpush.msra.mxu3 %v7981_v63  ;;  %2351 = vmatmul.f32.vlgmr.msra.gmra.mxu0 %v2350_v16 }
 0x79b   :  { %2555 = vmatmul.f32.vlgmr.msrb.gmra.mxu1 %v2346_v42  ;;  %2663 = vmatpush.msra.mxu0 %v7996_v3 }
 0x79c   :  { %2708 = vmatpush.msra.mxu1 %v8084_v48  ;;  %2745 = vmatpush.msra.mxu2 %v8096_v57 }
 0x79d   :  { %2780 = vmatpush.msra.mxu3 %v8047_v19  ;;  %2588 = vmatmul.f32.vlgmr.msrb.gmra.mxu2 %v2350_v16  ;;  %v10644_v16 = vld [vmem:[#allocation20_spill] sm:$0xff] }
 0x79e   :  { %2666 = vmatpush.msra.mxu0 %v7999_v4  ;;  %2710 = vmatpush.msra.mxu1 %v8098_v58 }
 0x79f   :  { %2749 = vmatpush.msra.mxu2 %v8112_v12  ;;  %2782 = vmatpush.msra.mxu3 %v8072_v30 }
 0x7a0   :  { %2649 = vmatmul.f32.vlgmr.msrb.gmra.mxu3 %v2346_v42  ;;  %2669 = vmatpush.msra.mxu0 %v8075_v31 }
 0x7a1   :  { %2712 = vmatpush.msra.mxu1 %v8114_v13  ;;  %2753 = vmatpush.msra.mxu2 %v8134_v52 }
 0x7a2   :  { %2784 = vmatpush.msra.mxu3 %v8084_v48  ;;  %2672 = vmatpush.msra.mxu0 %v8087_v49 }
 0x7a3   :  { %2714 = vmatpush.msra.mxu1 %v8128_v46  ;;  %2757 = vmatpush.msra.mxu2 %v8141_v11 }
 0x7a4   :  { %2786 = vmatpush.msra.mxu3 %v8098_v58  ;;  %2526 = vmatmul.f32.vlgmr.msrb.gmra.mxu0 %v2346_v42 }
 0x7a5   :  { %2718 = vmatmul.f32.vlgmr.msra.gmra.mxu1 %v2348_v40  ;;  %2675 = vmatpush.msra.mxu0 %v8101_v0  ;;  %v10642_v40 = vld [vmem:[#allocation18_spill] sm:$0xff] }
 0x7a6   :  { %2761 = vmatpush.msra.mxu2 %v8152_v26  ;;  %2788 = vmatpush.msra.mxu3 %v8114_v13 }
 0x7a7   :  { %2763 = vmatmul.f32.vlgmr.msra.gmra.mxu2 %v2346_v42  ;;  %2678 = vmatpush.msra.mxu0 %v8117_v20 }
 0x7a8   :  { %2790 = vmatpush.msra.mxu3 %v8128_v46  ;;  %2914 = vmatpush.msrb.mxu1 %v7959_v54 }
 0x7a9   :  { %2792 = vmatmul.f32.vlgmr.msra.gmra.mxu3 %v2346_v42  ;;  %2681 = vmatpush.msra.mxu0 %v8131_v53  ;;  %v10640_v42 = vld [vmem:[#allocation16_spill] sm:$0xff] }
 0x7aa   :  { %2920 = vmatpush.msrb.mxu1 %v7961_v55  ;;  %2972 = vmatpush.msrb.mxu2 %v7894_v32 }
 0x7ab   :  { %2684 = vmatpush.msra.mxu0 %v8144_v60  ;;  %3009 = vmatpush.msrb.mxu3 %v7866_v21 }
 0x7ac   :  { %2687 = vmatmul.f32.vlgmr.msra.gmra.mxu0 %v2347_v15  ;;  %2926 = vmatpush.msrb.mxu1 %v7976_v61  ;;  %v10641_v15 = vld [vmem:[#allocation31_spill] sm:$0xff] }
 0x7ad   :  { %2975 = vmatpush.msrb.mxu2 %v7897_v33  ;;  %3011 = vmatpush.msrb.mxu3 %v7868_v22 }
 0x7ae   :  { %2932 = vmatpush.msrb.mxu1 %v7992_v2  ;;  %2877 = vmatpush.msrb.mxu0 %v7866_v21 }
 0x7af   :  { %2978 = vmatpush.msrb.mxu2 %v7900_v34  ;;  %3013 = vmatpush.msrb.mxu3 %v7870_v23 }
 0x7b0   :  { %2938 = vmatpush.msrb.mxu1 %v8004_v5  ;;  %2879 = vmatpush.msrb.mxu0 %v7868_v22 }
 0x7b1   :  { %2981 = vmatpush.msrb.mxu2 %v7907_v36  ;;  %3015 = vmatpush.msrb.mxu3 %v7881_v27 }
 0x7b2   :  { %2944 = vmatpush.msrb.mxu1 %v8018_v9  ;;  %2881 = vmatpush.msrb.mxu0 %v7870_v23 }
 0x7b3   :  { %2984 = vmatpush.msrb.mxu2 %v7910_v37  ;;  %3017 = vmatpush.msrb.mxu3 %v10621_v28 }
 0x7b4   :  { %2950 = vmatpush.msrb.mxu1 %v10622_v14  ;;  %2883 = vmatpush.msrb.mxu0 %v7881_v27 }
 0x7b5   :  { %2987 = vmatpush.msrb.mxu2 %v10623_v44  ;;  %3019 = vmatpush.msrb.mxu3 %v10624_v39 }
 0x7b6   :  { %2956 = vmatpush.msrb.mxu1 %v10625_v18  ;;  %2885 = vmatpush.msrb.mxu0 %v10621_v28 }
 0x7b7   :  { %2990 = vmatpush.msrb.mxu2 %v10626_v50  ;;  %3021 = vmatpush.msrb.mxu3 %v10627_v45 }
 0x7b8   :  { %3085 = vmatpush.msra.mxu1 %v7866_v21  ;;  %2887 = vmatpush.msrb.mxu0 %v10624_v39 }
 0x7b9   :  { %2993 = vmatpush.msrb.mxu2 %v10628_v51  ;;  %3023 = vmatpush.msrb.mxu3 %v10629_v17 }
 0x7ba   :  { %3087 = vmatpush.msra.mxu1 %v7868_v22  ;;  %2889 = vmatpush.msrb.mxu0 %v10627_v45 }
 0x7bb   :  { %3114 = vmatpush.msra.mxu2 %v7979_v62  ;;  %3151 = vmatpush.msra.mxu3 %v10630_v35 }
 0x7bc   :  { %3089 = vmatpush.msra.mxu1 %v7870_v23  ;;  %2891 = vmatpush.msrb.mxu0 %v10629_v17 }
 0x7bd   :  { %3116 = vmatpush.msra.mxu2 %v7981_v63  ;;  %3157 = vmatpush.msra.mxu3 %v10631_v1 }
 0x7be   :  { %3091 = vmatpush.msra.mxu1 %v7881_v27  ;;  %3042 = vmatpush.msra.mxu0 %v10632_v43 }
 0x7bf   :  { %3118 = vmatpush.msra.mxu2 %v8047_v19  ;;  %3163 = vmatpush.msra.mxu3 %v10633_v59 }
 0x7c0   :  { %3093 = vmatpush.msra.mxu1 %v10621_v28  ;;  %3046 = vmatpush.msra.mxu0 %v10634_v10  ;;  %v7589_v28 = vld [vmem:[%s10428_s0 + $0x14] sm:$0xf] }
 0x7c1   :  { %3120 = vmatpush.msra.mxu2 %v8072_v30  ;;  %3169 = vmatpush.msra.mxu3 %v10635_v41 }
 0x7c2   :  { %3095 = vmatpush.msra.mxu1 %v10624_v39  ;;  %3050 = vmatpush.msra.mxu0 %v10636_v29 }
 0x7c3   :  { %3122 = vmatpush.msra.mxu2 %v8084_v48  ;;  %3175 = vmatpush.msra.mxu3 %v10637_v38  ;;  %v10645_v38 = vld [vmem:[#allocation22_spill] sm:$0xff] }
 0x7c4   :  { %3097 = vmatpush.msra.mxu1 %v10627_v45  ;;  %3054 = vmatpush.msra.mxu0 %v10638_v24 }
 0x7c5   :  { %3124 = vmatpush.msra.mxu2 %v8098_v58  ;;  %3181 = vmatpush.msra.mxu3 %v10639_v56 }
 0x7c6   :  { %3099 = vmatpush.msra.mxu1 %v10629_v17  ;;  %3058 = vmatpush.msra.mxu0 %v10640_v42 }
 0x7c7   :  { %3126 = vmatpush.msra.mxu2 %v8114_v13  ;;  %3187 = vmatpush.msra.mxu3 %v10641_v15 }
 0x7c8   :  { %3062 = vmatpush.msra.mxu0 %v10642_v40 }
 0x7c9   :  { %3128 = vmatpush.msra.mxu2 %v8128_v46  ;;  %3193 = vmatpush.msra.mxu3 %v10643_v25 }
 0x7ca   :  { %3066 = vmatpush.msra.mxu0 %v10644_v16 }
 0x7cc   :  { %3070 = vmatpush.msra.mxu0 %v10645_v38 }
 0x80f   :  { %v2413_v24 = vpop.f32.mrf.mxu1 }
 0x817   :  { %v2352_v29 = vpop.f32.mrf.mxu0  ;;  %v2451_v41 = vpop.f32.mrf.mxu2 }
 0x818   :  { %v2556_v59 = vpop.f32.mrf.mxu1  ;;  %v2414_v42 = vadd.f32 %v2413_v24, %v2352_v29 }
 0x819   :  { %v2482_v10 = vpop.f32.mrf.mxu3 }
 0x81a   :  { %v2452_v35 = vadd.f32 %v2451_v41, %v2414_v42 }
 0x81c   :  { %v2483_v45 = vadd.f32 %v2482_v10, %v2452_v35 }
 0x820   :  { %v2589_v43 = vpop.f32.mrf.mxu2 }
 0x821   :  { %v2527_v56 = vpop.f32.mrf.mxu0 }
 0x822   :  { %v2719_v40 = vpop.f32.mrf.mxu1  ;;  %v2528_v16 = vadd.f32 %v2527_v56, %v2483_v45 }
 0x823   :  { %v2650_v1 = vpop.f32.mrf.mxu3 }
 0x824   :  { %v2651_v17 = vadd.f32 %v2650_v1, %v2589_v43  ;;  %v2557_v44 = vadd.f32 %v2556_v59, %v2528_v16 }
 0x829   :  { %v2688_v15 = vpop.f32.mrf.mxu0 }
 0x82a   :  { %v2689_v51 = vadd.f32 %v2688_v15, %v2651_v17  ;;  %v2764_v50 = vpop.f32.mrf.mxu2 }
 0x82c   :  { %v2720_v25 = vadd.f32 %v2719_v40, %v2689_v51  ;;  %v2793_v38 = vpop.f32.mrf.mxu3 }
 0x82e   :  { %v2765_v18 = vadd.f32 %v2764_v50, %v2720_v25 }
 0x830   :  { %v2794_v39 = vadd.f32 %v2793_v38, %v2765_v18 }
 0x832   :  { %v2798_v14 = vrot.slane %v2794_v39, 6 }
 0x834   :  { %v2799_v29 = vsel %vm608_vm11, %v2557_v44, %v2798_v14 }
 0x835   :  { %v2801_v41 = vadd.f32 %v7589_v28, %v2799_v29 }
 0x837   :  { %2825 = vrot.lane.b32.xlu1 %v2801_v41, %s7781_s5  ;;  %v7590_v17 = vmul.f32 -1.442695, %v2801_v41  ;;  %v2822_v50 = vrot.slane %v2801_v41, 2 }
 0x839   :  { %7669 = vpow2.f32 %v7590_v17 }
 0x83f   :  { %v7670_v35 = vpop.eup %7669 }
 0x840   :  { %v2805_v51 = vadd.f32 1.0, %v7670_v35 }
 0x842   :  { %7671 = vrcp.f32 %v2805_v51  ;;  %v2817_v39 = vand.u32 2147483648, %v2805_v51  ;;  %v2815_v59 = vand.u32 2147483647, %v2805_v51  ;;  %vm2811_vm5 = vweird.f32 %v2805_v51 }
 0x843   :  { %7673 = vtanh.f32 %v2822_v50 }
 0x844   :  { %v2818_v28 = vor.u32 1.1754944e-38, %v2817_v39  ;;  %vm2816_vm7 = vcmp.eq.f32.partialorder %v2815_v59, 8.507059e+37 }
 0x848   :  { %v7672_v45 = vpop.eup %7671 }
 0x849   :  { %v2807_v1 = vmul.f32 %v7672_v45, %v2805_v51  ;;  %vm2812_vm4 = vweird.f32 %v7672_v45  ;;  %v7674_v44 = vpop.eup %7673 }
 0x84a   :  { %vm2813_vm6 = vmor %vm2811_vm5, %vm2812_vm4 }
 0x84b   :  { %v2808_v18 = vsub.f32 1.0, %v2807_v1 }
 0x84d   :  { %v2809_v43 = vmul.f32 %v7672_v45, %v2808_v18 }
 0x84f   :  { %v2810_v10 = vadd.f32 %v7672_v45, %v2809_v43 }
 0x851   :  { %v2814_v14 = vsel %vm2813_vm6, %v7672_v45, %v2810_v10 }
 0x852   :  { %v2819_v38 = vsel %vm2816_vm7, %v2818_v28, %v2814_v14 }
 0x853   :  { %v2849_v24 = vmul.f32 %v7674_v44, %v2819_v38  ;;  %v2848_v56 = vmul.f32 %v2819_v38, %v8601_v6 }
 0x855   :  { %2851 = vrot.lane.b32.xlu0 %v2849_v24, %s7781_s5 }
 0x8a9   :  { %v2826_v25 = vpop.permute.xlu1 %2825 }
 0x8aa   :  { %v2827_v16 = vrot.slane %v2826_v25, 2  ;;  %v10662_v25 = vld [vmem:[#allocation29_spill] sm:$0xff] }
 0x8ac   :  { %v7591_v29 = vmul.f32 -1.442695, %v2827_v16  ;;  %v10663_v16 = vld [vmem:[#allocation15_spill] sm:$0xff] }
 0x8c7   :  { %v2852_v42 = vpop.permute.xlu0 %2851 }
 0x8c8   :  { %v8711_v15 = vadd.f32 %v2852_v42, %v2848_v56 }
 0x8ca   :  { %7675 = vtanh.f32 %v8711_v15 }
 0x8cb   :  { %7677 = vpow2.f32 %v7591_v29  ;;  %v10664_v29 = vld [vmem:[#allocation30_spill] sm:$0xff] }
 0x8d0   :  { %v7676_v40 = vpop.eup %7675 }
 0x8d1   :  { %2857 = vrot.lane.b32.xlu2 %v7676_v40, %s7781_s5  ;;  %v7678_v41 = vpop.eup %7677  ;;  %v10661_v40 = vld [vmem:[#allocation14_spill] sm:$0xff] }
 0x8d2   :  { %v2832_v17 = vadd.f32 1.0, %v7678_v41  ;;  %v10665_v41 = vld [vmem:[#allocation16_spill] sm:$0xff] }
 0x8d4   :  { %7679 = vrcp.f32 %v2832_v17  ;;  %v2844_v1 = vand.u32 2147483648, %v2832_v17  ;;  %vm2838_vm13 = vweird.f32 %v2832_v17  ;;  %v2842_v18 = vand.u32 2147483647, %v2832_v17 }
 0x8d6   :  { %v2845_v43 = vor.u32 1.1754944e-38, %v2844_v1  ;;  %vm2843_vm15 = vcmp.eq.f32.partialorder %v2842_v18, 8.507059e+37 }
 0x8da   :  { %v7680_v35 = vpop.eup %7679 }
 0x8db   :  { %v2834_v51 = vmul.f32 %v7680_v35, %v2832_v17  ;;  %vm2839_vm12 = vweird.f32 %v7680_v35  ;;  %v10666_v17 = vld [vmem:[#allocation31_spill] sm:$0xff] }
 0x8dc   :  { %vm2840_vm14 = vmor %vm2838_vm13, %vm2839_vm12 }
 0x8dd   :  { %v2835_v45 = vsub.f32 1.0, %v2834_v51  ;;  %v10668_v51 = vld [vmem:[#allocation32_spill] sm:$0xff] }
 0x8df   :  { %v2836_v50 = vmul.f32 %v7680_v35, %v2835_v45  ;;  %v10669_v45 = vld [vmem:[#allocation20_spill] sm:$0xff] }
 0x8e1   :  { %v2837_v6 = vadd.f32 %v7680_v35, %v2836_v50  ;;  %v10670_v50 = vld [vmem:[#allocation22_spill] sm:$0xff] }
 0x8e3   :  { %v2841_v39 = vsel %vm2840_vm14, %v7680_v35, %v2837_v6  ;;  %v10667_v35 = vld [vmem:[#allocation18_spill] sm:$0xff] }
 0x8e4   :  { %v2846_v59 = vsel %vm2843_vm15, %v2845_v43, %v2841_v39 }
 0x92b   :  { %v2858_v10 = vpop.permute.xlu2 %2857 }
 0x92c   :  { %v2860_v28 = vmul.f32 %v2858_v10, %v2846_v59 }
 0x92e   :  { %2861 = vst.msk [vmem:[#allocation2 + $0xa] sm:$0x3] %vm120_vm8, %v2860_v28  ;;  %v2866_v14 = vsel %vm127_vm9, %v2860_v28, 0 }
 0x92f   :  { %2862 = vst.msk [vmem:[#allocation2 + $0x4] sm:$0x3] %vm123_vm10, %v2860_v28  ;;  %v2892_v44 = vand.u32 4294901760, %v2866_v14 }
 0x931   :  { %v2893_v38 = vsub.f32 %v2866_v14, %v2892_v44  ;;  %2958 = vmatmul.f32.vlgmr.msrb.gmra.mxu1 %v2892_v44 }
 0x932   :  { %3246 = vmatpush.msrb.mxu1 %v7979_v62 }
 0x933   :  { %2996 = vmatmul.f32.vlgmr.msrb.gmra.mxu2 %v2893_v38  ;;  %v2894_v24 = vand.u32 4294901760, %v2893_v38 }
 0x934   :  { %3248 = vmatpush.msrb.mxu1 %v7981_v63  ;;  %3279 = vmatpush.msrb.mxu2 %v8010_v7 }
 0x935   :  { %3027 = vmatmul.f32.vlgmr.msrb.gmra.mxu3 %v2894_v24  ;;  %v2895_v56 = vsub.f32 %v2893_v38, %v2894_v24 }
 0x936   :  { %3250 = vmatpush.msrb.mxu1 %v8047_v19  ;;  %3283 = vmatpush.msrb.mxu2 %v8013_v8 }
 0x937   :  { %3322 = vmatpush.msrb.mxu3 %v7979_v62  ;;  %v2896_v42 = vand.u32 4294901760, %v2895_v56 }
 0x938   :  { %3252 = vmatpush.msrb.mxu1 %v8072_v30  ;;  %3287 = vmatpush.msrb.mxu2 %v8082_v47 }
 0x939   :  { %3324 = vmatpush.msrb.mxu3 %v7981_v63  ;;  %2897 = vmatmul.f32.vlgmr.msrb.gmra.mxu0 %v2896_v42 }
 0x93a   :  { %3101 = vmatmul.f32.vlgmr.msra.gmra.mxu1 %v2892_v44  ;;  %3209 = vmatpush.msrb.mxu0 %v7996_v3 }
 0x93b   :  { %3254 = vmatpush.msrb.mxu1 %v8084_v48  ;;  %3291 = vmatpush.msrb.mxu2 %v8096_v57 }
 0x93c   :  { %3326 = vmatpush.msrb.mxu3 %v8047_v19  ;;  %3134 = vmatmul.f32.vlgmr.msra.gmra.mxu2 %v2896_v42 }
 0x93d   :  { %3212 = vmatpush.msrb.mxu0 %v7999_v4  ;;  %3256 = vmatpush.msrb.mxu1 %v8098_v58 }
 0x93e   :  { %3295 = vmatpush.msrb.mxu2 %v8112_v12  ;;  %3328 = vmatpush.msrb.mxu3 %v8072_v30 }
 0x93f   :  { %3195 = vmatmul.f32.vlgmr.msra.gmra.mxu3 %v2892_v44  ;;  %3215 = vmatpush.msrb.mxu0 %v8075_v31 }
 0x940   :  { %3258 = vmatpush.msrb.mxu1 %v8114_v13  ;;  %3299 = vmatpush.msrb.mxu2 %v8134_v52 }
 0x941   :  { %3330 = vmatpush.msrb.mxu3 %v8084_v48  ;;  %3218 = vmatpush.msrb.mxu0 %v8087_v49 }
 0x942   :  { %3260 = vmatpush.msrb.mxu1 %v8128_v46  ;;  %3303 = vmatpush.msrb.mxu2 %v8141_v11 }
 0x943   :  { %3332 = vmatpush.msrb.mxu3 %v8098_v58  ;;  %3072 = vmatmul.f32.vlgmr.msra.gmra.mxu0 %v2892_v44 }
 0x944   :  { %3264 = vmatmul.f32.vlgmr.msrb.gmra.mxu1 %v2894_v24  ;;  %3221 = vmatpush.msrb.mxu0 %v8101_v0 }
 0x945   :  { %3307 = vmatpush.msrb.mxu2 %v8152_v26  ;;  %3334 = vmatpush.msrb.mxu3 %v8114_v13 }
 0x946   :  { %3309 = vmatmul.f32.vlgmr.msrb.gmra.mxu2 %v2892_v44  ;;  %3224 = vmatpush.msrb.mxu0 %v8117_v20 }
 0x947   :  { %3336 = vmatpush.msrb.mxu3 %v8128_v46  ;;  %3460 = vmatpush.msra.mxu1 %v7959_v54  ;;  %v10649_v54 = vld [vmem:[#allocation8_spill] sm:$0xff] }
 0x948   :  { %3338 = vmatmul.f32.vlgmr.msrb.gmra.mxu3 %v2892_v44  ;;  %3227 = vmatpush.msrb.mxu0 %v8131_v53 }
 0x949   :  { %3466 = vmatpush.msra.mxu1 %v7961_v55  ;;  %3518 = vmatpush.msra.mxu2 %v7894_v32  ;;  %v10646_v32 = vld [vmem:[#allocation7_spill] sm:$0xff]  ;;  %v10650_v55 = vld [vmem:[#allocation26_spill] sm:$0xff] }
 0x94a   :  { %3230 = vmatpush.msrb.mxu0 %v8144_v60  ;;  %3555 = vmatpush.msra.mxu3 %v7866_v21 }
 0x94b   :  { %3233 = vmatmul.f32.vlgmr.msrb.gmra.mxu0 %v2893_v38  ;;  %3472 = vmatpush.msra.mxu1 %v7976_v61  ;;  %v10652_v61 = vld [vmem:[#allocation9_spill] sm:$0xff] }
 0x94c   :  { %3521 = vmatpush.msra.mxu2 %v7897_v33  ;;  %3557 = vmatpush.msra.mxu3 %v7868_v22  ;;  %v10647_v33 = vld [vmem:[#allocation23_spill] sm:$0xff] }
 0x94d   :  { %3478 = vmatpush.msra.mxu1 %v7992_v2  ;;  %3423 = vmatpush.msra.mxu0 %v7866_v21  ;;  %v10654_v2 = vld [vmem:[#allocation11_spill] sm:$0xff] }
 0x94e   :  { %3524 = vmatpush.msra.mxu2 %v7900_v34  ;;  %3559 = vmatpush.msra.mxu3 %v7870_v23  ;;  %v10648_v34 = vld [vmem:[#allocation10_spill] sm:$0xff] }
 0x94f   :  { %3484 = vmatpush.msra.mxu1 %v8004_v5  ;;  %3425 = vmatpush.msra.mxu0 %v7868_v22  ;;  %v10655_v5 = vld [vmem:[#allocation24_spill] sm:$0xff] }
 0x950   :  { %3527 = vmatpush.msra.mxu2 %v7907_v36  ;;  %3561 = vmatpush.msra.mxu3 %v7881_v27  ;;  %v10651_v36 = vld [vmem:[#allocation17_spill] sm:$0xff] }
 0x951   :  { %3490 = vmatpush.msra.mxu1 %v8018_v9  ;;  %3427 = vmatpush.msra.mxu0 %v7870_v23  ;;  %v10659_v9 = vld [vmem:[#allocation13_spill] sm:$0xff] }
 0x952   :  { %3530 = vmatpush.msra.mxu2 %v7910_v37  ;;  %3563 = vmatpush.msra.mxu3 %v10646_v32  ;;  %v10653_v37 = vld [vmem:[#allocation19_spill] sm:$0xff] }
 0x953   :  { %3496 = vmatpush.msra.mxu1 %v10647_v33  ;;  %3429 = vmatpush.msra.mxu0 %v7881_v27 }
 0x954   :  { %3533 = vmatpush.msra.mxu2 %v10648_v34  ;;  %3565 = vmatpush.msra.mxu3 %v10649_v54 }
 0x955   :  { %3502 = vmatpush.msra.mxu1 %v10650_v55  ;;  %3431 = vmatpush.msra.mxu0 %v10646_v32 }
 0x956   :  { %3536 = vmatpush.msra.mxu2 %v10651_v36  ;;  %3567 = vmatpush.msra.mxu3 %v10652_v61 }
 0x957   :  { %3631 = vmatpush.msrb.mxu1 %v7866_v21  ;;  %3433 = vmatpush.msra.mxu0 %v10649_v54  ;;  %v10656_v21 = vld [vmem:[#allocation25_spill] sm:$0xff] }
 0x958   :  { %3539 = vmatpush.msra.mxu2 %v10653_v37  ;;  %3569 = vmatpush.msra.mxu3 %v10654_v2 }
 0x959   :  { %3633 = vmatpush.msrb.mxu1 %v7868_v22  ;;  %3435 = vmatpush.msra.mxu0 %v10652_v61  ;;  %v10657_v22 = vld [vmem:[#allocation12_spill] sm:$0xff] }
 0x95a   :  { %3660 = vmatpush.msrb.mxu2 %v7979_v62  ;;  %3697 = vmatpush.msrb.mxu3 %v10655_v5  ;;  %v7592_v5 = vld [vmem:[%s10428_s0 + $0x18] sm:$0xf] }
 0x95b   :  { %3635 = vmatpush.msrb.mxu1 %v7870_v23  ;;  %3437 = vmatpush.msra.mxu0 %v10654_v2  ;;  %v10658_v23 = vld [vmem:[#allocation27_spill] sm:$0xff] }
 0x95c   :  { %3662 = vmatpush.msrb.mxu2 %v7981_v63  ;;  %3703 = vmatpush.msrb.mxu3 %v10656_v21 }
 0x95d   :  { %3637 = vmatpush.msrb.mxu1 %v7881_v27  ;;  %3588 = vmatpush.msrb.mxu0 %v10657_v22  ;;  %v10660_v27 = vld [vmem:[#allocation28_spill] sm:$0xff] }
 0x95e   :  { %3664 = vmatpush.msrb.mxu2 %v8047_v19  ;;  %3709 = vmatpush.msrb.mxu3 %v10658_v23 }
 0x95f   :  { %3639 = vmatpush.msrb.mxu1 %v10646_v32  ;;  %3592 = vmatpush.msrb.mxu0 %v10659_v9 }
 0x960   :  { %3666 = vmatpush.msrb.mxu2 %v8072_v30  ;;  %3715 = vmatpush.msrb.mxu3 %v10660_v27 }
 0x961   :  { %3641 = vmatpush.msrb.mxu1 %v10649_v54  ;;  %3596 = vmatpush.msrb.mxu0 %v10661_v40 }
 0x962   :  { %3668 = vmatpush.msrb.mxu2 %v8084_v48  ;;  %3721 = vmatpush.msrb.mxu3 %v10662_v25 }
 0x963   :  { %3643 = vmatpush.msrb.mxu1 %v10652_v61  ;;  %3600 = vmatpush.msrb.mxu0 %v10663_v16 }
 0x964   :  { %3670 = vmatpush.msrb.mxu2 %v8098_v58  ;;  %3727 = vmatpush.msrb.mxu3 %v10664_v29 }
 0x965   :  { %3645 = vmatpush.msrb.mxu1 %v10654_v2  ;;  %3604 = vmatpush.msrb.mxu0 %v10665_v41 }
 0x966   :  { %3672 = vmatpush.msrb.mxu2 %v8114_v13  ;;  %3733 = vmatpush.msrb.mxu3 %v10666_v17 }
 0x967   :  { %3608 = vmatpush.msrb.mxu0 %v10667_v35 }
 0x968   :  { %3674 = vmatpush.msrb.mxu2 %v8128_v46  ;;  %3739 = vmatpush.msrb.mxu3 %v10668_v51 }
 0x969   :  { %3612 = vmatpush.msrb.mxu0 %v10669_v45 }
 0x96b   :  { %3616 = vmatpush.msrb.mxu0 %v10670_v50 }
 0x9ae   :  { %v2959_v6 = vpop.f32.mrf.mxu1 }
 0x9b6   :  { %v2898_v1 = vpop.f32.mrf.mxu0  ;;  %v2997_v18 = vpop.f32.mrf.mxu2 }
 0x9b7   :  { %v3102_v43 = vpop.f32.mrf.mxu1  ;;  %v2960_v28 = vadd.f32 %v2959_v6, %v2898_v1 }
 0x9b8   :  { %v3028_v39 = vpop.f32.mrf.mxu3 }
 0x9b9   :  { %v2998_v44 = vadd.f32 %v2997_v18, %v2960_v28 }
 0x9bb   :  { %v3029_v32 = vadd.f32 %v3028_v39, %v2998_v44 }
 0x9bf   :  { %v3135_v10 = vpop.f32.mrf.mxu2 }
 0x9c0   :  { %v3073_v59 = vpop.f32.mrf.mxu0 }
 0x9c1   :  { %v3265_v42 = vpop.f32.mrf.mxu1  ;;  %v3074_v54 = vadd.f32 %v3073_v59, %v3029_v32 }
 0x9c2   :  { %v3196_v14 = vpop.f32.mrf.mxu3 }
 0x9c3   :  { %v3197_v38 = vadd.f32 %v3196_v14, %v3135_v10  ;;  %v3103_v37 = vadd.f32 %v3102_v43, %v3074_v54 }
 0x9c8   :  { %v3234_v24 = vpop.f32.mrf.mxu0 }
 0x9c9   :  { %v3235_v56 = vadd.f32 %v3234_v24, %v3197_v38  ;;  %v3310_v34 = vpop.f32.mrf.mxu2 }
 0x9cb   :  { %v3266_v33 = vadd.f32 %v3265_v42, %v3235_v56  ;;  %v3339_v36 = vpop.f32.mrf.mxu3 }
 0x9cd   :  { %v3311_v55 = vadd.f32 %v3310_v34, %v3266_v33 }
 0x9cf   :  { %v3340_v61 = vadd.f32 %v3339_v36, %v3311_v55 }
 0x9d1   :  { %v3344_v2 = vrot.slane %v3340_v61, 6 }
 0x9d3   :  { %v3345_v21 = vsel %vm608_vm11, %v3103_v37, %v3344_v2 }
 0x9d4   :  { %v3347_v22 = vadd.f32 %v7592_v5, %v3345_v21 }
 0x9d6   :  { %3371 = vrot.lane.b32.xlu1 %v3347_v22, %s7781_s5  ;;  %v7593_v23 = vmul.f32 -1.442695, %v3347_v22  ;;  %v3368_v25 = vrot.slane %v3347_v22, 2 }
 0x9d8   :  { %7681 = vpow2.f32 %v7593_v23 }
 0x9de   :  { %v7682_v9 = vpop.eup %7681 }
 0x9df   :  { %v3351_v27 = vadd.f32 1.0, %v7682_v9 }
 0x9e1   :  { %7683 = vrcp.f32 %v3351_v27  ;;  %v3363_v41 = vand.u32 2147483648, %v3351_v27  ;;  %v3361_v35 = vand.u32 2147483647, %v3351_v27  ;;  %vm3357_vm1 = vweird.f32 %v3351_v27 }
 0x9e2   :  { %7685 = vtanh.f32 %v3368_v25 }
 0x9e3   :  { %v3364_v45 = vor.u32 1.1754944e-38, %v3363_v41  ;;  %vm3362_vm3 = vcmp.eq.f32.partialorder %v3361_v35, 8.507059e+37 }
 0x9e7   :  { %v7684_v40 = vpop.eup %7683 }
 0x9e8   :  { %v3353_v16 = vmul.f32 %v7684_v40, %v3351_v27  ;;  %vm3358_vm0 = vweird.f32 %v7684_v40  ;;  %v7686_v6 = vpop.eup %7685 }
 0x9e9   :  { %vm3359_vm2 = vmor %vm3357_vm1, %vm3358_vm0 }
 0x9ea   :  { %v3354_v29 = vsub.f32 1.0, %v3353_v16 }
 0x9ec   :  { %v3355_v17 = vmul.f32 %v7684_v40, %v3354_v29 }
 0x9ee   :  { %v3356_v51 = vadd.f32 %v7684_v40, %v3355_v17 }
 0x9f0   :  { %v3360_v50 = vsel %vm3359_vm2, %v7684_v40, %v3356_v51 }
 0x9f1   :  { %v3365_v1 = vsel %vm3362_vm3, %v3364_v45, %v3360_v50 }
 0x9f2   :  { %v3395_v18 = vmul.f32 %v7686_v6, %v3365_v1  ;;  %v3394_v39 = vmul.f32 %v3365_v1, %v8711_v15 }
 0x9f4   :  { %3397 = vrot.lane.b32.xlu0 %v3395_v18, %s7781_s5 }
 0xa48   :  { %v3372_v28 = vpop.permute.xlu1 %3371 }
 0xa49   :  { %v3373_v14 = vrot.slane %v3372_v28, 2 }
 0xa4b   :  { %v7594_v44 = vmul.f32 -1.442695, %v3373_v14 }
 0xa66   :  { %v3398_v43 = vpop.permute.xlu0 %3397 }
 0xa67   :  { %v8821_v59 = vadd.f32 %v3398_v43, %v3394_v39 }
 0xa69   :  { %7687 = vtanh.f32 %v8821_v59 }
 0xa6a   :  { %7689 = vpow2.f32 %v7594_v44  ;;  %v3962_v44 = vld [vmem:[%s10430_s2 + $0x38] sm:$0xff] }
 0xa6f   :  { %v7688_v10 = vpop.eup %7687 }
 0xa70   :  { %3403 = vrot.lane.b32.xlu2 %v7688_v10, %s7781_s5  ;;  %v7690_v38 = vpop.eup %7689 }
 0xa71   :  { %v3378_v24 = vadd.f32 1.0, %v7690_v38  ;;  %v3961_v38 = vld [vmem:[%s10430_s2 + $0x30] sm:$0xff] }
 0xa73   :  { %7691 = vrcp.f32 %v3378_v24  ;;  %v3390_v34 = vand.u32 2147483648, %v3378_v24  ;;  %vm3384_vm5 = vweird.f32 %v3378_v24  ;;  %v3388_v54 = vand.u32 2147483647, %v3378_v24 }
 0xa75   :  { %v3391_v36 = vor.u32 1.1754944e-38, %v3390_v34  ;;  %vm3389_vm7 = vcmp.eq.f32.partialorder %v3388_v54, 8.507059e+37  ;;  %v3957_v34 = vld [vmem:[%s10430_s2 + $0x10] sm:$0xff] }
 0xa79   :  { %v7692_v56 = vpop.eup %7691 }
 0xa7a   :  { %v3380_v42 = vmul.f32 %v7692_v56, %v3378_v24  ;;  %vm3385_vm4 = vweird.f32 %v7692_v56  ;;  %v3960_v24 = vld [vmem:[%s10430_s2 + $0x28] sm:$0xff] }
 0xa7b   :  { %vm3386_vm6 = vmor %vm3384_vm5, %vm3385_vm4 }
 0xa7c   :  { %v3381_v32 = vsub.f32 1.0, %v3380_v42  ;;  %v8880_v42 = vand.u32 4294901760, %v3961_v38 }
 0xa7e   :  { %v3382_v33 = vmul.f32 %v7692_v56, %v3381_v32  ;;  %v8882_v32 = vand.u32 4294901760, %v3960_v24 }
 0xa80   :  { %v3383_v15 = vadd.f32 %v7692_v56, %v3382_v33  ;;  %v3959_v33 = vld [vmem:[%s10430_s2 + $0x20] sm:$0xff] }
 0xa81   :  { %v8893_v54 = vand.u32 4294901760, %v3959_v33 }
 0xa82   :  { %v3387_v55 = vsel %vm3386_vm6, %v7692_v56, %v3383_v15  ;;  %v8878_v56 = vand.u32 4294901760, %v3962_v44  ;;  %v3958_v15 = vld [vmem:[%s10430_s2 + $0x18] sm:$0xff]  ;;  %vm7273_vm6 = vcmask 687104  }
 0xa83   :  { %v3392_v61 = vsel %vm3389_vm7, %v3391_v36, %v3387_v55  ;;  %v8895_v55 = vand.u32 4294901760, %v3958_v15  ;;  %v8897_v36 = vand.u32 4294901760, %v3957_v34  ;;  %vm7557_vm7 = vcmask 33792  }
 0xaca   :  { %v3404_v37 = vpop.permute.xlu2 %3403 }
 0xacb   :  { %v3406_v2 = vmul.f32 %v3404_v37, %v3392_v61  ;;  %v3956_v61 = vld [vmem:[%s10430_s2 + $0x8] sm:$0xff]  ;;  %v8903_v37 = vsub.f32 %v3962_v44, %v8878_v56 }
 0xacd   :  { %3407 = vst.msk [vmem:[#allocation2 + $0xc] sm:$0x3] %vm120_vm8, %v3406_v2  ;;  %v3412_v5 = vsel %vm127_vm9, %v3406_v2, 0 }
 0xace   :  { %3408 = vst.msk [vmem:[#allocation2 + $0x2] sm:$0x3] %vm123_vm10, %v3406_v2  ;;  %v3438_v21 = vand.u32 4294901760, %v3412_v5  ;;  %v8906_v2 = vsub.f32 %v3961_v38, %v8880_v42 }
 0xad0   :  { %v3439_v22 = vsub.f32 %v3412_v5, %v3438_v21  ;;  %3504 = vmatmul.f32.vlgmr.msra.gmra.mxu1 %v3438_v21  ;;  %v8909_v5 = vsub.f32 %v3960_v24, %v8882_v32 }
 0xad1   :  { %3792 = vmatpush.msra.mxu1 %v7979_v62 }
 0xad2   :  { %3542 = vmatmul.f32.vlgmr.msra.gmra.mxu2 %v3439_v22  ;;  %v3440_v23 = vand.u32 4294901760, %v3439_v22 }
 0xad3   :  { %3794 = vmatpush.msra.mxu1 %v7981_v63  ;;  %3825 = vmatpush.msra.mxu2 %v8010_v7 }
 0xad4   :  { %3573 = vmatmul.f32.vlgmr.msra.gmra.mxu3 %v3440_v23  ;;  %v3441_v9 = vsub.f32 %v3439_v22, %v3440_v23 }
 0xad5   :  { %3796 = vmatpush.msra.mxu1 %v8047_v19  ;;  %3829 = vmatpush.msra.mxu2 %v8013_v8 }
 0xad6   :  { %3868 = vmatpush.msra.mxu3 %v7979_v62  ;;  %v3442_v27 = vand.u32 4294901760, %v3441_v9  ;;  %v8922_v9 = vand.u32 4294901760, %v8903_v37 }
 0xad7   :  { %3798 = vmatpush.msra.mxu1 %v8072_v30  ;;  %3833 = vmatpush.msra.mxu2 %v8082_v47 }
 0xad8   :  { %3870 = vmatpush.msra.mxu3 %v7981_v63  ;;  %3443 = vmatmul.f32.vlgmr.msra.gmra.mxu0 %v3442_v27 }
 0xad9   :  { %3647 = vmatmul.f32.vlgmr.msrb.gmra.mxu1 %v3438_v21  ;;  %3755 = vmatpush.msra.mxu0 %v7996_v3 }
 0xada   :  { %3800 = vmatpush.msra.mxu1 %v8084_v48  ;;  %3837 = vmatpush.msra.mxu2 %v8096_v57 }
 0xadb   :  { %3872 = vmatpush.msra.mxu3 %v8047_v19  ;;  %3680 = vmatmul.f32.vlgmr.msrb.gmra.mxu2 %v3442_v27  ;;  %v8925_v27 = vand.u32 4294901760, %v8906_v2 }
 0xadc   :  { %3758 = vmatpush.msra.mxu0 %v7999_v4  ;;  %3802 = vmatpush.msra.mxu1 %v8098_v58 }
 0xadd   :  { %3841 = vmatpush.msra.mxu2 %v8112_v12  ;;  %3874 = vmatpush.msra.mxu3 %v8072_v30 }
 0xade   :  { %3741 = vmatmul.f32.vlgmr.msrb.gmra.mxu3 %v3438_v21  ;;  %3761 = vmatpush.msra.mxu0 %v8075_v31 }
 0xadf   :  { %3804 = vmatpush.msra.mxu1 %v8114_v13  ;;  %3845 = vmatpush.msra.mxu2 %v8134_v52 }
 0xae0   :  { %3876 = vmatpush.msra.mxu3 %v8084_v48  ;;  %3764 = vmatpush.msra.mxu0 %v8087_v49 }
 0xae1   :  { %3806 = vmatpush.msra.mxu1 %v8128_v46  ;;  %3849 = vmatpush.msra.mxu2 %v8141_v11 }
 0xae2   :  { %3878 = vmatpush.msra.mxu3 %v8098_v58  ;;  %3618 = vmatmul.f32.vlgmr.msrb.gmra.mxu0 %v3438_v21 }
 0xae3   :  { %3810 = vmatmul.f32.vlgmr.msra.gmra.mxu1 %v3440_v23  ;;  %3767 = vmatpush.msra.mxu0 %v8101_v0  ;;  %v8919_v23 = vsub.f32 %v3958_v15, %v8895_v55 }
 0xae4   :  { %3853 = vmatpush.msra.mxu2 %v8152_v26  ;;  %3880 = vmatpush.msra.mxu3 %v8114_v13  ;;  %v7595_v26 = vld [vmem:[%s10428_s0 + $0x1c] sm:$0xf] }
 0xae5   :  { %3855 = vmatmul.f32.vlgmr.msra.gmra.mxu2 %v3438_v21  ;;  %3770 = vmatpush.msra.mxu0 %v8117_v20 }
 0xae6   :  { %3882 = vmatpush.msra.mxu3 %v8128_v46  ;;  %4077 = vmatpush.msrb.mxu2 %v8903_v37 }
 0xae7   :  { %3884 = vmatmul.f32.vlgmr.msra.gmra.mxu3 %v3438_v21  ;;  %3773 = vmatpush.msra.mxu0 %v8131_v53  ;;  %v8913_v21 = vand.u32 4294901760, %v3956_v61 }
 0xae8   :  { %4114 = vmatpush.msrb.mxu3 %v8878_v56  ;;  %4080 = vmatpush.msrb.mxu2 %v8906_v2 }
 0xae9   :  { %3776 = vmatpush.msra.mxu0 %v8144_v60 }
 0xaea   :  { %3779 = vmatmul.f32.vlgmr.msra.gmra.mxu0 %v3439_v22  ;;  %v8916_v22 = vsub.f32 %v3959_v33, %v8893_v54  ;;  %4116 = vmatpush.msrb.mxu3 %v8880_v42 }
 0xaeb   :  { %3982 = vmatpush.msrb.mxu0 %v8878_v56  ;;  %4083 = vmatpush.msrb.mxu2 %v8909_v5 }
 0xaec   :  { %4118 = vmatpush.msrb.mxu3 %v8882_v32 }
 0xaed   :  { %3984 = vmatpush.msrb.mxu0 %v8880_v42  ;;  %4086 = vmatpush.msrb.mxu2 %v8916_v22 }
 0xaee   :  { %4120 = vmatpush.msrb.mxu3 %v8893_v54 }
 0xaef   :  { %3986 = vmatpush.msrb.mxu0 %v8882_v32  ;;  %4089 = vmatpush.msrb.mxu2 %v8919_v23 }
 0xaf0   :  { %4122 = vmatpush.msrb.mxu3 %v8895_v55 }
 0xaf1   :  { %3988 = vmatpush.msrb.mxu0 %v8893_v54 }
 0xaf2   :  { %4124 = vmatpush.msrb.mxu3 %v8897_v36 }
 0xaf3   :  { %3990 = vmatpush.msrb.mxu0 %v8895_v55 }
 0xaf4   :  { %4126 = vmatpush.msrb.mxu3 %v8913_v21 }
 0xaf5   :  { %3992 = vmatpush.msrb.mxu0 %v8897_v36 }
 0xaf7   :  { %3994 = vmatpush.msrb.mxu0 %v8913_v21 }
 0xb4d   :  { %v3505_v62 = vpop.f32.mrf.mxu1 }
 0xb55   :  { %v3444_v63 = vpop.f32.mrf.mxu0  ;;  %v3543_v3 = vpop.f32.mrf.mxu2 }
 0xb56   :  { %v3648_v7 = vpop.f32.mrf.mxu1  ;;  %v3506_v30 = vadd.f32 %v3505_v62, %v3444_v63  ;;  %v8929_v62 = vand.u32 4294901760, %v8909_v5  ;;  %v8933_v63 = vsub.f32 %v3957_v34, %v8897_v36  ;;  %v4244_v34 = vld [vmem:[#allocation2 + $0x2] sm:$0x3] }
 0xb57   :  { %v3574_v4 = vpop.f32.mrf.mxu3 }
 0xb58   :  { %v3544_v47 = vadd.f32 %v3543_v3, %v3506_v30  ;;  %v3955_v3 = vld [vmem:[%s10430_s2] sm:$0xff]  ;;  %v4029_v30 = vsub.f32 %v8909_v5, %v8929_v62  ;;  %4092 = vmatpush.msrb.mxu2 %v8933_v63 }
 0xb5a   :  { %v3575_v0 = vadd.f32 %v3574_v4, %v3544_v47  ;;  %v8939_v4 = vand.u32 4294901760, %v8916_v22  ;;  %v8957_v47 = vand.u32 4294901760, %v3955_v3 }
 0xb5c   :  { %4128 = vmatpush.msrb.mxu3 %v8957_v47  ;;  %3996 = vmatpush.msrb.mxu0 %v8957_v47 }
 0xb5e   :  { %v3681_v19 = vpop.f32.mrf.mxu2  ;;  %4147 = vmatpush.msra.mxu0 %v8922_v9 }
 0xb5f   :  { %v3619_v8 = vpop.f32.mrf.mxu0 }
 0xb60   :  { %v3811_v58 = vpop.f32.mrf.mxu1  ;;  %v3620_v20 = vadd.f32 %v3619_v8, %v3575_v0  ;;  %v4017_v8 = vsub.f32 %v8903_v37, %v8922_v9  ;;  %v8972_v0 = vsub.f32 %v3955_v3, %v8957_v47  ;;  %4151 = vmatpush.msra.mxu0 %v8925_v27 }
 0xb61   :  { %v3742_v31 = vpop.f32.mrf.mxu3 }
 0xb62   :  { %v3743_v48 = vadd.f32 %v3742_v31, %v3681_v19  ;;  %v3649_v52 = vadd.f32 %v3648_v7, %v3620_v20  ;;  %v8943_v7 = vsub.f32 %v3956_v61, %v8913_v21  ;;  %v4023_v19 = vsub.f32 %v8906_v2, %v8925_v27  ;;  %4155 = vmatpush.msra.mxu0 %v8929_v62 }
 0xb63   :  { %v8953_v31 = vand.u32 4294901760, %v8919_v23  ;;  %v4246_v61 = vsel %vm127_vm9, %v4244_v34, 0  ;;  %v5320_v34 = vld [vmem:[#allocation2 + $0xa] sm:$0x3] }
 0xb64   :  { %v8981_v20 = vand.u32 4294901760, %v8943_v7  ;;  %4095 = vmatpush.msrb.mxu2 %v8943_v7  ;;  %4159 = vmatpush.msra.mxu0 %v8939_v4  ;;  %v4272_v3 = vand.u32 4294901760, %v4246_v61 }
 0xb66   :  { %4098 = vmatpush.msrb.mxu2 %v8972_v0  ;;  %4163 = vmatpush.msra.mxu0 %v8953_v31 }
 0xb67   :  { %v3780_v49 = vpop.f32.mrf.mxu0 }
 0xb68   :  { %v3781_v57 = vadd.f32 %v3780_v49, %v3743_v48  ;;  %v3856_v13 = vpop.f32.mrf.mxu2  ;;  %v8959_v48 = vand.u32 4294901760, %v4017_v8  ;;  %v8961_v49 = vand.u32 4294901760, %v4023_v19  ;;  %4257 = vmatpush.msra.mxu2 %v8878_v56 }
 0xb6a   :  { %v3812_v12 = vadd.f32 %v3811_v58, %v3781_v57  ;;  %v3885_v46 = vpop.f32.mrf.mxu3  ;;  %v4035_v57 = vsub.f32 %v8916_v22, %v8939_v4  ;;  %v8967_v58 = vand.u32 4294901760, %v8933_v63  ;;  %4019 = vmatpush.msrb.mxu1 %v8959_v48  ;;  %4294 = vmatpush.msra.mxu3 %v8959_v48 }
 0xb6b   :  { %4259 = vmatpush.msra.mxu2 %v8880_v42 }
 0xb6c   :  { %v3857_v60 = vadd.f32 %v3856_v13, %v3812_v12  ;;  %v8975_v12 = vand.u32 4294901760, %v4029_v30  ;;  %v4041_v13 = vsub.f32 %v8919_v23, %v8953_v31  ;;  %4025 = vmatpush.msrb.mxu1 %v8961_v49  ;;  %4300 = vmatpush.msra.mxu3 %v8961_v49  ;;  %v9060_v30 = vsub.f32 %v4246_v61, %v4272_v3 }
 0xb6d   :  { %4261 = vmatpush.msra.mxu2 %v8882_v32  ;;  %4167 = vmatpush.msra.mxu0 %v8967_v58  ;;  %v5322_v61 = vsel %vm127_vm9, %v5320_v34, 0 }
 0xb6e   :  { %v3886_v53 = vadd.f32 %v3885_v46, %v3857_v60  ;;  %v8986_v60 = vand.u32 4294901760, %v4035_v57  ;;  %v4047_v46 = vsub.f32 %v8933_v63, %v8967_v58  ;;  %4031 = vmatpush.msrb.mxu1 %v8975_v12  ;;  %4306 = vmatpush.msra.mxu3 %v8975_v12 }
 0xb6f   :  { %4263 = vmatpush.msra.mxu2 %v8893_v54  ;;  %4171 = vmatpush.msra.mxu0 %v8981_v20 }
 0xb70   :  { %v3890_v11 = vrot.slane %v3886_v53, 6  ;;  %v8992_v53 = vand.u32 4294901760, %v8972_v0  ;;  %4037 = vmatpush.msrb.mxu1 %v8986_v60  ;;  %4312 = vmatpush.msra.mxu3 %v8986_v60 }
 0xb71   :  { %4265 = vmatpush.msra.mxu2 %v8895_v55 }
 0xb72   :  { %v3891_v40 = vsel %vm608_vm11, %v3649_v52, %v3890_v11  ;;  %v8997_v52 = vand.u32 4294901760, %v4041_v13  ;;  %v4053_v11 = vsub.f32 %v8943_v7, %v8981_v20  ;;  %4175 = vmatpush.msra.mxu0 %v8992_v53 }
 0xb73   :  { %v3893_v25 = vadd.f32 %v7595_v26, %v3891_v40  ;;  %v9005_v26 = vand.u32 4294901760, %v4047_v46  ;;  %v4059_v40 = vsub.f32 %v8972_v0, %v8992_v53  ;;  %4267 = vmatpush.msra.mxu2 %v8897_v36  ;;  %v4274_v46 = vand.u32 4294901760, %v9060_v30 }
 0xb74   :  { %4043 = vmatpush.msrb.mxu1 %v8997_v52  ;;  %4318 = vmatpush.msra.mxu3 %v8997_v52 }
 0xb75   :  { %3917 = vrot.lane.b32.xlu1 %v3893_v25, %s7781_s5  ;;  %v7596_v16 = vmul.f32 -1.442695, %v3893_v25  ;;  %v3914_v35 = vrot.slane %v3893_v25, 2  ;;  %v9013_v25 = vand.u32 4294901760, %v4053_v11  ;;  %4269 = vmatpush.msra.mxu2 %v8913_v21 }
 0xb76   :  { %4049 = vmatpush.msrb.mxu1 %v9005_v26  ;;  %4324 = vmatpush.msra.mxu3 %v9005_v26 }
 0xb77   :  { %7693 = vpow2.f32 %v7596_v16  ;;  %4271 = vmatpush.msra.mxu2 %v8957_v47 }
 0xb78   :  { %4055 = vmatpush.msrb.mxu1 %v9013_v25  ;;  %4330 = vmatpush.msra.mxu3 %v9013_v25 }
 0xb7d   :  { %v7694_v29 = vpop.eup %7693 }
 0xb7e   :  { %v3897_v41 = vadd.f32 1.0, %v7694_v29  ;;  %v9021_v29 = vand.u32 4294901760, %v4059_v40 }
 0xb80   :  { %7695 = vrcp.f32 %v3897_v41  ;;  %v3909_v50 = vand.u32 2147483648, %v3897_v41  ;;  %v3907_v1 = vand.u32 2147483647, %v3897_v41  ;;  %vm3903_vm13 = vweird.f32 %v3897_v41  ;;  %4061 = vmatpush.msrb.mxu1 %v9021_v29  ;;  %4336 = vmatpush.msra.mxu3 %v9021_v29 }
 0xb81   :  { %7697 = vtanh.f32 %v3914_v35 }
 0xb82   :  { %v3910_v39 = vor.u32 1.1754944e-38, %v3909_v50  ;;  %vm3908_vm14 = vcmp.eq.f32.partialorder %v3907_v1, 8.507059e+37  ;;  %4190 = vmatpush.msra.mxu1 %v8878_v56 }
 0xb84   :  { %4192 = vmatpush.msra.mxu1 %v8880_v42 }
 0xb86   :  { %v7696_v17 = vpop.eup %7695  ;;  %4194 = vmatpush.msra.mxu1 %v8882_v32 }
 0xb87   :  { %v3899_v51 = vmul.f32 %v7696_v17, %v3897_v41  ;;  %vm3904_vm12 = vweird.f32 %v7696_v17  ;;  %v7698_v10 = vpop.eup %7697 }
 0xb88   :  { %vm3905_vm11 = vmor %vm3903_vm13, %vm3904_vm12  ;;  %4196 = vmatpush.msra.mxu1 %v8893_v54 }
 0xb89   :  { %v3900_v45 = vsub.f32 1.0, %v3899_v51 }
 0xb8a   :  { %4198 = vmatpush.msra.mxu1 %v8895_v55 }
 0xb8b   :  { %v3901_v6 = vmul.f32 %v7696_v17, %v3900_v45 }
 0xb8c   :  { %4200 = vmatpush.msra.mxu1 %v8897_v36 }
 0xb8d   :  { %v3902_v18 = vadd.f32 %v7696_v17, %v3901_v6 }
 0xb8e   :  { %4202 = vmatpush.msra.mxu1 %v8913_v21 }
 0xb8f   :  { %v3906_v43 = vsel %vm3905_vm11, %v7696_v17, %v3902_v18 }
 0xb90   :  { %v8865_v28 = vsel %vm3908_vm14, %v3910_v39, %v3906_v43  ;;  %4204 = vmatpush.msra.mxu1 %v8957_v47 }
 0xb91   :  { %v3941_v14 = vmul.f32 %v7698_v10, %v8865_v28  ;;  %v3940_v16 = vmul.f32 %v8865_v28, %v8821_v59 }
 0xb93   :  { %3943 = vrot.lane.b32.xlu0 %v3941_v14, %s7781_s5 }
 0xbe7   :  { %v3918_v35 = vpop.permute.xlu1 %3917 }
 0xbe8   :  { %v3919_v51 = vrot.slane %v3918_v35, 2 }
 0xbea   :  { %v7597_v45 = vmul.f32 -1.442695, %v3919_v51 }
 0xc05   :  { %v3944_v41 = vpop.permute.xlu0 %3943 }
 0xc06   :  { %v3946_v17 = vadd.f32 %v3944_v41, %v3940_v16  ;;  %v4275_v16 = vsub.f32 %v9060_v30, %v4274_v46 }
 0xc08   :  { %7699 = vtanh.f32 %v3946_v17  ;;  %v4276_v17 = vand.u32 4294901760, %v4275_v16 }
 0xc09   :  { %7701 = vpow2.f32 %v7597_v45 }
 0xc0e   :  { %v7700_v59 = vpop.eup %7699 }
 0xc0f   :  { %3949 = vrot.lane.b32.xlu2 %v7700_v59, %s7781_s5  ;;  %v7702_v50 = vpop.eup %7701  ;;  %v4513_v59 = vld [vmem:[#allocation2 + $0x4] sm:$0x3] }
 0xc10   :  { %v3924_v6 = vadd.f32 1.0, %v7702_v50  ;;  %v4515_v35 = vsel %vm127_vm9, %v4513_v59, 0  ;;  %v4782_v50 = vld [vmem:[#allocation2 + $0x6] sm:$0x3] }
 0xc11   :  { %v9109_v51 = vand.u32 4294901760, %v4515_v35 }
 0xc12   :  { %7703 = vrcp.f32 %v3924_v6  ;;  %v3936_v28 = vand.u32 2147483648, %v3924_v6  ;;  %vm3930_vm0 = vweird.f32 %v3924_v6  ;;  %v3934_v14 = vand.u32 2147483647, %v3924_v6 }
 0xc13   :  { %v4542_v45 = vsub.f32 %v4515_v35, %v9109_v51 }
 0xc14   :  { %v3937_v38 = vor.u32 1.1754944e-38, %v3936_v28  ;;  %vm3935_vm2 = vcmp.eq.f32.partialorder %v3934_v14, 8.507059e+37 }
 0xc18   :  { %v7704_v1 = vpop.eup %7703 }
 0xc19   :  { %v3926_v18 = vmul.f32 %v7704_v1, %v3924_v6  ;;  %vm3931_vm15 = vweird.f32 %v7704_v1  ;;  %v4784_v6 = vsel %vm127_vm9, %v4782_v50, 0 }
 0xc1a   :  { %vm3932_vm1 = vmor %vm3930_vm0, %vm3931_vm15 }
 0xc1b   :  { %v3927_v39 = vsub.f32 1.0, %v3926_v18  ;;  %v9132_v18 = vand.u32 4294901760, %v4784_v6 }
 0xc1d   :  { %v3928_v43 = vmul.f32 %v7704_v1, %v3927_v39 }
 0xc1f   :  { %v3929_v10 = vadd.f32 %v7704_v1, %v3928_v43  ;;  %v9142_v43 = vsub.f32 %v4784_v6, %v9132_v18 }
 0xc21   :  { %v3933_v44 = vsel %vm3932_vm1, %v7704_v1, %v3929_v10  ;;  %v4543_v1 = vand.u32 4294901760, %v4542_v45  ;;  %v4812_v28 = vand.u32 4294901760, %v9142_v43 }
 0xc22   :  { %v3938_v24 = vsel %vm3935_vm2, %v3937_v38, %v3933_v44  ;;  %v5051_v38 = vld [vmem:[#allocation2 + $0x8] sm:$0x3] }
 0xc23   :  { %v4544_v39 = vsub.f32 %v4542_v45, %v4543_v1  ;;  %v4813_v14 = vsub.f32 %v9142_v43, %v4812_v28 }
 0xc25   :  { %v4545_v10 = vand.u32 4294901760, %v4544_v39  ;;  %v4814_v44 = vand.u32 4294901760, %v4813_v14 }
 0xc69   :  { %v3950_v33 = vpop.permute.xlu2 %3949 }
 0xc6a   :  { %v3952_v15 = vmul.f32 %v3950_v33, %v3938_v24  ;;  %v5053_v24 = vsel %vm127_vm9, %v5051_v38, 0 }
 0xc6b   :  { %v9224_v33 = vand.u32 4294901760, %v5053_v24 }
 0xc6c   :  { %3953 = vst.msk [vmem:[#allocation2 + $0xe] sm:$0x3] %vm120_vm8, %v3952_v15  ;;  %vm4215_vm8 = vcmask 517120  }
 0xc6d   :  { %3954 = vst.msk [vmem:[#allocation2] sm:$0x3] %vm123_vm10, %v3952_v15  ;;  %v5080_v15 = vsub.f32 %v5053_v24, %v9224_v33 }
 0xc73   :  { %v5858_v6 = vld [vmem:[#allocation2 + $0xe] sm:$0x3] }
 0xc74   :  { %v3966_v8 = vld [vmem:[#allocation2] sm:$0x3] }
 0xc75   :  { %v3971_v19 = vsel %vm127_vm9, %v3966_v8, 0  ;;  %v9247_v8 = vand.u32 4294901760, %v5322_v61 }
 0xc76   :  { %v3997_v57 = vand.u32 4294901760, %v3971_v19 }
 0xc78   :  { %4063 = vmatmul.f32.vlgmr.msrb.gmra.mxu1 %v3997_v57  ;;  %v3998_v13 = vsub.f32 %v3971_v19, %v3997_v57 }
 0xc79   :  { %4389 = vmatpush.msrb.mxu1 %v8878_v56 }
 0xc7a   :  { %4101 = vmatmul.f32.vlgmr.msrb.gmra.mxu2 %v3998_v13  ;;  %v3999_v11 = vand.u32 4294901760, %v3998_v13 }
 0xc7b   :  { %4391 = vmatpush.msrb.mxu1 %v8880_v42  ;;  %4422 = vmatpush.msrb.mxu2 %v8922_v9 }
 0xc7c   :  { %4132 = vmatmul.f32.vlgmr.msrb.gmra.mxu3 %v3999_v11  ;;  %v4000_v40 = vsub.f32 %v3998_v13, %v3999_v11 }
 0xc7d   :  { %4393 = vmatpush.msrb.mxu1 %v8882_v32  ;;  %4426 = vmatpush.msrb.mxu2 %v8925_v27 }
 0xc7e   :  { %4465 = vmatpush.msrb.mxu3 %v8878_v56  ;;  %v4001_v41 = vand.u32 4294901760, %v4000_v40  ;;  %v5589_v40 = vld [vmem:[#allocation2 + $0xc] sm:$0x3] }
 0xc7f   :  { %4395 = vmatpush.msrb.mxu1 %v8893_v54  ;;  %4430 = vmatpush.msrb.mxu2 %v8929_v62  ;;  %v5591_v16 = vsel %vm127_vm9, %v5589_v40, 0 }
 0xc80   :  { %4467 = vmatpush.msrb.mxu3 %v8880_v42  ;;  %4002 = vmatmul.f32.vlgmr.msrb.gmra.mxu0 %v4001_v41 }
 0xc81   :  { %4206 = vmatmul.f32.vlgmr.msra.gmra.mxu1 %v3997_v57  ;;  %4352 = vmatpush.msrb.mxu0 %v8903_v37 }
 0xc82   :  { %4397 = vmatpush.msrb.mxu1 %v8895_v55  ;;  %4434 = vmatpush.msrb.mxu2 %v8939_v4 }
 0xc83   :  { %4469 = vmatpush.msrb.mxu3 %v8882_v32  ;;  %4277 = vmatmul.f32.vlgmr.msra.gmra.mxu2 %v4276_v17  ;;  %v9339_v17 = vand.u32 4294901760, %v5591_v16 }
 0xc84   :  { %4355 = vmatpush.msrb.mxu0 %v8906_v2  ;;  %4399 = vmatpush.msrb.mxu1 %v8897_v36 }
 0xc85   :  { %4438 = vmatpush.msrb.mxu2 %v8953_v31  ;;  %4471 = vmatpush.msrb.mxu3 %v8893_v54 }
 0xc86   :  { %4338 = vmatmul.f32.vlgmr.msra.gmra.mxu3 %v4272_v3  ;;  %4358 = vmatpush.msrb.mxu0 %v8909_v5 }
 0xc87   :  { %4401 = vmatpush.msrb.mxu1 %v8913_v21  ;;  %4442 = vmatpush.msrb.mxu2 %v8967_v58 }
 0xc88   :  { %4473 = vmatpush.msrb.mxu3 %v8895_v55  ;;  %4361 = vmatpush.msrb.mxu0 %v8916_v22 }
 0xc89   :  { %4403 = vmatpush.msrb.mxu1 %v8957_v47  ;;  %4446 = vmatpush.msrb.mxu2 %v8981_v20 }
 0xc8a   :  { %4475 = vmatpush.msrb.mxu3 %v8897_v36  ;;  %4177 = vmatmul.f32.vlgmr.msra.gmra.mxu0 %v3997_v57 }
 0xc8b   :  { %4563 = vmatpush.msra.mxu1 %v8959_v48  ;;  %4364 = vmatpush.msrb.mxu0 %v8919_v23 }
 0xc8c   :  { %4407 = vmatmul.f32.vlgmr.msrb.gmra.mxu1 %v4274_v46  ;;  %4450 = vmatpush.msrb.mxu2 %v8992_v53 }
 0xc8d   :  { %4477 = vmatpush.msrb.mxu3 %v8913_v21  ;;  %4569 = vmatpush.msra.mxu1 %v8961_v49 }
 0xc8e   :  { %4621 = vmatpush.msra.mxu2 %v8903_v37  ;;  %4367 = vmatpush.msrb.mxu0 %v8933_v63 }
 0xc8f   :  { %4452 = vmatmul.f32.vlgmr.msrb.gmra.mxu2 %v4272_v3  ;;  %4479 = vmatpush.msrb.mxu3 %v8957_v47 }
 0xc90   :  { %4575 = vmatpush.msra.mxu1 %v8975_v12  ;;  %4624 = vmatpush.msra.mxu2 %v8906_v2 }
 0xc91   :  { %4658 = vmatpush.msra.mxu3 %v8878_v56  ;;  %4370 = vmatpush.msrb.mxu0 %v8943_v7 }
 0xc92   :  { %4481 = vmatmul.f32.vlgmr.msrb.gmra.mxu3 %v4272_v3  ;;  %4581 = vmatpush.msra.mxu1 %v8986_v60  ;;  %v5081_v3 = vand.u32 4294901760, %v5080_v15 }
 0xc93   :  { %4627 = vmatpush.msra.mxu2 %v8909_v5  ;;  %4660 = vmatpush.msra.mxu3 %v8880_v42 }
 0xc94   :  { %4373 = vmatpush.msrb.mxu0 %v8972_v0  ;;  %4587 = vmatpush.msra.mxu1 %v8997_v52  ;;  %v5082_v19 = vsub.f32 %v5080_v15, %v5081_v3 }
 0xc95   :  { %4630 = vmatpush.msra.mxu2 %v8916_v22  ;;  %4662 = vmatpush.msra.mxu3 %v8882_v32 }
 0xc96   :  { %4526 = vmatpush.msra.mxu0 %v8878_v56  ;;  %4593 = vmatpush.msra.mxu1 %v9005_v26  ;;  %v5083_v57 = vand.u32 4294901760, %v5082_v19 }
 0xc97   :  { %4376 = vmatmul.f32.vlgmr.msrb.gmra.mxu0 %v9060_v30  ;;  %4633 = vmatpush.msra.mxu2 %v8919_v23  ;;  %v9257_v30 = vsub.f32 %v5322_v61, %v9247_v8 }
 0xc98   :  { %4528 = vmatpush.msra.mxu0 %v8880_v42  ;;  %4664 = vmatpush.msra.mxu3 %v8893_v54 }
 0xc99   :  { %4599 = vmatpush.msra.mxu1 %v9013_v25  ;;  %4636 = vmatpush.msra.mxu2 %v8933_v63  ;;  %v5350_v13 = vand.u32 4294901760, %v9257_v30 }
 0xc9a   :  { %4530 = vmatpush.msra.mxu0 %v8882_v32  ;;  %4666 = vmatpush.msra.mxu3 %v8895_v55 }
 0xc9b   :  { %4605 = vmatpush.msra.mxu1 %v9021_v29  ;;  %4639 = vmatpush.msra.mxu2 %v8943_v7  ;;  %v5351_v46 = vsub.f32 %v9257_v30, %v5350_v13 }
 0xc9c   :  { %4532 = vmatpush.msra.mxu0 %v8893_v54  ;;  %4668 = vmatpush.msra.mxu3 %v8897_v36 }
 0xc9d   :  { %4607 = vmatmul.f32.vlgmr.msra.gmra.mxu1 %v9109_v51  ;;  %4642 = vmatpush.msra.mxu2 %v8972_v0  ;;  %v5352_v11 = vand.u32 4294901760, %v5351_v46 }
 0xc9e   :  { %4534 = vmatpush.msra.mxu0 %v8895_v55  ;;  %4734 = vmatpush.msrb.mxu1 %v8878_v56 }
 0xc9f   :  { %4670 = vmatpush.msra.mxu3 %v8913_v21  ;;  %4645 = vmatmul.f32.vlgmr.msra.gmra.mxu2 %v4542_v45  ;;  %v5618_v45 = vsub.f32 %v5591_v16, %v9339_v17 }
 0xca0   :  { %4736 = vmatpush.msrb.mxu1 %v8880_v42  ;;  %4795 = vmatpush.msrb.mxu2 %v8878_v56 }
 0xca1   :  { %4536 = vmatpush.msra.mxu0 %v8897_v36  ;;  %4672 = vmatpush.msra.mxu3 %v8957_v47  ;;  %v5619_v39 = vand.u32 4294901760, %v5618_v45 }
 0xca2   :  { %4676 = vmatmul.f32.vlgmr.msra.gmra.mxu3 %v4543_v1  ;;  %4738 = vmatpush.msrb.mxu1 %v8882_v32 }
 0xca3   :  { %4797 = vmatpush.msrb.mxu2 %v8880_v42  ;;  %4832 = vmatpush.msrb.mxu3 %v8959_v48  ;;  %v5620_v38 = vsub.f32 %v5618_v45, %v5619_v39 }
 0xca4   :  { %4538 = vmatpush.msra.mxu0 %v8913_v21  ;;  %4740 = vmatpush.msrb.mxu1 %v8893_v54 }
 0xca5   :  { %4799 = vmatpush.msrb.mxu2 %v8882_v32  ;;  %4838 = vmatpush.msrb.mxu3 %v8961_v49  ;;  %v5621_v61 = vand.u32 4294901760, %v5620_v38 }
 0xca6   :  { %4540 = vmatpush.msra.mxu0 %v8957_v47  ;;  %4742 = vmatpush.msrb.mxu1 %v8895_v55 }
 0xca7   :  { %4546 = vmatmul.f32.vlgmr.msra.gmra.mxu0 %v4545_v10  ;;  %4801 = vmatpush.msrb.mxu2 %v8893_v54 }
 0xca8   :  { %4691 = vmatpush.msrb.mxu0 %v8922_v9  ;;  %4844 = vmatpush.msrb.mxu3 %v8975_v12 }
 0xca9   :  { %4744 = vmatpush.msrb.mxu1 %v8897_v36  ;;  %4803 = vmatpush.msrb.mxu2 %v8895_v55 }
 0xcaa   :  { %4695 = vmatpush.msrb.mxu0 %v8925_v27  ;;  %4850 = vmatpush.msrb.mxu3 %v8986_v60 }
 0xcab   :  { %4746 = vmatpush.msrb.mxu1 %v8913_v21  ;;  %4805 = vmatpush.msrb.mxu2 %v8897_v36 }
 0xcac   :  { %4699 = vmatpush.msrb.mxu0 %v8929_v62  ;;  %4856 = vmatpush.msrb.mxu3 %v8997_v52 }
 0xcad   :  { %4748 = vmatpush.msrb.mxu1 %v8957_v47  ;;  %4807 = vmatpush.msrb.mxu2 %v8913_v21 }
 0xcae   :  { %4703 = vmatpush.msrb.mxu0 %v8939_v4  ;;  %4862 = vmatpush.msrb.mxu3 %v9005_v26 }
 0xcaf   :  { %4750 = vmatmul.f32.vlgmr.msrb.gmra.mxu1 %v9109_v51  ;;  %4809 = vmatpush.msrb.mxu2 %v8957_v47 }
 0xcb0   :  { %4927 = vmatpush.msra.mxu1 %v8878_v56  ;;  %4707 = vmatpush.msrb.mxu0 %v8953_v31 }
 0xcb1   :  { %4868 = vmatpush.msrb.mxu3 %v9013_v25  ;;  %4815 = vmatmul.f32.vlgmr.msrb.gmra.mxu2 %v4814_v44 }
 0xcb2   :  { %4929 = vmatpush.msra.mxu1 %v8880_v42  ;;  %4960 = vmatpush.msra.mxu2 %v8922_v9 }
 0xcb3   :  { %4711 = vmatpush.msrb.mxu0 %v8967_v58  ;;  %4874 = vmatpush.msrb.mxu3 %v9021_v29 }
 0xcb4   :  { %4876 = vmatmul.f32.vlgmr.msrb.gmra.mxu3 %v9132_v18  ;;  %4931 = vmatpush.msra.mxu1 %v8882_v32 }
 0xcb5   :  { %4964 = vmatpush.msra.mxu2 %v8925_v27  ;;  %5003 = vmatpush.msra.mxu3 %v8878_v56 }
 0xcb6   :  { %4715 = vmatpush.msrb.mxu0 %v8981_v20  ;;  %4933 = vmatpush.msra.mxu1 %v8893_v54 }
 0xcb7   :  { %4968 = vmatpush.msra.mxu2 %v8929_v62  ;;  %5005 = vmatpush.msra.mxu3 %v8880_v42 }
 0xcb8   :  { %4719 = vmatpush.msrb.mxu0 %v8992_v53  ;;  %4935 = vmatpush.msra.mxu1 %v8895_v55 }
 0xcb9   :  { %4721 = vmatmul.f32.vlgmr.msrb.gmra.mxu0 %v9109_v51  ;;  %4972 = vmatpush.msra.mxu2 %v8939_v4  ;;  %v9348_v51 = vld [vmem:[%s10431_s3] ss:$0 sm:$0xff] }
 0xcba   :  { %4890 = vmatpush.msra.mxu0 %v8903_v37  ;;  %5007 = vmatpush.msra.mxu3 %v8882_v32 }
 0xcbb   :  { %4937 = vmatpush.msra.mxu1 %v8897_v36  ;;  %4976 = vmatpush.msra.mxu2 %v8953_v31 }
 0xcbc   :  { %4893 = vmatpush.msra.mxu0 %v8906_v2  ;;  %5009 = vmatpush.msra.mxu3 %v8893_v54 }
 0xcbd   :  { %4939 = vmatpush.msra.mxu1 %v8913_v21  ;;  %4980 = vmatpush.msra.mxu2 %v8967_v58 }
 0xcbe   :  { %4896 = vmatpush.msra.mxu0 %v8909_v5  ;;  %5011 = vmatpush.msra.mxu3 %v8895_v55 }
 0xcbf   :  { %4941 = vmatpush.msra.mxu1 %v8957_v47  ;;  %4984 = vmatpush.msra.mxu2 %v8981_v20 }
 0xcc0   :  { %4899 = vmatpush.msra.mxu0 %v8916_v22  ;;  %5013 = vmatpush.msra.mxu3 %v8897_v36 }
 0xcc1   :  { %4945 = vmatmul.f32.vlgmr.msra.gmra.mxu1 %v4812_v28  ;;  %4988 = vmatpush.msra.mxu2 %v8992_v53 }
 0xcc2   :  { %5101 = vmatpush.msrb.mxu1 %v8959_v48  ;;  %4902 = vmatpush.msra.mxu0 %v8919_v23 }
 0xcc3   :  { %5015 = vmatpush.msra.mxu3 %v8913_v21  ;;  %4990 = vmatmul.f32.vlgmr.msra.gmra.mxu2 %v9132_v18 }
 0xcc4   :  { %5107 = vmatpush.msrb.mxu1 %v8961_v49  ;;  %5159 = vmatpush.msrb.mxu2 %v8903_v37 }
 0xcc5   :  { %4905 = vmatpush.msra.mxu0 %v8933_v63  ;;  %5017 = vmatpush.msra.mxu3 %v8957_v47 }
 0xcc6   :  { %5019 = vmatmul.f32.vlgmr.msra.gmra.mxu3 %v9132_v18  ;;  %5113 = vmatpush.msrb.mxu1 %v8975_v12  ;;  %v5860_v18 = vsel %vm127_vm9, %v5858_v6, 0 }
 0xcc7   :  { %5162 = vmatpush.msrb.mxu2 %v8906_v2  ;;  %5196 = vmatpush.msrb.mxu3 %v8878_v56  ;;  %v9368_v14 = vand.u32 4294901760, %v5860_v18 }
 0xcc8   :  { %4908 = vmatpush.msra.mxu0 %v8943_v7  ;;  %5119 = vmatpush.msrb.mxu1 %v8986_v60 }
 0xcc9   :  { %5165 = vmatpush.msrb.mxu2 %v8909_v5  ;;  %5198 = vmatpush.msrb.mxu3 %v8880_v42 }
 0xcca   :  { %4911 = vmatpush.msra.mxu0 %v8972_v0  ;;  %5125 = vmatpush.msrb.mxu1 %v8997_v52 }
 0xccb   :  { %4914 = vmatmul.f32.vlgmr.msra.gmra.mxu0 %v9142_v43  ;;  %5168 = vmatpush.msrb.mxu2 %v8916_v22 }
 0xccc   :  { %5064 = vmatpush.msrb.mxu0 %v8878_v56  ;;  %5200 = vmatpush.msrb.mxu3 %v8882_v32 }
 0xccd   :  { %5131 = vmatpush.msrb.mxu1 %v9005_v26  ;;  %5171 = vmatpush.msrb.mxu2 %v8919_v23 }
 0xcce   :  { %5066 = vmatpush.msrb.mxu0 %v8880_v42  ;;  %5202 = vmatpush.msrb.mxu3 %v8893_v54 }
 0xccf   :  { %5137 = vmatpush.msrb.mxu1 %v9013_v25  ;;  %5174 = vmatpush.msrb.mxu2 %v8933_v63 }
 0xcd0   :  { %5068 = vmatpush.msrb.mxu0 %v8882_v32  ;;  %5204 = vmatpush.msrb.mxu3 %v8895_v55 }
 0xcd1   :  { %5143 = vmatpush.msrb.mxu1 %v9021_v29  ;;  %5177 = vmatpush.msrb.mxu2 %v8943_v7 }
 0xcd2   :  { %5070 = vmatpush.msrb.mxu0 %v8893_v54  ;;  %5206 = vmatpush.msrb.mxu3 %v8897_v36 }
 0xcd3   :  { %5145 = vmatmul.f32.vlgmr.msrb.gmra.mxu1 %v9224_v33  ;;  %5180 = vmatpush.msrb.mxu2 %v8972_v0 }
 0xcd4   :  { %5272 = vmatpush.msra.mxu1 %v8878_v56  ;;  %5072 = vmatpush.msrb.mxu0 %v8895_v55 }
 0xcd5   :  { %5208 = vmatpush.msrb.mxu3 %v8913_v21  ;;  %5183 = vmatmul.f32.vlgmr.msrb.gmra.mxu2 %v5080_v15  ;;  %v9379_v15 = vsub.f32 %v5860_v18, %v9368_v14 }
 0xcd6   :  { %5274 = vmatpush.msra.mxu1 %v8880_v42  ;;  %5333 = vmatpush.msra.mxu2 %v8878_v56 }
 0xcd7   :  { %5074 = vmatpush.msrb.mxu0 %v8897_v36  ;;  %5210 = vmatpush.msrb.mxu3 %v8957_v47 }
 0xcd8   :  { %5214 = vmatmul.f32.vlgmr.msrb.gmra.mxu3 %v5081_v3  ;;  %5276 = vmatpush.msra.mxu1 %v8882_v32 }
 0xcd9   :  { %5335 = vmatpush.msra.mxu2 %v8880_v42  ;;  %5370 = vmatpush.msra.mxu3 %v8959_v48 }
 0xcda   :  { %5076 = vmatpush.msrb.mxu0 %v8913_v21  ;;  %5278 = vmatpush.msra.mxu1 %v8893_v54 }
 0xcdb   :  { %5337 = vmatpush.msra.mxu2 %v8882_v32  ;;  %5376 = vmatpush.msra.mxu3 %v8961_v49 }
 0xcdc   :  { %5078 = vmatpush.msrb.mxu0 %v8957_v47  ;;  %5280 = vmatpush.msra.mxu1 %v8895_v55 }
 0xcdd   :  { %5084 = vmatmul.f32.vlgmr.msrb.gmra.mxu0 %v5083_v57  ;;  %5339 = vmatpush.msra.mxu2 %v8893_v54 }
 0xcde   :  { %5229 = vmatpush.msra.mxu0 %v8922_v9  ;;  %5382 = vmatpush.msra.mxu3 %v8975_v12 }
 0xcdf   :  { %5282 = vmatpush.msra.mxu1 %v8897_v36  ;;  %5341 = vmatpush.msra.mxu2 %v8895_v55 }
 0xce0   :  { %5233 = vmatpush.msra.mxu0 %v8925_v27  ;;  %5388 = vmatpush.msra.mxu3 %v8986_v60 }
 0xce1   :  { %5284 = vmatpush.msra.mxu1 %v8913_v21  ;;  %5343 = vmatpush.msra.mxu2 %v8897_v36 }
 0xce2   :  { %5237 = vmatpush.msra.mxu0 %v8929_v62  ;;  %5394 = vmatpush.msra.mxu3 %v8997_v52 }
 0xce3   :  { %5286 = vmatpush.msra.mxu1 %v8957_v47  ;;  %5345 = vmatpush.msra.mxu2 %v8913_v21 }
 0xce4   :  { %5241 = vmatpush.msra.mxu0 %v8939_v4  ;;  %5400 = vmatpush.msra.mxu3 %v9005_v26 }
 0xce5   :  { %5288 = vmatmul.f32.vlgmr.msra.gmra.mxu1 %v9224_v33  ;;  %5347 = vmatpush.msra.mxu2 %v8957_v47 }
 0xce6   :  { %5465 = vmatpush.msrb.mxu1 %v8878_v56  ;;  %5245 = vmatpush.msra.mxu0 %v8953_v31 }
 0xce7   :  { %5406 = vmatpush.msra.mxu3 %v9013_v25  ;;  %5353 = vmatmul.f32.vlgmr.msra.gmra.mxu2 %v5352_v11 }
 0xce8   :  { %5467 = vmatpush.msrb.mxu1 %v8880_v42  ;;  %5498 = vmatpush.msrb.mxu2 %v8922_v9 }
 0xce9   :  { %5249 = vmatpush.msra.mxu0 %v8967_v58  ;;  %5412 = vmatpush.msra.mxu3 %v9021_v29 }
 0xcea   :  { %5414 = vmatmul.f32.vlgmr.msra.gmra.mxu3 %v9247_v8  ;;  %5469 = vmatpush.msrb.mxu1 %v8882_v32 }
 0xceb   :  { %5502 = vmatpush.msrb.mxu2 %v8925_v27  ;;  %5541 = vmatpush.msrb.mxu3 %v8878_v56 }
 0xcec   :  { %5253 = vmatpush.msra.mxu0 %v8981_v20  ;;  %5471 = vmatpush.msrb.mxu1 %v8893_v54 }
 0xced   :  { %5506 = vmatpush.msrb.mxu2 %v8929_v62  ;;  %5543 = vmatpush.msrb.mxu3 %v8880_v42 }
 0xcee   :  { %5257 = vmatpush.msra.mxu0 %v8992_v53  ;;  %5473 = vmatpush.msrb.mxu1 %v8895_v55 }
 0xcef   :  { %5259 = vmatmul.f32.vlgmr.msra.gmra.mxu0 %v9224_v33  ;;  %5510 = vmatpush.msrb.mxu2 %v8939_v4 }
 0xcf0   :  { %5428 = vmatpush.msrb.mxu0 %v8903_v37  ;;  %5545 = vmatpush.msrb.mxu3 %v8882_v32 }
 0xcf1   :  { %5475 = vmatpush.msrb.mxu1 %v8897_v36  ;;  %5514 = vmatpush.msrb.mxu2 %v8953_v31 }
 0xcf2   :  { %5431 = vmatpush.msrb.mxu0 %v8906_v2  ;;  %5547 = vmatpush.msrb.mxu3 %v8893_v54 }
 0xcf3   :  { %5477 = vmatpush.msrb.mxu1 %v8913_v21  ;;  %5518 = vmatpush.msrb.mxu2 %v8967_v58 }
 0xcf4   :  { %5434 = vmatpush.msrb.mxu0 %v8909_v5  ;;  %5549 = vmatpush.msrb.mxu3 %v8895_v55 }
 0xcf5   :  { %5479 = vmatpush.msrb.mxu1 %v8957_v47  ;;  %5522 = vmatpush.msrb.mxu2 %v8981_v20  ;;  %v4064_v59 = vpop.f32.mrf.mxu1 }
 0xcf6   :  { %5437 = vmatpush.msrb.mxu0 %v8916_v22  ;;  %5551 = vmatpush.msrb.mxu3 %v8897_v36 }
 0xcf7   :  { %5483 = vmatmul.f32.vlgmr.msrb.gmra.mxu1 %v5350_v13  ;;  %5526 = vmatpush.msrb.mxu2 %v8992_v53 }
 0xcf8   :  { %5639 = vmatpush.msra.mxu1 %v8959_v48  ;;  %5440 = vmatpush.msrb.mxu0 %v8919_v23 }
 0xcf9   :  { %5553 = vmatpush.msrb.mxu3 %v8913_v21  ;;  %5528 = vmatmul.f32.vlgmr.msrb.gmra.mxu2 %v9247_v8 }
 0xcfa   :  { %5645 = vmatpush.msra.mxu1 %v8961_v49  ;;  %5697 = vmatpush.msra.mxu2 %v8903_v37 }
 0xcfb   :  { %5443 = vmatpush.msrb.mxu0 %v8933_v63  ;;  %5555 = vmatpush.msrb.mxu3 %v8957_v47 }
 0xcfc   :  { %5557 = vmatmul.f32.vlgmr.msrb.gmra.mxu3 %v9247_v8  ;;  %5651 = vmatpush.msra.mxu1 %v8975_v12  ;;  %v5888_v8 = vand.u32 4294901760, %v9379_v15 }
 0xcfd   :  { %5700 = vmatpush.msra.mxu2 %v8906_v2  ;;  %5734 = vmatpush.msra.mxu3 %v8878_v56  ;;  %v4003_v41 = vpop.f32.mrf.mxu0  ;;  %v4102_v35 = vpop.f32.mrf.mxu2 }
 0xcfe   :  { %5446 = vmatpush.msrb.mxu0 %v8943_v7  ;;  %5657 = vmatpush.msra.mxu1 %v8986_v60  ;;  %v4004_v1 = vadd.f32 %v9348_v51, %v4003_v41  ;;  %v4207_v28 = vpop.f32.mrf.mxu1  ;;  %v5889_v13 = vsub.f32 %v9379_v15, %v5888_v8 }
 0xcff   :  { %5703 = vmatpush.msra.mxu2 %v8909_v5  ;;  %5736 = vmatpush.msra.mxu3 %v8880_v42  ;;  %v4133_v50 = vpop.f32.mrf.mxu3 }
 0xd00   :  { %5449 = vmatpush.msrb.mxu0 %v8972_v0  ;;  %5663 = vmatpush.msra.mxu1 %v8997_v52  ;;  %v4065_v10 = vadd.f32 %v4064_v59, %v4004_v1  ;;  %v5890_v11 = vand.u32 4294901760, %v5889_v13 }
 0xd01   :  { %5452 = vmatmul.f32.vlgmr.msrb.gmra.mxu0 %v9257_v30  ;;  %5706 = vmatpush.msra.mxu2 %v8916_v22 }
 0xd02   :  { %5602 = vmatpush.msra.mxu0 %v8878_v56  ;;  %5738 = vmatpush.msra.mxu3 %v8882_v32  ;;  %v4103_v33 = vadd.f32 %v4102_v35, %v4065_v10 }
 0xd03   :  { %5669 = vmatpush.msra.mxu1 %v9005_v26  ;;  %5709 = vmatpush.msra.mxu2 %v8919_v23 }
 0xd04   :  { %5604 = vmatpush.msra.mxu0 %v8880_v42  ;;  %5740 = vmatpush.msra.mxu3 %v8893_v54 }
 0xd05   :  { %5675 = vmatpush.msra.mxu1 %v9013_v25  ;;  %5712 = vmatpush.msra.mxu2 %v8933_v63 }
 0xd06   :  { %5606 = vmatpush.msra.mxu0 %v8882_v32  ;;  %5742 = vmatpush.msra.mxu3 %v8895_v55  ;;  %v4278_v44 = vpop.f32.mrf.mxu2 }
 0xd07   :  { %5681 = vmatpush.msra.mxu1 %v9021_v29  ;;  %5715 = vmatpush.msra.mxu2 %v8943_v7  ;;  %v4178_v43 = vpop.f32.mrf.mxu0  ;;  %v4279_v24 = vadd.f32 %v9348_v51, %v4278_v44 }
 0xd08   :  { %5608 = vmatpush.msra.mxu0 %v8893_v54  ;;  %5744 = vmatpush.msra.mxu3 %v8897_v36 }
 0xd09   :  { %5683 = vmatmul.f32.vlgmr.msra.gmra.mxu1 %v9339_v17  ;;  %5718 = vmatpush.msra.mxu2 %v8972_v0  ;;  %v4339_v34 = vpop.f32.mrf.mxu3 }
 0xd0a   :  { %5810 = vmatpush.msrb.mxu1 %v8878_v56  ;;  %5610 = vmatpush.msra.mxu0 %v8895_v55  ;;  %v4340_v3 = vadd.f32 %v4339_v34, %v4279_v24 }
 0xd0b   :  { %5746 = vmatpush.msra.mxu3 %v8913_v21  ;;  %5721 = vmatmul.f32.vlgmr.msra.gmra.mxu2 %v5618_v45 }
 0xd0c   :  { %5812 = vmatpush.msrb.mxu1 %v8880_v42  ;;  %5871 = vmatpush.msrb.mxu2 %v8878_v56 }
 0xd0d   :  { %5612 = vmatpush.msra.mxu0 %v8897_v36  ;;  %5748 = vmatpush.msra.mxu3 %v8957_v47 }
 0xd0e   :  { %5752 = vmatmul.f32.vlgmr.msra.gmra.mxu3 %v5619_v39  ;;  %5814 = vmatpush.msrb.mxu1 %v8882_v32 }
 0xd0f   :  { %5873 = vmatpush.msrb.mxu2 %v8880_v42  ;;  %5908 = vmatpush.msrb.mxu3 %v8959_v48  ;;  %v4134_v48 = vadd.f32 %v4133_v50, %v4103_v33 }
 0xd10   :  { %5614 = vmatpush.msra.mxu0 %v8913_v21  ;;  %5816 = vmatpush.msrb.mxu1 %v8893_v54 }
 0xd11   :  { %5875 = vmatpush.msrb.mxu2 %v8882_v32  ;;  %5914 = vmatpush.msrb.mxu3 %v8961_v49  ;;  %v4408_v49 = vpop.f32.mrf.mxu1 }
 0xd12   :  { %5616 = vmatpush.msra.mxu0 %v8957_v47  ;;  %5818 = vmatpush.msrb.mxu1 %v8895_v55  ;;  %v4453_v46 = vpop.f32.mrf.mxu2 }
 0xd13   :  { %5622 = vmatmul.f32.vlgmr.msra.gmra.mxu0 %v5621_v61  ;;  %5877 = vmatpush.msrb.mxu2 %v8893_v54 }
 0xd14   :  { %v4377_v19 = vpop.f32.mrf.mxu0  ;;  %5767 = vmatpush.msrb.mxu0 %v8922_v9  ;;  %5920 = vmatpush.msrb.mxu3 %v8975_v12  ;;  %v4179_v12 = vadd.f32 %v4178_v43, %v4134_v48 }
 0xd15   :  { %v4378_v30 = vadd.f32 %v4377_v19, %v4340_v3  ;;  %5820 = vmatpush.msrb.mxu1 %v8897_v36  ;;  %5879 = vmatpush.msrb.mxu2 %v8895_v55 }
 0xd16   :  { %5771 = vmatpush.msrb.mxu0 %v8925_v27  ;;  %5926 = vmatpush.msrb.mxu3 %v8986_v60  ;;  %v4208_v40 = vadd.f32 %v4207_v28, %v4179_v12 }
 0xd17   :  { %v4409_v57 = vadd.f32 %v4408_v49, %v4378_v30  ;;  %5822 = vmatpush.msrb.mxu1 %v8913_v21  ;;  %5881 = vmatpush.msrb.mxu2 %v8897_v36 }
 0xd18   :  { %5775 = vmatpush.msrb.mxu0 %v8929_v62  ;;  %5932 = vmatpush.msrb.mxu3 %v8997_v52  ;;  %v4482_v52 = vpop.f32.mrf.mxu3  ;;  %7705 = vtanh.f32 %v4208_v40 }
 0xd19   :  { %5824 = vmatpush.msrb.mxu1 %v8957_v47  ;;  %5883 = vmatpush.msrb.mxu2 %v8913_v21  ;;  %v4454_v60 = vadd.f32 %v4453_v46, %v4409_v57 }
 0xd1a   :  { %5779 = vmatpush.msrb.mxu0 %v8939_v4  ;;  %5938 = vmatpush.msrb.mxu3 %v9005_v26 }
 0xd1b   :  { %5826 = vmatmul.f32.vlgmr.msrb.gmra.mxu1 %v9339_v17  ;;  %5885 = vmatpush.msrb.mxu2 %v8957_v47  ;;  %v4483_v16 = vadd.f32 %v4482_v52, %v4454_v60 }
 0xd1c   :  { %6003 = vmatpush.msra.mxu1 %v8878_v56  ;;  %5783 = vmatpush.msrb.mxu0 %v8953_v31 }
 0xd1d   :  { %5944 = vmatpush.msrb.mxu3 %v9013_v25  ;;  %5891 = vmatmul.f32.vlgmr.msrb.gmra.mxu2 %v5890_v11  ;;  %7707 = vtanh.f32 %v4483_v16 }
 0xd1e   :  { %6005 = vmatpush.msra.mxu1 %v8880_v42  ;;  %6036 = vmatpush.msra.mxu2 %v8922_v9  ;;  %v9428_v9 = vld [vmem:[%s10432_s4] ss:$0 sm:$0xff] }
 0xd1f   :  { %5787 = vmatpush.msrb.mxu0 %v8967_v58  ;;  %5950 = vmatpush.msrb.mxu3 %v9021_v29 }
 0xd20   :  { %5952 = vmatmul.f32.vlgmr.msrb.gmra.mxu3 %v9368_v14  ;;  %6007 = vmatpush.msra.mxu1 %v8882_v32 }
 0xd21   :  { %6040 = vmatpush.msra.mxu2 %v8925_v27  ;;  %6079 = vmatpush.msra.mxu3 %v8878_v56  ;;  %v9430_v27 = vpop.eup %7705 }
 0xd22   :  { %5791 = vmatpush.msrb.mxu0 %v8981_v20  ;;  %6009 = vmatpush.msra.mxu1 %v8893_v54 }
 0xd23   :  { %6044 = vmatpush.msra.mxu2 %v8929_v62  ;;  %6081 = vmatpush.msra.mxu3 %v8880_v42  ;;  %v9436_v42 = vpop.eup %7707  ;;  %v4214_v62 = vmul.f32 %v9430_v27, %v9428_v9 }
 0xd24   :  { %5795 = vmatpush.msrb.mxu0 %v8992_v53  ;;  %6011 = vmatpush.msra.mxu1 %v8895_v55  ;;  %v4547_v56 = vpop.f32.mrf.mxu0 }
 0xd25   :  { %5797 = vmatmul.f32.vlgmr.msrb.gmra.mxu0 %v9339_v17  ;;  %6048 = vmatpush.msra.mxu2 %v8939_v4 }
 0xd26   :  { %5966 = vmatpush.msra.mxu0 %v8903_v37  ;;  %6083 = vmatpush.msra.mxu3 %v8882_v32  ;;  %v4548_v32 = vadd.f32 %v9348_v51, %v4547_v56  ;;  %v4486_v37 = vmul.f32 %v9436_v42, %v9428_v9 }
 0xd27   :  { %6013 = vmatpush.msra.mxu1 %v8897_v36  ;;  %6052 = vmatpush.msra.mxu2 %v8953_v31 }
 0xd28   :  { %5969 = vmatpush.msra.mxu0 %v8906_v2  ;;  %6085 = vmatpush.msra.mxu3 %v8893_v54  ;;  %v4608_v54 = vpop.f32.mrf.mxu1  ;;  %v4216_v2 = vsel %vm4215_vm8, %v4214_v62, 0.0 }
 0xd29   :  { %6015 = vmatpush.msra.mxu1 %v8913_v21  ;;  %6056 = vmatpush.msra.mxu2 %v8967_v58 }
 0xd2a   :  { %5972 = vmatpush.msra.mxu0 %v8909_v5  ;;  %6087 = vmatpush.msra.mxu3 %v8895_v55  ;;  %v4609_v55 = vadd.f32 %v4608_v54, %v4548_v32  ;;  %v4487_v5 = vsel %vm4215_vm8, %v4486_v37, 0.0 }
 0xd2b   :  { %6017 = vmatpush.msra.mxu1 %v8957_v47  ;;  %6060 = vmatpush.msra.mxu2 %v8981_v20 }
 0xd2c   :  { %5975 = vmatpush.msra.mxu0 %v8916_v22  ;;  %6089 = vmatpush.msra.mxu3 %v8897_v36  ;;  %v4646_v36 = vpop.f32.mrf.mxu2 }
 0xd2d   :  { %6021 = vmatmul.f32.vlgmr.msra.gmra.mxu1 %v5888_v8  ;;  %6064 = vmatpush.msra.mxu2 %v8992_v53  ;;  %v4647_v22 = vadd.f32 %v4646_v36, %v4609_v55 }
 0xd2e   :  { %5978 = vmatpush.msra.mxu0 %v8919_v23  ;;  %6091 = vmatpush.msra.mxu3 %v8913_v21  ;;  %v4677_v23 = vpop.f32.mrf.mxu3 }
 0xd2f   :  { %6066 = vmatmul.f32.vlgmr.msra.gmra.mxu2 %v9368_v14  ;;  %4217 = vadd.xlane.f32.xlu0 %v4216_v2  ;;  %v4678_v21 = vadd.f32 %v4677_v23, %v4647_v22  ;;  %v7782_v2 = vmov 0  }
 0xd30   :  { %5981 = vmatpush.msra.mxu0 %v8933_v63  ;;  %6093 = vmatpush.msra.mxu3 %v8957_v47  ;;  %v4751_v58 = vpop.f32.mrf.mxu1 }
 0xd31   :  { %6095 = vmatmul.f32.vlgmr.msra.gmra.mxu3 %v9368_v14  ;;  %4488 = vadd.xlane.f32.xlu1 %v4487_v5 }
 0xd32   :  { %5984 = vmatpush.msra.mxu0 %v8943_v7  ;;  %7601 = vset.pattern.permute.xlu1 %v7782_v2 }
 0xd33   :  { %7602 = vset.pattern.permute.xlu2 %v7782_v2  ;;  %7603 = vset.pattern.permute.xlu0 %v7782_v2 }
 0xd34   :  { %5987 = vmatpush.msra.mxu0 %v8972_v0  ;;  %v4816_v63 = vpop.f32.mrf.mxu2 }
 0xd35   :  { %5990 = vmatmul.f32.vlgmr.msra.gmra.mxu0 %v9379_v15  ;;  %v4817_v26 = vadd.f32 %v9348_v51, %v4816_v63 }
 0xd36   :  { %v4722_v4 = vpop.f32.mrf.mxu0 }
 0xd37   :  { %v4723_v31 = vadd.f32 %v4722_v4, %v4678_v21  ;;  %v4877_v7 = vpop.f32.mrf.mxu3  ;;  %v9493_v21 = vld [vmem:[#allocation3] ss:$0 sm:$0xff] }
 0xd38   :  { %v4878_v25 = vadd.f32 %v4877_v7, %v4817_v26 }
 0xd39   :  { %v4752_v20 = vadd.f32 %v4751_v58, %v4723_v31 }
 0xd3b   :  { %7709 = vtanh.f32 %v4752_v20 }
 0xd3e   :  { %v4946_v17 = vpop.f32.mrf.mxu1 }
 0xd41   :  { %v9469_v47 = vpop.eup %7709 }
 0xd42   :  { %v4755_v53 = vmul.f32 %v9469_v47, %v9428_v9 }
 0xd44   :  { %v4756_v0 = vsel %vm4215_vm8, %v4755_v53, 0.0 }
 0xd45   :  { %4757 = vadd.xlane.f32.xlu2 %v4756_v0 }
 0xd46   :  { %v4991_v35 = vpop.f32.mrf.mxu2 }
 0xd48   :  { %v4915_v29 = vpop.f32.mrf.mxu0 }
 0xd49   :  { %v4916_v41 = vadd.f32 %v4915_v29, %v4878_v25  ;;  %v5020_v50 = vpop.f32.mrf.mxu3 }
 0xd4b   :  { %v4947_v59 = vadd.f32 %v4946_v17, %v4916_v41 }
 0xd4d   :  { %v4992_v45 = vadd.f32 %v4991_v35, %v4947_v59 }
 0xd4f   :  { %v5021_v6 = vadd.f32 %v5020_v50, %v4992_v45 }
 0xd50   :  { %v5146_v28 = vpop.f32.mrf.mxu1 }
 0xd51   :  { %7711 = vtanh.f32 %v5021_v6 }
 0xd57   :  { %v9475_v1 = vpop.eup %7711 }
 0xd58   :  { %v5024_v18 = vmul.f32 %v9475_v1, %v9428_v9  ;;  %v5184_v44 = vpop.f32.mrf.mxu2 }
 0xd5a   :  { %v5025_v39 = vsel %vm4215_vm8, %v5024_v18, 0.0  ;;  %v5085_v43 = vpop.f32.mrf.mxu0 }
 0xd5b   :  { %5026 = vadd.xlane.f32.xlu2 %v5025_v39  ;;  %v5086_v10 = vadd.f32 %v9348_v51, %v5085_v43  ;;  %v5215_v24 = vpop.f32.mrf.mxu3 }
 0xd5d   :  { %v5147_v14 = vadd.f32 %v5146_v28, %v5086_v10 }
 0xd5f   :  { %v5185_v38 = vadd.f32 %v5184_v44, %v5147_v14 }
 0xd61   :  { %v5216_v33 = vadd.f32 %v5215_v24, %v5185_v38 }
 0xd62   :  { %v5289_v61 = vpop.f32.mrf.mxu1 }
 0xd6a   :  { %v5354_v48 = vpop.f32.mrf.mxu2 }
 0xd6b   :  { %v5355_v30 = vadd.f32 %v9348_v51, %v5354_v48 }
 0xd6c   :  { %v5260_v15 = vpop.f32.mrf.mxu0 }
 0xd6d   :  { %v5261_v34 = vadd.f32 %v5260_v15, %v5216_v33  ;;  %v5415_v49 = vpop.f32.mrf.mxu3 }
 0xd6e   :  { %v5416_v13 = vadd.f32 %v5415_v49, %v5355_v30 }
 0xd6f   :  { %v5290_v3 = vadd.f32 %v5289_v61, %v5261_v34 }
 0xd71   :  { %7713 = vtanh.f32 %v5290_v3 }
 0xd74   :  { %v5484_v60 = vpop.f32.mrf.mxu1 }
 0xd77   :  { %v9481_v8 = vpop.eup %7713 }
 0xd78   :  { %v5293_v19 = vmul.f32 %v9481_v8, %v9428_v9 }
 0xd7a   :  { %v5294_v57 = vsel %vm4215_vm8, %v5293_v19, 0.0 }
 0xd7b   :  { %5295 = vadd.xlane.f32.xlu0 %v5294_v57 }
 0xd7c   :  { %v5529_v40 = vpop.f32.mrf.mxu2 }
 0xd7e   :  { %v5453_v12 = vpop.f32.mrf.mxu0 }
 0xd7f   :  { %v5454_v46 = vadd.f32 %v5453_v12, %v5416_v13  ;;  %v5558_v16 = vpop.f32.mrf.mxu3 }
 0xd81   :  { %v5485_v11 = vadd.f32 %v5484_v60, %v5454_v46 }
 0xd83   :  { %v5530_v52 = vadd.f32 %v5529_v40, %v5485_v11 }
 0xd85   :  { %v5559_v56 = vadd.f32 %v5558_v16, %v5530_v52 }
 0xd86   :  { %v5684_v5 = vpop.f32.mrf.mxu1 }
 0xd87   :  { %7715 = vtanh.f32 %v5559_v56 }
 0xd8d   :  { %v9487_v62 = vpop.eup %7715 }
 0xd8e   :  { %v5562_v32 = vmul.f32 %v9487_v62, %v9428_v9  ;;  %v5722_v22 = vpop.f32.mrf.mxu2 }
 0xd90   :  { %v5563_v37 = vsel %vm4215_vm8, %v5562_v32, 0.0  ;;  %v5623_v54 = vpop.f32.mrf.mxu0 }
 0xd91   :  { %5564 = vadd.xlane.f32.xlu1 %v5563_v37  ;;  %v5624_v55 = vadd.f32 %v9348_v51, %v5623_v54  ;;  %v5753_v4 = vpop.f32.mrf.mxu3 }
 0xd93   :  { %v5685_v36 = vadd.f32 %v5684_v5, %v5624_v55 }
 0xd95   :  { %v5723_v23 = vadd.f32 %v5722_v22, %v5685_v36 }
 0xd97   :  { %v5754_v31 = vadd.f32 %v5753_v4, %v5723_v23 }
 0xd98   :  { %v5827_v26 = vpop.f32.mrf.mxu1 }
 0xda0   :  { %v5892_v6 = vpop.f32.mrf.mxu2 }
 0xda1   :  { %v5893_v10 = vadd.f32 %v9348_v51, %v5892_v6 }
 0xda2   :  { %v5798_v58 = vpop.f32.mrf.mxu0  ;;  %v4218_v20 = vpop.xlane.xlu0 %4217 }
 0xda3   :  { %v5799_v63 = vadd.f32 %v5798_v58, %v5754_v31  ;;  %v4222_v53 = vadd.f32 %v9493_v21, %v4218_v20  ;;  %v5953_v28 = vpop.f32.mrf.mxu3 }
 0xda4   :  { %v4489_v7 = vpop.xlane.xlu1 %4488  ;;  %v5954_v15 = vadd.f32 %v5953_v28, %v5893_v10 }
 0xda5   :  { %v5828_v0 = vadd.f32 %v5827_v26, %v5799_v63  ;;  %v4223_v25 = vsub.f32 -inf, %v4222_v53  ;;  %v4226_v29 = vsub.f32 %v4222_v53, %v4222_v53  ;;  %v4490_v41 = vadd.f32 %v9493_v21, %v4489_v7 }
 0xda7   :  { %7717 = vtanh.f32 %v5828_v0  ;;  %v4224_v17 = vmul.f32 1.442695, %v4223_v25  ;;  %v4227_v59 = vmul.f32 1.442695, %v4226_v29  ;;  %v4491_v35 = vmax.f32 %v4222_v53, %v4490_v41 }
 0xda9   :  { %7719 = vpow2.f32 %v4224_v17  ;;  %v4492_v45 = vsub.f32 %v4222_v53, %v4491_v35  ;;  %v4495_v50 = vsub.f32 %v4490_v41, %v4491_v35 }
 0xdaa   :  { %7721 = vpow2.f32 %v4227_v59  ;;  %v6022_v19 = vpop.f32.mrf.mxu1 }
 0xdab   :  { %v4493_v18 = vmul.f32 1.442695, %v4492_v45  ;;  %v4496_v39 = vmul.f32 1.442695, %v4495_v50 }
 0xdad   :  { %v9497_v43 = vpop.eup %7717  ;;  %7723 = vpow2.f32 %v4493_v18 }
 0xdae   :  { %v5831_v14 = vmul.f32 %v9497_v43, %v9428_v9  ;;  %7725 = vpow2.f32 %v4496_v39 }
 0xdaf   :  { %v7720_v44 = vpop.eup %7719 }
 0xdb0   :  { %v5832_v38 = vsel %vm4215_vm8, %v5831_v14, 0.0  ;;  %v4229_v24 = vmul.f32 0.0, %v7720_v44  ;;  %4233 = vperm.xlu1 %7601, %v7720_v44   ;;  %v7722_v33 = vpop.eup %7721 }
 0xdb1   :  { %5833 = vadd.xlane.f32.xlu2 %v5832_v38 }
 0xdb2   :  { %v5991_v34 = vpop.f32.mrf.mxu0  ;;  %v4230_v61 = vadd.f32 %v7722_v33, %v4229_v24  ;;  %v6067_v57 = vpop.f32.mrf.mxu2 }
 0xdb3   :  { %v7724_v3 = vpop.eup %7723  ;;  %v5992_v48 = vadd.f32 %v5991_v34, %v5954_v15 }
 0xdb4   :  { %v4498_v51 = vmul.f32 %v7724_v3, %v4230_v61  ;;  %v7726_v30 = vpop.eup %7725  ;;  %v6096_v46 = vpop.f32.mrf.mxu3 }
 0xdb5   :  { %v6023_v49 = vadd.f32 %v6022_v19, %v5992_v48 }
 0xdb6   :  { %v4499_v13 = vadd.f32 %v7726_v30, %v4498_v51 }
 0xdb7   :  { %v6068_v12 = vadd.f32 %v6067_v57, %v6023_v49 }
 0xdb8   :  { %4508 = vperm.xlu1 %7601, %v7726_v30   ;;  %v4758_v60 = vpop.xlane.xlu2 %4757 }
 0xdb9   :  { %v6097_v11 = vadd.f32 %v6096_v46, %v6068_v12  ;;  %v4759_v40 = vadd.f32 %v9493_v21, %v4758_v60 }
 0xdbb   :  { %7727 = vtanh.f32 %v6097_v11  ;;  %v4760_v52 = vmax.f32 %v4491_v35, %v4759_v40 }
 0xdbd   :  { %v4761_v16 = vsub.f32 %v4491_v35, %v4760_v52  ;;  %v4764_v56 = vsub.f32 %v4759_v40, %v4760_v52 }
 0xdbf   :  { %v4762_v32 = vmul.f32 1.442695, %v4761_v16  ;;  %v4765_v37 = vmul.f32 1.442695, %v4764_v56 }
 0xdc1   :  { %v9504_v54 = vpop.eup %7727  ;;  %7729 = vpow2.f32 %v4762_v32 }
 0xdc2   :  { %v6100_v2 = vmul.f32 %v9504_v54, %v9428_v9  ;;  %7731 = vpow2.f32 %v4765_v37 }
 0xdc4   :  { %v6101_v55 = vsel %vm4215_vm8, %v6100_v2, 0.0 }
 0xdc5   :  { %6102 = vadd.xlane.f32.xlu0 %v6101_v55 }
 0xdc7   :  { %v7730_v5 = vpop.eup %7729 }
 0xdc8   :  { %v7732_v36 = vpop.eup %7731  ;;  %v4767_v22 = vmul.f32 %v7730_v5, %v4499_v13 }
 0xdc9   :  { %4239 = vperm.xlu2 %7602, %v7722_v33   ;;  %4777 = vperm.xlu1 %7601, %v7732_v36  }
 0xdca   :  { %v4768_v23 = vadd.f32 %v7732_v36, %v4767_v22 }
 0xdce   :  { %v5027_v4 = vpop.xlane.xlu2 %5026 }
 0xdcf   :  { %v5028_v31 = vadd.f32 %v9493_v21, %v5027_v4 }
 0xdd1   :  { %4771 = vperm.xlu2 %7602, %v7730_v5   ;;  %v5029_v58 = vmax.f32 %v4760_v52, %v5028_v31 }
 0xdd3   :  { %v5030_v20 = vsub.f32 %v4760_v52, %v5029_v58  ;;  %v5033_v63 = vsub.f32 %v5028_v31, %v5029_v58  ;;  %v6159_v31 = vld [vmem:[%s10434_s6 + $0x60] sm:$0xff] }
 0xdd5   :  { %v5031_v53 = vmul.f32 1.442695, %v5030_v20  ;;  %v5034_v26 = vmul.f32 1.442695, %v5033_v63  ;;  %v9525_v20 = vand.u32 4294901760, %v6159_v31  ;;  %v6157_v63 = vld [vmem:[%s10434_s6 + $0x50] sm:$0xff] }
 0xdd7   :  { %7733 = vpow2.f32 %v5031_v53 }
 0xdd8   :  { %7735 = vpow2.f32 %v5034_v26  ;;  %v9534_v26 = vsub.f32 %v6159_v31, %v9525_v20 }
 0xdd9   :  { %4502 = vperm.xlu0 %7603, %v7724_v3  }
 0xddd   :  { %v7734_v9 = vpop.eup %7733 }
 0xdde   :  { %v7736_v7 = vpop.eup %7735  ;;  %v5036_v0 = vmul.f32 %v7734_v9, %v4768_v23  ;;  %5040 = vperm.xlu2 %7602, %v7734_v9   ;;  %v9537_v9 = vand.u32 4294901760, %v6157_v63 }
 0xddf   :  { %5046 = vperm.xlu1 %7601, %v7736_v7  }
 0xde0   :  { %v5037_v25 = vadd.f32 %v7736_v7, %v5036_v0  ;;  %v6155_v7 = vld [vmem:[%s10434_s6 + $0x40] sm:$0xff] }
 0xdee   :  { %v5296_v29 = vpop.xlane.xlu0 %5295 }
 0xdef   :  { %v5297_v41 = vadd.f32 %v9493_v21, %v5296_v29  ;;  %v9549_v29 = vsub.f32 %v6157_v63, %v9537_v9 }
 0xdf1   :  { %v5298_v17 = vmax.f32 %v5029_v58, %v5297_v41 }
 0xdf3   :  { %v5299_v59 = vsub.f32 %v5029_v58, %v5298_v17  ;;  %v5302_v35 = vsub.f32 %v5297_v41, %v5298_v17  ;;  %v9552_v41 = vand.u32 4294901760, %v6155_v7 }
 0xdf5   :  { %v5300_v45 = vmul.f32 1.442695, %v5299_v59  ;;  %v5303_v50 = vmul.f32 1.442695, %v5302_v35 }
 0xdf7   :  { %7737 = vpow2.f32 %v5300_v45 }
 0xdf8   :  { %7739 = vpow2.f32 %v5303_v50  ;;  %v6227_v50 = vand.u32 4294901760, %v9549_v29 }
 0xdfd   :  { %v7738_v6 = vpop.eup %7737 }
 0xdfe   :  { %v7740_v18 = vpop.eup %7739  ;;  %v5305_v39 = vmul.f32 %v7738_v6, %v5037_v25  ;;  %5309 = vperm.xlu0 %7603, %v7738_v6   ;;  %v6221_v25 = vand.u32 4294901760, %v9534_v26  ;;  %v9564_v6 = vsub.f32 %v6155_v7, %v9552_v41 }
 0xdff   :  { %5315 = vperm.xlu1 %7601, %v7740_v18  }
 0xe00   :  { %v5306_v10 = vadd.f32 %v7740_v18, %v5305_v39  ;;  %v6222_v45 = vsub.f32 %v9534_v26, %v6221_v25  ;;  %v6151_v39 = vld [vmem:[%s10434_s6 + $0x20] sm:$0xff] }
 0xe04   :  { %v5565_v28 = vpop.xlane.xlu1 %5564 }
 0xe05   :  { %v5566_v14 = vadd.f32 %v9493_v21, %v5565_v28  ;;  %v6228_v28 = vsub.f32 %v9549_v29, %v6227_v50 }
 0xe07   :  { %v5567_v44 = vmax.f32 %v5298_v17, %v5566_v14 }
 0xe09   :  { %v5568_v38 = vsub.f32 %v5298_v17, %v5567_v44  ;;  %v5571_v24 = vsub.f32 %v5566_v14, %v5567_v44  ;;  %v6153_v17 = vld [vmem:[%s10434_s6 + $0x30] sm:$0xff]  ;;  %v6233_v14 = vand.u32 4294901760, %v9564_v6 }
 0xe0a   :  { %v9568_v18 = vand.u32 4294901760, %v6153_v17 }
 0xe0b   :  { %v5569_v33 = vmul.f32 1.442695, %v5568_v38  ;;  %v5572_v15 = vmul.f32 1.442695, %v5571_v24  ;;  %v9582_v38 = vand.u32 4294901760, %v6151_v39  ;;  %v6149_v24 = vld [vmem:[%s10434_s6 + $0x10] sm:$0xff] }
 0xe0d   :  { %7741 = vpow2.f32 %v5569_v33  ;;  %v6229_v33 = vand.u32 4294901760, %v6228_v28 }
 0xe0e   :  { %7743 = vpow2.f32 %v5572_v15  ;;  %v6234_v15 = vsub.f32 %v9564_v6, %v6233_v14 }
 0xe13   :  { %v7742_v34 = vpop.eup %7741 }
 0xe14   :  { %v7744_v61 = vpop.eup %7743  ;;  %v5574_v3 = vmul.f32 %v7742_v34, %v5306_v10  ;;  %v6223_v10 = vand.u32 4294901760, %v6222_v45 }
 0xe15   :  { %5584 = vperm.xlu0 %7603, %v7744_v61  }
 0xe16   :  { %v5575_v32 = vadd.f32 %v7744_v61, %v5574_v3 }
 0xe22   :  { %v4234_v59 = vpop.permute.xlu1 %4233 }
 0xe24   :  { %v5834_v48 = vpop.xlane.xlu2 %5833 }
 0xe25   :  { %v5835_v19 = vadd.f32 %v9493_v21, %v5834_v48  ;;  %v9596_v48 = vsub.f32 %v6151_v39, %v9582_v38  ;;  %v6156_v39 = vld [vmem:[%s10434_s6 + $0x48] sm:$0xff] }
 0xe27   :  { %v5836_v51 = vmax.f32 %v5567_v44, %v5835_v19 }
 0xe29   :  { %v5837_v30 = vsub.f32 %v5567_v44, %v5836_v51  ;;  %v5840_v13 = vsub.f32 %v5835_v19, %v5836_v51  ;;  %v9580_v44 = vsub.f32 %v6153_v17, %v9568_v18  ;;  %v6147_v19 = vld [vmem:[%s10434_s6] sm:$0xff] }
 0xe2b   :  { %v5838_v49 = vmul.f32 1.442695, %v5837_v30  ;;  %v5841_v60 = vmul.f32 1.442695, %v5840_v13  ;;  %v6239_v3 = vand.u32 4294901760, %v9580_v44  ;;  %v6245_v13 = vand.u32 4294901760, %v9596_v48 }
 0xe2c   :  { %v4240_v61 = vpop.permute.xlu2 %4239 }
 0xe2d   :  { %7745 = vpow2.f32 %v5838_v49  ;;  %v9606_v49 = vand.u32 4294901760, %v6147_v19 }
 0xe2e   :  { %7747 = vpow2.f32 %v5841_v60 }
 0xe33   :  { %v7746_v57 = vpop.eup %7745 }
 0xe34   :  { %5847 = vperm.xlu1 %7601, %v7746_v57   ;;  %v5843_v37 = vmul.f32 %v7746_v57, %v5575_v32  ;;  %v7748_v2 = vpop.eup %7747  ;;  %v6240_v57 = vsub.f32 %v9580_v44, %v6239_v3  ;;  %v6162_v32 = vld [vmem:[%s10434_s6 + $0x78] sm:$0xff] }
 0xe36   :  { %v5844_v55 = vadd.f32 %v7748_v2, %v5843_v37 }
 0xe38   :  { %v6103_v12 = vpop.xlane.xlu0 %6102 }
 0xe39   :  { %v6104_v46 = vadd.f32 %v9493_v21, %v6103_v12  ;;  %v6161_v21 = vld [vmem:[%s10434_s6 + $0x70] sm:$0xff]  ;;  %v4242_v12 = vmul.f32 %v9430_v27, %v4240_v61 }
 0xe3a   :  { %v9517_v4 = vand.u32 4294901760, %v6161_v21 }
 0xe3b   :  { %v6105_v11 = vmax.f32 %v5836_v51, %v6104_v46 }
 0xe3c   :  { %v9523_v58 = vsub.f32 %v6161_v21, %v9517_v4  ;;  %6313 = vmatpush.msrb.mxu3 %v9517_v4  ;;  %6181 = vmatpush.msrb.mxu0 %v9517_v4 }
 0xe3d   :  { %v6106_v40 = vsub.f32 %v5836_v51, %v6105_v11  ;;  %v6109_v52 = vsub.f32 %v6104_v46, %v6105_v11  ;;  %v6235_v51 = vand.u32 4294901760, %v6234_v15  ;;  %v4509_v46 = vpop.permute.xlu1 %4508  ;;  %v9618_v11 = vsub.f32 %v6147_v19, %v9606_v49 }
 0xe3e   :  { %v6215_v53 = vand.u32 4294901760, %v9523_v58  ;;  %6276 = vmatpush.msrb.mxu2 %v9523_v58  ;;  %6315 = vmatpush.msrb.mxu3 %v9525_v20 }
 0xe3f   :  { %v6107_v16 = vmul.f32 1.442695, %v6106_v40  ;;  %v6110_v56 = vmul.f32 1.442695, %v6109_v52  ;;  %6183 = vmatpush.msrb.mxu0 %v9525_v20  ;;  %v6241_v40 = vand.u32 4294901760, %v6240_v57  ;;  %v6246_v52 = vsub.f32 %v9596_v48, %v6245_v13 }
 0xe40   :  { %v6216_v0 = vsub.f32 %v9523_v58, %v6215_v53  ;;  %6279 = vmatpush.msrb.mxu2 %v9534_v26  ;;  %6317 = vmatpush.msrb.mxu3 %v9537_v9 }
 0xe41   :  { %7749 = vpow2.f32 %v6107_v16  ;;  %6185 = vmatpush.msrb.mxu0 %v9537_v9  ;;  %v4236_v16 = vmul.f32 0.0, %v4234_v59  ;;  %v4511_v59 = vmul.f32 %v9436_v42, %v4509_v46 }
 0xe42   :  { %7751 = vpow2.f32 %v6110_v56  ;;  %v6217_v35 = vand.u32 4294901760, %v6216_v0  ;;  %6282 = vmatpush.msrb.mxu2 %v9549_v29  ;;  %6319 = vmatpush.msrb.mxu3 %v9552_v41  ;;  %v6257_v56 = vand.u32 4294901760, %v9618_v11  ;;  %v6158_v0 = vld [vmem:[%s10434_s6 + $0x58] sm:$0xff] }
 0xe43   :  { %6187 = vmatpush.msrb.mxu0 %v9552_v41  ;;  %v6154_v29 = vld [vmem:[%s10434_s6 + $0x38] sm:$0xff] }
 0xe44   :  { %6218 = vmatpush.msrb.mxu1 %v6217_v35  ;;  %6285 = vmatpush.msrb.mxu2 %v9564_v6  ;;  %v4772_v35 = vpop.permute.xlu2 %4771  ;;  %v9690_v15 = vand.u32 4294901760, %v6154_v29  ;;  %v6152_v6 = vld [vmem:[%s10434_s6 + $0x28] sm:$0xff] }
 0xe45   :  { %6321 = vmatpush.msrb.mxu3 %v9568_v18  ;;  %6189 = vmatpush.msrb.mxu0 %v9568_v18  ;;  %v4778_v45 = vpop.permute.xlu1 %4777  ;;  %v9705_v19 = vand.u32 4294901760, %v6152_v6 }
 0xe46   :  { %6224 = vmatpush.msrb.mxu1 %v6223_v10  ;;  %6288 = vmatpush.msrb.mxu2 %v9580_v44  ;;  %v9674_v10 = vand.u32 4294901760, %v6156_v39  ;;  %v6150_v44 = vld [vmem:[%s10434_s6 + $0x18] sm:$0xff] }
 0xe47   :  { %v7750_v5 = vpop.eup %7749  ;;  %6323 = vmatpush.msrb.mxu3 %v9582_v38  ;;  %6191 = vmatpush.msrb.mxu0 %v9582_v38  ;;  %v9719_v46 = vand.u32 4294901760, %v6150_v44 }
 0xe48   :  { %v7752_v36 = vpop.eup %7751  ;;  %6116 = vperm.xlu0 %7603, %v7750_v5   ;;  %v6112_v22 = vmul.f32 %v7750_v5, %v5844_v55  ;;  %6230 = vmatpush.msrb.mxu1 %v6229_v33  ;;  %v9635_v55 = vand.u32 4294901760, %v6162_v32  ;;  %v4243_v5 = vadd.f32 %v4242_v12, %v4236_v16 }
 0xe49   :  { %6122 = vperm.xlu1 %7601, %v7752_v36   ;;  %6291 = vmatpush.msrb.mxu2 %v9596_v48 }
 0xe4a   :  { %v6113_v23 = vadd.f32 %v7752_v36, %v6112_v22  ;;  %6236 = vmatpush.msrb.mxu1 %v6235_v51  ;;  %v6258_v22 = vsub.f32 %v9618_v11, %v6257_v56  ;;  %v9647_v21 = vsub.f32 %v6162_v32, %v9635_v55  ;;  %v9742_v32 = vsub.f32 %v6150_v44, %v9719_v46 }
 0xe4b   :  { %v4503_v37 = vpop.permute.xlu0 %4502 }
 0xe4c   :  { %6129 = vperm.xlu2 %7602, %v6113_v23   ;;  %6242 = vmatpush.msrb.mxu1 %v6241_v40  ;;  %v6160_v23 = vld [vmem:[%s10434_s6 + $0x68] sm:$0xff]  ;;  %v4505_v63 = vmul.f32 %v4503_v37, %v4243_v5  ;;  %v6259_v7 = vand.u32 4294901760, %v6258_v22  ;;  %v6452_v58 = vand.u32 4294901760, %v9647_v21  ;;  %v9722_v40 = vsub.f32 %v6152_v6, %v9705_v19 }
 0xe4d   :  { %v9649_v31 = vand.u32 4294901760, %v6160_v23  ;;  %v6488_v5 = vand.u32 4294901760, %v9742_v32 }
 0xe4e   :  { %v6453_v26 = vsub.f32 %v9647_v21, %v6452_v58  ;;  %v4512_v28 = vadd.f32 %v4511_v59, %v4505_v63 }
 0xe4f   :  { %v9661_v17 = vsub.f32 %v6160_v23, %v9649_v31 }
 0xe50   :  { %v4774_v51 = vmul.f32 %v4772_v35, %v4512_v28 }
 0xe51   :  { %v5047_v16 = vpop.permute.xlu1 %5046 }
 0xe54   :  { %5578 = vperm.xlu2 %7602, %v7742_v34   ;;  %v9592_v34 = vand.u32 4294901760, %v6149_v24 }
 0xe56   :  { %v9604_v30 = vsub.f32 %v6149_v24, %v9592_v34  ;;  %6325 = vmatpush.msrb.mxu3 %v9592_v34  ;;  %6193 = vmatpush.msrb.mxu0 %v9592_v34 }
 0xe58   :  { %v6251_v60 = vand.u32 4294901760, %v9604_v30  ;;  %6294 = vmatpush.msrb.mxu2 %v9604_v30  ;;  %6327 = vmatpush.msrb.mxu3 %v9606_v49 }
 0xe59   :  { %6195 = vmatpush.msrb.mxu0 %v9606_v49 }
 0xe5a   :  { %v6252_v27 = vsub.f32 %v9604_v30, %v6251_v60  ;;  %6297 = vmatpush.msrb.mxu2 %v9618_v11  ;;  %v6489_v11 = vsub.f32 %v9742_v32, %v6488_v5 }
 0xe5b   :  { %6346 = vmatpush.msra.mxu0 %v6215_v53  ;;  %v9658_v53 = vand.u32 4294901760, %v6158_v0 }
 0xe5c   :  { %5853 = vperm.xlu2 %7602, %v7748_v2   ;;  %v6247_v2 = vand.u32 4294901760, %v6246_v52  ;;  %v6253_v36 = vand.u32 4294901760, %v6252_v27  ;;  %6418 = vmatpush.msra.mxu2 %v9635_v55  ;;  %v4780_v52 = vmul.f32 %v9469_v47, %v4778_v45  ;;  %v6482_v47 = vand.u32 4294901760, %v9722_v40 }
 0xe5d   :  { %6350 = vmatpush.msra.mxu0 %v6221_v25  ;;  %v6458_v25 = vand.u32 4294901760, %v9661_v17  ;;  %v9677_v42 = vsub.f32 %v6158_v0, %v9658_v53 }
 0xe5e   :  { %6248 = vmatpush.msrb.mxu1 %v6247_v2  ;;  %6420 = vmatpush.msra.mxu2 %v9649_v31  ;;  %v4781_v37 = vadd.f32 %v4780_v52, %v4774_v51 }
 0xe5f   :  { %6354 = vmatpush.msra.mxu0 %v6227_v50  ;;  %v6454_v50 = vand.u32 4294901760, %v6453_v26  ;;  %v6459_v24 = vsub.f32 %v9661_v17, %v6458_v25  ;;  %v6464_v33 = vand.u32 4294901760, %v9677_v42 }
 0xe60   :  { %6254 = vmatpush.msrb.mxu1 %v6253_v36  ;;  %6422 = vmatpush.msra.mxu2 %v9658_v53 }
 0xe61   :  { %6358 = vmatpush.msra.mxu0 %v6233_v14  ;;  %6455 = vmatpush.msra.mxu3 %v6454_v50  ;;  %v6460_v14 = vand.u32 4294901760, %v6459_v24  ;;  %v6465_v61 = vsub.f32 %v9677_v42, %v6464_v33 }
 0xe62   :  { %6260 = vmatpush.msrb.mxu1 %v6259_v7  ;;  %6424 = vmatpush.msra.mxu2 %v9674_v10  ;;  %v6490_v7 = vand.u32 4294901760, %v6489_v11 }
 0xe63   :  { %6362 = vmatpush.msra.mxu0 %v6239_v3  ;;  %6461 = vmatpush.msra.mxu3 %v6460_v14  ;;  %v6466_v3 = vand.u32 4294901760, %v6465_v61 }
 0xe64   :  { %6389 = vmatpush.msra.mxu1 %v9517_v4  ;;  %v9694_v4 = vsub.f32 %v6156_v39, %v9674_v10  ;;  %6426 = vmatpush.msra.mxu2 %v9690_v15 }
 0xe65   :  { %6366 = vmatpush.msra.mxu0 %v6245_v13  ;;  %v6148_v13 = vld [vmem:[%s10434_s6 + $0x8] sm:$0xff]  ;;  %6467 = vmatpush.msra.mxu3 %v6466_v3 }
 0xe66   :  { %6391 = vmatpush.msra.mxu1 %v9525_v20  ;;  %v9708_v20 = vsub.f32 %v6154_v29, %v9690_v15  ;;  %v6470_v57 = vand.u32 4294901760, %v9694_v4  ;;  %6428 = vmatpush.msra.mxu2 %v9705_v19 }
 0xe67   :  { %6370 = vmatpush.msra.mxu0 %v6251_v60  ;;  %v6483_v60 = vsub.f32 %v9722_v40, %v6482_v47 }
 0xe68   :  { %6393 = vmatpush.msra.mxu1 %v9537_v9  ;;  %v6476_v12 = vand.u32 4294901760, %v9708_v20  ;;  %v5041_v9 = vpop.permute.xlu2 %5040  ;;  %v6471_v48 = vsub.f32 %v9694_v4, %v6470_v57  ;;  %6430 = vmatpush.msra.mxu2 %v9719_v46 }
 0xe69   :  { %6374 = vmatpush.msra.mxu0 %v6257_v56  ;;  %v6484_v22 = vand.u32 4294901760, %v6483_v60  ;;  %v5043_v63 = vmul.f32 %v5041_v9, %v4781_v37 }
 0xe6a   :  { %6395 = vmatpush.msra.mxu1 %v9552_v41  ;;  %v6477_v27 = vsub.f32 %v9708_v20, %v6476_v12  ;;  %v9739_v41 = vand.u32 4294901760, %v6148_v13  ;;  %v6472_v2 = vand.u32 4294901760, %v6471_v48 }
 0xe6c   :  { %6397 = vmatpush.msra.mxu1 %v9568_v18  ;;  %v6478_v30 = vand.u32 4294901760, %v6477_v27  ;;  %6432 = vmatpush.msra.mxu2 %v9739_v41  ;;  %v9753_v36 = vsub.f32 %v6148_v13, %v9739_v41  ;;  %v5049_v18 = vmul.f32 %v9475_v1, %v5047_v16 }
 0xe6d   :  { %6473 = vmatpush.msra.mxu3 %v6472_v2 }
 0xe6e   :  { %6399 = vmatpush.msra.mxu1 %v9582_v38  ;;  %v6494_v56 = vand.u32 4294901760, %v9753_v36  ;;  %v5050_v1 = vadd.f32 %v5049_v18, %v5043_v63 }
 0xe6f   :  { %6479 = vmatpush.msra.mxu3 %v6478_v30 }
 0xe70   :  { %6401 = vmatpush.msra.mxu1 %v9592_v34  ;;  %v5310_v23 = vpop.permute.xlu0 %5309  ;;  %v6495_v38 = vsub.f32 %v9753_v36, %v6494_v56 }
 0xe71   :  { %v5316_v0 = vpop.permute.xlu1 %5315  ;;  %6485 = vmatpush.msra.mxu3 %v6484_v22  ;;  %v5312_v45 = vmul.f32 %v5310_v23, %v5050_v1  ;;  %v6663_v23 = vld [vmem:[%s10436_s8 + $0x78] sm:$0xff] }
 0xe72   :  { %6403 = vmatpush.msra.mxu1 %v9606_v49  ;;  %v6496_v35 = vand.u32 4294901760, %v6495_v38  ;;  %v5318_v34 = vmul.f32 %v9481_v8, %v5316_v0  ;;  %v9788_v38 = vand.u32 4294901760, %v6663_v23  ;;  %v6661_v0 = vld [vmem:[%s10436_s8 + $0x68] sm:$0xff] }
 0xe73   :  { %6491 = vmatpush.msra.mxu3 %v6490_v7 }
 0xe74   :  { %v5319_v26 = vadd.f32 %v5318_v34, %v5312_v45  ;;  %v9809_v45 = vsub.f32 %v6663_v23, %v9788_v38  ;;  %v9811_v34 = vand.u32 4294901760, %v6661_v0  ;;  %v6649_v23 = vld [vmem:[%s10436_s8 + $0x8] sm:$0xff] }
 0xe75   :  { %6497 = vmatpush.msra.mxu3 %v6496_v35 }
 0xe87   :  { %v5585_v28 = vpop.permute.xlu0 %5584 }
 0xe88   :  { %v5587_v14 = vmul.f32 %v9487_v62, %v5585_v28 }
 0xea6   :  { %v6130_v59 = vpop.permute.xlu2 %6129  ;;  %v5848_v61 = vpop.permute.xlu1 %5847 }
 0xea7   :  { %7753 = vrcp.f32 %v6130_v59  ;;  %v6143_v8 = vand.u32 2147483648, %v6130_v59  ;;  %vm6137_vm3 = vweird.f32 %v6130_v59  ;;  %v6141_v13 = vand.u32 2147483647, %v6130_v59 }
 0xea9   :  { %v6144_v30 = vor.u32 1.1754944e-38, %v6143_v8  ;;  %vm6142_vm5 = vcmp.eq.f32.partialorder %v6141_v13, 8.507059e+37 }
 0xead   :  { %v7754_v39 = vpop.eup %7753 }
 0xeae   :  { %v6133_v29 = vmul.f32 %v7754_v39, %v6130_v59  ;;  %v5579_v50 = vpop.permute.xlu2 %5578  ;;  %vm6138_vm10 = vweird.f32 %v7754_v39 }
 0xeaf   :  { %v5581_v24 = vmul.f32 %v5579_v50, %v5319_v26  ;;  %vm6139_vm4 = vmor %vm6137_vm3, %vm6138_vm10  ;;  %v9835_v26 = vsub.f32 %v6661_v0, %v9811_v34 }
 0xeb0   :  { %v6134_v6 = vsub.f32 1.0, %v6133_v29 }
 0xeb1   :  { %v5588_v49 = vadd.f32 %v5587_v14, %v5581_v24  ;;  %v6656_v24 = vld [vmem:[%s10436_s8 + $0x40] sm:$0xff] }
 0xeb2   :  { %v6135_v51 = vmul.f32 %v7754_v39, %v6134_v6  ;;  %v6734_v6 = vand.u32 4294901760, %v9835_v26 }
 0xeb3   :  { %v5850_v9 = vmul.f32 %v5848_v61, %v5588_v49 }
 0xeb4   :  { %v6136_v52 = vadd.f32 %v7754_v39, %v6135_v51  ;;  %v6735_v51 = vsub.f32 %v9835_v26, %v6734_v6 }
 0xeb6   :  { %v5854_v44 = vpop.permute.xlu2 %5853  ;;  %v6140_v2 = vsel %vm6139_vm4, %v7754_v39, %v6136_v52 }
 0xeb7   :  { %v5856_v3 = vmul.f32 %v9497_v43, %v5854_v44  ;;  %v6145_v18 = vsel %vm6142_vm5, %v6144_v30, %v6140_v2 }
 0xeb9   :  { %v5857_v16 = vadd.f32 %v5856_v3, %v5850_v9 }
 0xeba   :  { %v6117_v48 = vpop.permute.xlu0 %6116 }
 0xebb   :  { %v6119_v27 = vmul.f32 %v6117_v48, %v5857_v16  ;;  %v6123_v37 = vpop.permute.xlu1 %6122 }
 0xebc   :  { %v6125_v62 = vmul.f32 %v9504_v54, %v6123_v37  ;;  %v6662_v54 = vld [vmem:[%s10436_s8 + $0x70] sm:$0xff] }
 0xebd   :  { %v9799_v1 = vand.u32 4294901760, %v6662_v54 }
 0xebe   :  { %v6126_v60 = vadd.f32 %v6125_v62, %v6119_v27 }
 0xec0   :  { %v6146_v22 = vmul.f32 %v6145_v18, %v6126_v60  ;;  %v6650_v60 = vld [vmem:[%s10436_s8 + $0x10] sm:$0xff] }
 0xec1   :  { %v9976_v0 = vand.u32 4294901760, %v6650_v60 }
 0xec2   :  { %v6170_v43 = vsel %vm127_vm9, %v6146_v22, 0 }
 0xec3   :  { %v9771_v11 = vand.u32 4294901760, %v6170_v43 }
 0xec5   :  { %v9777_v63 = vsub.f32 %v6170_v43, %v9771_v11  ;;  %6262 = vmatmul.f32.vlgmr.msrb.gmra.mxu1 %v9771_v11 }
 0xec6   :  { %6550 = vmatpush.msrb.mxu1 %v9635_v55 }
 0xec7   :  { %6300 = vmatmul.f32.vlgmr.msrb.gmra.mxu2 %v9777_v63  ;;  %v9786_v7 = vand.u32 4294901760, %v9777_v63 }
 0xec8   :  { %6552 = vmatpush.msrb.mxu1 %v9649_v31  ;;  %6583 = vmatpush.msrb.mxu2 %v6452_v58  ;;  %v6660_v58 = vld [vmem:[%s10436_s8 + $0x60] sm:$0xff] }
 0xec9   :  { %6331 = vmatmul.f32.vlgmr.msrb.gmra.mxu3 %v9786_v7  ;;  %v6199_v59 = vsub.f32 %v9777_v63, %v9786_v7  ;;  %v9823_v39 = vand.u32 4294901760, %v6660_v58 }
 0xeca   :  { %6554 = vmatpush.msrb.mxu1 %v9658_v53  ;;  %6587 = vmatpush.msrb.mxu2 %v6458_v25  ;;  %v6659_v25 = vld [vmem:[%s10436_s8 + $0x58] sm:$0xff] }
 0xecb   :  { %6626 = vmatpush.msrb.mxu3 %v9635_v55  ;;  %v6200_v35 = vand.u32 4294901760, %v6199_v59  ;;  %v9821_v55 = vsub.f32 %v6662_v54, %v9799_v1  ;;  %v9837_v28 = vand.u32 4294901760, %v6659_v25  ;;  %v9847_v29 = vsub.f32 %v6660_v58, %v9823_v39  ;;  %v6648_v58 = vld [vmem:[%s10436_s8] sm:$0xff] }
 0xecc   :  { %6556 = vmatpush.msrb.mxu1 %v9674_v10  ;;  %6591 = vmatpush.msrb.mxu2 %v6464_v33  ;;  %v6658_v33 = vld [vmem:[%s10436_s8 + $0x50] sm:$0xff] }
 0xecd   :  { %6628 = vmatpush.msrb.mxu3 %v9649_v31  ;;  %6201 = vmatmul.f32.vlgmr.msrb.gmra.mxu0 %v6200_v35  ;;  %v6722_v31 = vand.u32 4294901760, %v9809_v45  ;;  %v9849_v50 = vand.u32 4294901760, %v6658_v33  ;;  %v9866_v14 = vsub.f32 %v6659_v25, %v9837_v28  ;;  %v6740_v61 = vand.u32 4294901760, %v9847_v29 }
 0xece   :  { %6405 = vmatmul.f32.vlgmr.msra.gmra.mxu1 %v9771_v11  ;;  %6513 = vmatpush.msrb.mxu0 %v9647_v21  ;;  %v6657_v21 = vld [vmem:[%s10436_s8 + $0x48] sm:$0xff] }
 0xecf   :  { %6558 = vmatpush.msrb.mxu1 %v9690_v15  ;;  %6595 = vmatpush.msrb.mxu2 %v6470_v57  ;;  %v6728_v57 = vand.u32 4294901760, %v9821_v55  ;;  %v9883_v49 = vsub.f32 %v6658_v33, %v9849_v50  ;;  %v6746_v44 = vand.u32 4294901760, %v9866_v14  ;;  %v6741_v52 = vsub.f32 %v9847_v29, %v6740_v61 }
 0xed0   :  { %6630 = vmatpush.msrb.mxu3 %v9658_v53  ;;  %6438 = vmatmul.f32.vlgmr.msra.gmra.mxu2 %v6200_v35  ;;  %v9857_v53 = vand.u32 4294901760, %v6657_v21 }
 0xed1   :  { %6516 = vmatpush.msrb.mxu0 %v9661_v17  ;;  %6560 = vmatpush.msrb.mxu1 %v9705_v19  ;;  %v6723_v17 = vsub.f32 %v9809_v45, %v6722_v31  ;;  %v6752_v8 = vand.u32 4294901760, %v9883_v49  ;;  %v6747_v48 = vsub.f32 %v9866_v14, %v6746_v44  ;;  %v6742_v37 = vand.u32 4294901760, %v6741_v52 }
 0xed2   :  { %6599 = vmatpush.msrb.mxu2 %v6476_v12  ;;  %6632 = vmatpush.msrb.mxu3 %v9674_v10  ;;  %v9871_v10 = vand.u32 4294901760, %v6656_v24  ;;  %v6729_v12 = vsub.f32 %v9821_v55, %v6728_v57 }
 0xed3   :  { %6499 = vmatmul.f32.vlgmr.msra.gmra.mxu3 %v9771_v11  ;;  %6519 = vmatpush.msrb.mxu0 %v9677_v42  ;;  %v6655_v42 = vld [vmem:[%s10436_s8 + $0x38] sm:$0xff]  ;;  %v6753_v2 = vsub.f32 %v9883_v49, %v6752_v8  ;;  %v6748_v18 = vand.u32 4294901760, %v6747_v48 }
 0xed4   :  { %6562 = vmatpush.msrb.mxu1 %v9719_v46  ;;  %6603 = vmatpush.msrb.mxu2 %v6482_v47  ;;  %v9889_v47 = vsub.f32 %v6657_v21, %v9857_v53  ;;  %v9900_v3 = vand.u32 4294901760, %v6655_v42  ;;  %v6730_v9 = vand.u32 4294901760, %v6729_v12  ;;  %v9991_v21 = vand.u32 4294901760, %v6649_v23 }
 0xed5   :  { %6634 = vmatpush.msrb.mxu3 %v9690_v15  ;;  %6522 = vmatpush.msrb.mxu0 %v9694_v4  ;;  %v6654_v15 = vld [vmem:[%s10436_s8 + $0x30] sm:$0xff]  ;;  %v6724_v4 = vand.u32 4294901760, %v6723_v17  ;;  %v10001_v12 = vsub.f32 %v6650_v60, %v9976_v0 }
 0xed6   :  { %6564 = vmatpush.msrb.mxu1 %v9739_v41  ;;  %6607 = vmatpush.msrb.mxu2 %v6488_v5  ;;  %v9905_v5 = vsub.f32 %v6656_v24, %v9871_v10  ;;  %v6758_v16 = vand.u32 4294901760, %v9889_v47  ;;  %v9930_v13 = vsub.f32 %v6655_v42, %v9900_v3 }
 0xed7   :  { %6636 = vmatpush.msrb.mxu3 %v9705_v19  ;;  %6376 = vmatmul.f32.vlgmr.msra.gmra.mxu0 %v9771_v11  ;;  %v6653_v19 = vld [vmem:[%s10436_s8 + $0x28] sm:$0xff] }
 0xed8   :  { %6568 = vmatmul.f32.vlgmr.msrb.gmra.mxu1 %v9786_v7  ;;  %6525 = vmatpush.msrb.mxu0 %v9708_v20  ;;  %v9917_v20 = vand.u32 4294901760, %v6654_v15  ;;  %v9932_v27 = vand.u32 4294901760, %v6653_v19  ;;  %v6770_v22 = vand.u32 4294901760, %v9930_v13 }
 0xed9   :  { %6611 = vmatpush.msrb.mxu2 %v6494_v56  ;;  %6638 = vmatpush.msrb.mxu3 %v9719_v46  ;;  %v6652_v56 = vld [vmem:[%s10436_s8 + $0x20] sm:$0xff]  ;;  %v6736_v46 = vand.u32 4294901760, %v6735_v51 }
 0xeda   :  { %6613 = vmatmul.f32.vlgmr.msrb.gmra.mxu2 %v9771_v11  ;;  %6528 = vmatpush.msrb.mxu0 %v9722_v40  ;;  %v6764_v40 = vand.u32 4294901760, %v9905_v5  ;;  %v9944_v62 = vsub.f32 %v6654_v15, %v9917_v20  ;;  %v9947_v30 = vand.u32 4294901760, %v6652_v56  ;;  %v9960_v43 = vsub.f32 %v6653_v19, %v9932_v27 }
 0xedb   :  { %6640 = vmatpush.msrb.mxu3 %v9739_v41  ;;  %6725 = vmatpush.msra.mxu1 %v6724_v4  ;;  %v6651_v41 = vld [vmem:[%s10436_s8 + $0x18] sm:$0xff]  ;;  %v6771_v35 = vsub.f32 %v9930_v13, %v6770_v22  ;;  %v10003_v15 = vand.u32 4294901760, %v6648_v58 }
 0xedc   :  { %6642 = vmatmul.f32.vlgmr.msrb.gmra.mxu3 %v9771_v11  ;;  %6531 = vmatpush.msrb.mxu0 %v9742_v32  ;;  %v6759_v32 = vsub.f32 %v9889_v47, %v6758_v16  ;;  %v6765_v11 = vsub.f32 %v9905_v5, %v6764_v40  ;;  %v6776_v54 = vand.u32 4294901760, %v9944_v62  ;;  %v9974_v7 = vsub.f32 %v6652_v56, %v9947_v30 }
 0xedd   :  { %6731 = vmatpush.msra.mxu1 %v6730_v9  ;;  %6876 = vmatpush.msra.mxu3 %v9788_v38  ;;  %v6782_v25 = vand.u32 4294901760, %v9960_v43  ;;  %v6772_v4 = vand.u32 4294901760, %v6771_v35  ;;  %v10013_v9 = vsub.f32 %v6649_v23, %v9991_v21  ;;  %v10023_v48 = vsub.f32 %v6648_v58, %v10003_v15 }
 0xede   :  { %6534 = vmatpush.msrb.mxu0 %v9753_v36  ;;  %6823 = vmatpush.msra.mxu2 %v9809_v45  ;;  %v9962_v36 = vand.u32 4294901760, %v6651_v41  ;;  %v6760_v59 = vand.u32 4294901760, %v6759_v32  ;;  %v6766_v24 = vand.u32 4294901760, %v6765_v11  ;;  %v6777_v17 = vsub.f32 %v9944_v62, %v6776_v54  ;;  %v6670_v45 = vld [vmem:[%s10436_s8 + $0xb0] sm:$0xff] }
 0xedf   :  { %6537 = vmatmul.f32.vlgmr.msrb.gmra.mxu0 %v9777_v63  ;;  %6737 = vmatpush.msra.mxu1 %v6736_v46  ;;  %v6754_v63 = vand.u32 4294901760, %v6753_v2  ;;  %v6788_v42 = vand.u32 4294901760, %v9974_v7  ;;  %v6783_v51 = vsub.f32 %v9960_v43, %v6782_v25  ;;  %v6800_v46 = vand.u32 4294901760, %v10001_v12 }
 0xee0   :  { %6680 = vmatpush.msra.mxu0 %v9788_v38  ;;  %6878 = vmatpush.msra.mxu3 %v9799_v1  ;;  %v9989_v33 = vsub.f32 %v6651_v41, %v9962_v36  ;;  %v6778_v52 = vand.u32 4294901760, %v6777_v17  ;;  %v6806_v2 = vand.u32 4294901760, %v10013_v9 }
 0xee1   :  { %6743 = vmatpush.msra.mxu1 %v6742_v37  ;;  %6826 = vmatpush.msra.mxu2 %v9821_v55  ;;  %v6789_v56 = vsub.f32 %v9974_v7, %v6788_v42  ;;  %v6784_v41 = vand.u32 4294901760, %v6783_v51  ;;  %v6801_v60 = vsub.f32 %v10001_v12, %v6800_v46  ;;  %v10130_v55 = vand.u32 4294901760, %v6670_v45 }
 0xee2   :  { %6682 = vmatpush.msra.mxu0 %v9799_v1  ;;  %6880 = vmatpush.msra.mxu3 %v9811_v34  ;;  %v6794_v19 = vand.u32 4294901760, %v9989_v33  ;;  %v6807_v23 = vsub.f32 %v10013_v9, %v6806_v2 }
 0xee3   :  { %6749 = vmatpush.msra.mxu1 %v6748_v18  ;;  %6829 = vmatpush.msra.mxu2 %v9835_v26  ;;  %v6790_v32 = vand.u32 4294901760, %v6789_v56  ;;  %v6812_v18 = vand.u32 4294901760, %v10023_v48  ;;  %v10138_v26 = vsub.f32 %v6670_v45, %v10130_v55 }
 0xee4   :  { %6684 = vmatpush.msra.mxu0 %v9811_v34  ;;  %6882 = vmatpush.msra.mxu3 %v9823_v39  ;;  %v6795_v37 = vsub.f32 %v9989_v33, %v6794_v19  ;;  %v6808_v58 = vand.u32 4294901760, %v6807_v23 }
 0xee5   :  { %6755 = vmatpush.msra.mxu1 %v6754_v63  ;;  %6832 = vmatpush.msra.mxu2 %v9847_v29  ;;  %v6802_v63 = vand.u32 4294901760, %v6801_v60 }
 0xee6   :  { %6686 = vmatpush.msra.mxu0 %v9823_v39  ;;  %6884 = vmatpush.msra.mxu3 %v9837_v28  ;;  %v6796_v11 = vand.u32 4294901760, %v6795_v37 }
 0xee7   :  { %6761 = vmatpush.msra.mxu1 %v6760_v59  ;;  %6835 = vmatpush.msra.mxu2 %v9866_v14  ;;  %v6813_v59 = vsub.f32 %v10023_v48, %v6812_v18  ;;  %v6667_v14 = vld [vmem:[%s10436_s8 + $0x98] sm:$0xff] }
 0xee8   :  { %6688 = vmatpush.msra.mxu0 %v9837_v28  ;;  %6886 = vmatpush.msra.mxu3 %v9849_v50 }
 0xee9   :  { %6767 = vmatpush.msra.mxu1 %v6766_v24  ;;  %6838 = vmatpush.msra.mxu2 %v9883_v49  ;;  %v6814_v35 = vand.u32 4294901760, %v6813_v59 }
 0xeea   :  { %6690 = vmatpush.msra.mxu0 %v9849_v50  ;;  %6888 = vmatpush.msra.mxu3 %v9857_v53 }
 0xeeb   :  { %6773 = vmatpush.msra.mxu1 %v6772_v4  ;;  %6841 = vmatpush.msra.mxu2 %v9889_v47 }
 0xeec   :  { %6692 = vmatpush.msra.mxu0 %v9857_v53  ;;  %6890 = vmatpush.msra.mxu3 %v9871_v10 }
 0xeed   :  { %6779 = vmatpush.msra.mxu1 %v6778_v52  ;;  %6844 = vmatpush.msra.mxu2 %v9905_v5  ;;  %v6163_v52 = vld [vmem:[%s10435_s7] sm:$0x3] }
 0xeee   :  { %6694 = vmatpush.msra.mxu0 %v9871_v10  ;;  %6892 = vmatpush.msra.mxu3 %v9900_v3  ;;  %v6165_v56 = vperm.slane %v6163_v52, 0  ;;  %v6166_v23 = vperm.slane %v6163_v52, 1 }
 0xeef   :  { %6785 = vmatpush.msra.mxu1 %v6784_v41  ;;  %6847 = vmatpush.msra.mxu2 %v9930_v13 }
 0xef0   :  { %6696 = vmatpush.msra.mxu0 %v9900_v3  ;;  %6894 = vmatpush.msra.mxu3 %v9917_v20 }
 0xef1   :  { %6791 = vmatpush.msra.mxu1 %v6790_v32  ;;  %6850 = vmatpush.msra.mxu2 %v9944_v62 }
 0xef2   :  { %6698 = vmatpush.msra.mxu0 %v9917_v20  ;;  %6896 = vmatpush.msra.mxu3 %v9932_v27 }
 0xef3   :  { %6797 = vmatpush.msra.mxu1 %v6796_v11  ;;  %6853 = vmatpush.msra.mxu2 %v9960_v43 }
 0xef4   :  { %6700 = vmatpush.msra.mxu0 %v9932_v27  ;;  %6898 = vmatpush.msra.mxu3 %v9947_v30 }
 0xef5   :  { %6803 = vmatpush.msra.mxu1 %v6802_v63  ;;  %6856 = vmatpush.msra.mxu2 %v9974_v7 }
 0xef6   :  { %6702 = vmatpush.msra.mxu0 %v9947_v30  ;;  %6900 = vmatpush.msra.mxu3 %v9962_v36 }
 0xef7   :  { %6809 = vmatpush.msra.mxu1 %v6808_v58  ;;  %6859 = vmatpush.msra.mxu2 %v9989_v33 }
 0xef8   :  { %6704 = vmatpush.msra.mxu0 %v9962_v36  ;;  %6902 = vmatpush.msra.mxu3 %v9976_v0 }
 0xef9   :  { %6815 = vmatpush.msra.mxu1 %v6814_v35  ;;  %6862 = vmatpush.msra.mxu2 %v10001_v12 }
 0xefa   :  { %6706 = vmatpush.msra.mxu0 %v9976_v0  ;;  %6904 = vmatpush.msra.mxu3 %v9991_v21 }
 0xefb   :  { %6984 = vmatpush.msrb.mxu1 %v9788_v38  ;;  %6865 = vmatpush.msra.mxu2 %v10013_v9  ;;  %v6671_v38 = vld [vmem:[%s10436_s8 + $0xb8] sm:$0xff] }
 0xefc   :  { %6708 = vmatpush.msra.mxu0 %v9991_v21  ;;  %6906 = vmatpush.msra.mxu3 %v10003_v15 }
 0xefd   :  { %6986 = vmatpush.msrb.mxu1 %v9799_v1  ;;  %6868 = vmatpush.msra.mxu2 %v10023_v48  ;;  %v10122_v1 = vand.u32 4294901760, %v6671_v38 }
 0xefe   :  { %6710 = vmatpush.msra.mxu0 %v10003_v15 }
 0xeff   :  { %6988 = vmatpush.msrb.mxu1 %v9811_v34  ;;  %v10128_v34 = vsub.f32 %v6671_v38, %v10122_v1  ;;  %7029 = vmatpush.msrb.mxu2 %v10122_v1 }
 0xf00   :  { %6917 = vmatpush.msrb.mxu0 %v6722_v31 }
 0xf01   :  { %6990 = vmatpush.msrb.mxu1 %v9823_v39  ;;  %v6669_v39 = vld [vmem:[%s10436_s8 + $0xa8] sm:$0xff]  ;;  %v7063_v31 = vand.u32 4294901760, %v10128_v34  ;;  %7031 = vmatpush.msrb.mxu2 %v10130_v55 }
 0xf02   :  { %6921 = vmatpush.msrb.mxu0 %v6728_v57  ;;  %v6668_v57 = vld [vmem:[%s10436_s8 + $0xa0] sm:$0xff] }
 0xf03   :  { %6992 = vmatpush.msrb.mxu1 %v9837_v28  ;;  %v10140_v28 = vand.u32 4294901760, %v6669_v39  ;;  %v7064_v29 = vsub.f32 %v10128_v34, %v7063_v31 }
 0xf04   :  { %6925 = vmatpush.msrb.mxu0 %v6734_v6  ;;  %v10153_v6 = vand.u32 4294901760, %v6668_v57 }
 0xf05   :  { %6994 = vmatpush.msrb.mxu1 %v9849_v50  ;;  %v7069_v50 = vand.u32 4294901760, %v10138_v26  ;;  %7033 = vmatpush.msrb.mxu2 %v10140_v28 }
 0xf06   :  { %6929 = vmatpush.msrb.mxu0 %v6740_v61  ;;  %v10164_v47 = vsub.f32 %v6668_v57, %v10153_v6 }
 0xf07   :  { %6996 = vmatpush.msrb.mxu1 %v9857_v53  ;;  %v10151_v53 = vsub.f32 %v6669_v39, %v10140_v28  ;;  %v7070_v61 = vsub.f32 %v10138_v26, %v7069_v50  ;;  %7035 = vmatpush.msrb.mxu2 %v10153_v6 }
 0xf08   :  { %6933 = vmatpush.msrb.mxu0 %v6746_v44  ;;  %v10167_v44 = vand.u32 4294901760, %v6667_v14 }
 0xf09   :  { %6998 = vmatpush.msrb.mxu1 %v9871_v10  ;;  %v7065_v10 = vand.u32 4294901760, %v7064_v29  ;;  %v7075_v49 = vand.u32 4294901760, %v10151_v53  ;;  %v7071_v5 = vand.u32 4294901760, %v7070_v61 }
 0xf0a   :  { %6937 = vmatpush.msrb.mxu0 %v6752_v8  ;;  %v10179_v13 = vsub.f32 %v6667_v14, %v10167_v44  ;;  %7037 = vmatpush.msrb.mxu2 %v10167_v44 }
 0xf0b   :  { %7000 = vmatpush.msrb.mxu1 %v9900_v3  ;;  %v6666_v3 = vld [vmem:[%s10436_s8 + $0x90] sm:$0xff]  ;;  %7066 = vmatpush.msrb.mxu3 %v7065_v10  ;;  %v7076_v8 = vsub.f32 %v10151_v53, %v7075_v49 }
 0xf0c   :  { %6941 = vmatpush.msrb.mxu0 %v6758_v16  ;;  %v10176_v16 = vand.u32 4294901760, %v6666_v3  ;;  %v7087_v43 = vand.u32 4294901760, %v10179_v13 }
 0xf0d   :  { %7002 = vmatpush.msrb.mxu1 %v9917_v20  ;;  %v7081_v20 = vand.u32 4294901760, %v10164_v47  ;;  %7072 = vmatpush.msrb.mxu3 %v7071_v5 }
 0xf0e   :  { %6945 = vmatpush.msrb.mxu0 %v6764_v40  ;;  %v7077_v40 = vand.u32 4294901760, %v7076_v8  ;;  %7039 = vmatpush.msrb.mxu2 %v10176_v16  ;;  %v7088_v33 = vsub.f32 %v10179_v13, %v7087_v43 }
 0xf0f   :  { %7004 = vmatpush.msrb.mxu1 %v9932_v27  ;;  %v6665_v27 = vld [vmem:[%s10436_s8 + $0x88] sm:$0xff]  ;;  %v7082_v62 = vsub.f32 %v10164_v47, %v7081_v20 }
 0xf10   :  { %6949 = vmatpush.msrb.mxu0 %v6770_v22  ;;  %v10191_v22 = vand.u32 4294901760, %v6665_v27  ;;  %7078 = vmatpush.msrb.mxu3 %v7077_v40 }
 0xf11   :  { %7006 = vmatpush.msrb.mxu1 %v9947_v30  ;;  %v10189_v30 = vsub.f32 %v6666_v3, %v10176_v16 }
 0xf12   :  { %6953 = vmatpush.msrb.mxu0 %v6776_v54  ;;  %v7083_v54 = vand.u32 4294901760, %v7082_v62  ;;  %7041 = vmatpush.msrb.mxu2 %v10191_v22 }
 0xf13   :  { %7008 = vmatpush.msrb.mxu1 %v9962_v36  ;;  %v6664_v36 = vld [vmem:[%s10436_s8 + $0x80] sm:$0xff]  ;;  %v7093_v7 = vand.u32 4294901760, %v10189_v30  ;;  %s7564_s8 = sshll.u32 %s7783_s16, 4  ;;  %s7565_s8 = int_to_ptr.vmem [resolvable:$true] %s7564_s8 }
 0xf14   :  { %6957 = vmatpush.msrb.mxu0 %v6782_v25  ;;  %v10202_v25 = vand.u32 4294901760, %v6664_v36  ;;  %7084 = vmatpush.msrb.mxu3 %v7083_v54 }
 0xf15   :  { %7010 = vmatpush.msrb.mxu1 %v9976_v0  ;;  %v10200_v0 = vsub.f32 %v6665_v27, %v10191_v22 }
 0xf16   :  { %6961 = vmatpush.msrb.mxu0 %v6788_v42  ;;  %v10213_v17 = vsub.f32 %v6664_v36, %v10202_v25  ;;  %v7089_v42 = vand.u32 4294901760, %v7088_v33  ;;  %7043 = vmatpush.msrb.mxu2 %v10202_v25 }
 0xf17   :  { %7012 = vmatpush.msrb.mxu1 %v9991_v21  ;;  %v7094_v21 = vsub.f32 %v10189_v30, %v7093_v7  ;;  %v7099_v24 = vand.u32 4294901760, %v10200_v0 }
 0xf18   :  { %6965 = vmatpush.msrb.mxu0 %v6794_v19  ;;  %v7105_v4 = vand.u32 4294901760, %v10213_v17  ;;  %7090 = vmatpush.msrb.mxu3 %v7089_v42 }
 0xf19   :  { %7014 = vmatpush.msrb.mxu1 %v10003_v15  ;;  %v7095_v12 = vand.u32 4294901760, %v7094_v21  ;;  %v7100_v15 = vsub.f32 %v10200_v0, %v7099_v24 }
 0xf1a   :  { %6969 = vmatpush.msrb.mxu0 %v6800_v46  ;;  %v7106_v19 = vsub.f32 %v10213_v17, %v7105_v4 }
 0xf1b   :  { %v7101_v51 = vand.u32 4294901760, %v7100_v15  ;;  %7096 = vmatpush.msrb.mxu3 %v7095_v12 }
 0xf1c   :  { %6973 = vmatpush.msrb.mxu0 %v6806_v2  ;;  %v7107_v9 = vand.u32 4294901760, %v7106_v19 }
 0xf1d   :  { %7102 = vmatpush.msrb.mxu3 %v7101_v51  ;;  %v7263_v51 = vld [vmem:[%s10438_s10 + $0x28] sm:$0xff] }
 0xf1e   :  { %6977 = vmatpush.msrb.mxu0 %v6812_v18 }
 0xf1f   :  { %7108 = vmatpush.msrb.mxu3 %v7107_v9 }
 0xf42   :  { %v6263_v46 = vpop.f32.mrf.mxu1 }
 0xf4a   :  { %v6202_v48 = vpop.f32.mrf.mxu0  ;;  %v6301_v41 = vpop.f32.mrf.mxu2 }
 0xf4b   :  { %v6203_v37 = vadd.f32 %v6202_v48, %v6165_v56  ;;  %v6406_v11 = vpop.f32.mrf.mxu1  ;;  %v10331_v56 = vand.u32 4294901760, %v7263_v51  ;;  %v7262_v48 = vld [vmem:[%s10438_s10 + $0x20] sm:$0xff] }
 0xf4c   :  { %v6332_v32 = vpop.f32.mrf.mxu3 }
 0xf4d   :  { %v6264_v2 = vadd.f32 %v6263_v46, %v6203_v37 }
 0xf4f   :  { %v6302_v60 = vadd.f32 %v6301_v41, %v6264_v2  ;;  %v10346_v2 = vsub.f32 %v7263_v51, %v10331_v56 }
 0xf51   :  { %v6333_v18 = vadd.f32 %v6332_v32, %v6302_v60  ;;  %v10348_v32 = vand.u32 4294901760, %v7262_v48 }
 0xf53   :  { %v6439_v59 = vpop.f32.mrf.mxu2 }
 0xf54   :  { %v6377_v63 = vpop.f32.mrf.mxu0  ;;  %v6440_v38 = vadd.f32 %v6439_v59, %v6166_v23  ;;  %v7354_v23 = vand.u32 4294901760, %v10346_v2 }
 0xf55   :  { %v6378_v58 = vadd.f32 %v6377_v63, %v6333_v18  ;;  %v6569_v3 = vpop.f32.mrf.mxu1  ;;  %v7261_v18 = vld [vmem:[%s10438_s10 + $0x18] sm:$0xff]  ;;  %v10358_v63 = vsub.f32 %v7262_v48, %v10348_v32 }
 0xf56   :  { %v6500_v45 = vpop.f32.mrf.mxu3  ;;  %v10360_v59 = vand.u32 4294901760, %v7261_v18 }
 0xf57   :  { %v6407_v35 = vadd.f32 %v6406_v11, %v6378_v58  ;;  %v6501_v29 = vadd.f32 %v6500_v45, %v6440_v38  ;;  %v7355_v38 = vsub.f32 %v10346_v2, %v7354_v23  ;;  %v7360_v45 = vand.u32 4294901760, %v10358_v63 }
 0xf59   :  { %v6646_v39 = vmax.f32 %v6407_v35, 0.0  ;;  %v7260_v35 = vld [vmem:[%s10438_s10 + $0x10] sm:$0xff] }
 0xf5b   :  { %v6711_v57 = vand.u32 4294901760, %v6646_v39 }
 0xf5c   :  { %v6538_v14 = vpop.f32.mrf.mxu0 }
 0xf5d   :  { %v6712_v10 = vsub.f32 %v6646_v39, %v6711_v57  ;;  %v6539_v61 = vadd.f32 %v6538_v14, %v6501_v29  ;;  %6817 = vmatmul.f32.vlgmr.msra.gmra.mxu1 %v6711_v57  ;;  %v6614_v27 = vpop.f32.mrf.mxu2  ;;  %v7365_v39 = vsub.f32 %v7261_v18, %v10360_v59  ;;  %v7259_v14 = vld [vmem:[%s10438_s10 + $0x8] sm:$0xff] }
 0xf5e   :  { %7237 = vmatpush.msra.mxu1 %v10122_v1 }
 0xf5f   :  { %v6713_v5 = vand.u32 4294901760, %v6712_v10  ;;  %v6570_v8 = vadd.f32 %v6569_v3, %v6539_v61  ;;  %6871 = vmatmul.f32.vlgmr.msra.gmra.mxu2 %v6712_v10  ;;  %v6643_v36 = vpop.f32.mrf.mxu3  ;;  %v7361_v61 = vsub.f32 %v10358_v63, %v7360_v45  ;;  %v7366_v3 = vand.u32 4294901760, %v7365_v39 }
 0xf60   :  { %7239 = vmatpush.msra.mxu1 %v10130_v55  ;;  %7124 = vmatpush.msra.mxu2 %v10128_v34 }
 0xf61   :  { %v6714_v40 = vsub.f32 %v6712_v10, %v6713_v5  ;;  %v6615_v62 = vadd.f32 %v6614_v27, %v6570_v8  ;;  %6910 = vmatmul.f32.vlgmr.msra.gmra.mxu3 %v6713_v5  ;;  %v7356_v10 = vand.u32 4294901760, %v7355_v38  ;;  %v10387_v8 = vand.u32 4294901760, %v7259_v14  ;;  %v7258_v27 = vld [vmem:[%s10438_s10] sm:$0xff] }
 0xf62   :  { %7241 = vmatpush.msra.mxu1 %v10140_v28  ;;  %7161 = vmatpush.msra.mxu3 %v10122_v1 }
 0xf63   :  { %v6715_v54 = vand.u32 4294901760, %v6714_v40  ;;  %v6644_v33 = vadd.f32 %v6643_v36, %v6615_v62  ;;  %7127 = vmatpush.msra.mxu2 %v10138_v26  ;;  %v7362_v40 = vand.u32 4294901760, %v7361_v61  ;;  %v7367_v62 = vsub.f32 %v7365_v39, %v7366_v3 }
 0xf64   :  { %7243 = vmatpush.msra.mxu1 %v10153_v6  ;;  %7163 = vmatpush.msra.mxu3 %v10130_v55 }
 0xf65   :  { %v6647_v21 = vmax.f32 %v6644_v33, 0.0  ;;  %6716 = vmatmul.f32.vlgmr.msra.gmra.mxu0 %v6715_v54  ;;  %7016 = vmatmul.f32.vlgmr.msrb.gmra.mxu1 %v6711_v57  ;;  %v7306_v54 = vand.u32 4294901760, %v7258_v27  ;;  %v7377_v33 = vsub.f32 %v7259_v14, %v10387_v8 }
 0xf66   :  { %7194 = vmatpush.msra.mxu0 %v7063_v31  ;;  %7245 = vmatpush.msra.mxu1 %v10167_v44 }
 0xf67   :  { %v6677_v42 = vsel %vm127_vm9, %v6647_v21, 0  ;;  %7165 = vmatpush.msra.mxu3 %v10140_v28  ;;  %7130 = vmatpush.msra.mxu2 %v10151_v53  ;;  %v7268_v28 = vld [vmem:[%s10438_s10 + $0x50] sm:$0xf]  ;;  %vm7277_vm9 = vcmask 1043456   ;;  %v7368_v21 = vand.u32 4294901760, %v7367_v62 }
 0xf68   :  { %v7044_v1 = vand.u32 4294901760, %v6677_v42  ;;  %7198 = vmatpush.msra.mxu0 %v7069_v50  ;;  %7247 = vmatpush.msra.mxu1 %v10176_v16  ;;  %v7279_v50 = vsel %vm7277_vm9, %v7268_v28, 0 }
 0xf69   :  { %7167 = vmatpush.msra.mxu3 %v10153_v6  ;;  %7133 = vmatpush.msra.mxu2 %v10164_v47  ;;  %v10270_v53 = vand.u32 4294901760, %v7279_v50  ;;  %v7267_v6 = vld [vmem:[%s10438_s10 + $0x48] sm:$0xff] }
 0xf6a   :  { %v7045_v34 = vsub.f32 %v6677_v42, %v7044_v1  ;;  %7110 = vmatmul.f32.vlgmr.msrb.gmra.mxu3 %v7044_v1  ;;  %7202 = vmatpush.msra.mxu0 %v7075_v49  ;;  %v10278_v47 = vand.u32 4294901760, %v7267_v6 }
 0xf6b   :  { %7249 = vmatpush.msra.mxu1 %v10191_v22  ;;  %7169 = vmatpush.msra.mxu3 %v10167_v44  ;;  %v10276_v49 = vsub.f32 %v7279_v50, %v10270_v53  ;;  %v7266_v44 = vld [vmem:[%s10438_s10 + $0x40] sm:$0xff] }
 0xf6c   :  { %v7046_v55 = vand.u32 4294901760, %v7045_v34  ;;  %7206 = vmatpush.msra.mxu0 %v7081_v20  ;;  %7136 = vmatpush.msra.mxu2 %v10179_v13  ;;  %v10289_v13 = vand.u32 4294901760, %v7266_v44 }
 0xf6d   :  { %7251 = vmatpush.msra.mxu1 %v10202_v25  ;;  %6979 = vmatmul.f32.vlgmr.msrb.gmra.mxu0 %v6711_v57  ;;  %v7324_v20 = vand.u32 4294901760, %v10276_v49  ;;  %v10376_v57 = vand.u32 4294901760, %v7260_v35 }
 0xf6e   :  { %v7047_v31 = vsub.f32 %v7045_v34, %v7046_v55  ;;  %7171 = vmatpush.msra.mxu3 %v10176_v16  ;;  %7253 = vmatmul.f32.vlgmr.msra.gmra.mxu1 %v7044_v1  ;;  %v10287_v16 = vsub.f32 %v7267_v6, %v10278_v47 }
 0xf6f   :  { %7210 = vmatpush.msra.mxu0 %v7087_v43  ;;  %7139 = vmatpush.msra.mxu2 %v10189_v30  ;;  %v7265_v30 = vld [vmem:[%s10438_s10 + $0x38] sm:$0xff]  ;;  %v7371_v5 = vsub.f32 %v7260_v35, %v10376_v57 }
 0xf70   :  { %v7048_v26 = vand.u32 4294901760, %v7047_v31  ;;  %7173 = vmatpush.msra.mxu3 %v10191_v22  ;;  %7443 = vmatpush.msrb.mxu1 %v10270_v53  ;;  %v7325_v22 = vsub.f32 %v10276_v49, %v7324_v20  ;;  %v7330_v43 = vand.u32 4294901760, %v10287_v16 }
 0xf71   :  { %7214 = vmatpush.msra.mxu0 %v7093_v7  ;;  %7142 = vmatpush.msra.mxu2 %v10200_v0  ;;  %v10302_v7 = vsub.f32 %v7266_v44, %v10289_v13  ;;  %v10304_v0 = vand.u32 4294901760, %v7265_v30  ;;  %v7372_v36 = vand.u32 4294901760, %v7371_v5 }
 0xf72   :  { %7175 = vmatpush.msra.mxu3 %v10202_v25  ;;  %7049 = vmatmul.f32.vlgmr.msrb.gmra.mxu2 %v7048_v26  ;;  %v7264_v25 = vld [vmem:[%s10438_s10 + $0x30] sm:$0xff] }
 0xf73   :  { %7179 = vmatmul.f32.vlgmr.msra.gmra.mxu3 %v7046_v55  ;;  %7218 = vmatpush.msra.mxu0 %v7099_v24  ;;  %v7326_v24 = vand.u32 4294901760, %v7325_v22  ;;  %v7336_v12 = vand.u32 4294901760, %v10302_v7  ;;  %v10317_v15 = vsub.f32 %v7265_v30, %v10304_v0  ;;  %v7373_v42 = vsub.f32 %v7371_v5, %v7372_v36 }
 0xf74   :  { %7145 = vmatpush.msra.mxu2 %v10213_v17  ;;  %7445 = vmatpush.msrb.mxu1 %v10278_v47  ;;  %v7331_v17 = vsub.f32 %v10287_v16, %v7330_v43 }
 0xf75   :  { %7222 = vmatpush.msra.mxu0 %v7105_v4  ;;  %v10321_v4 = vand.u32 4294901760, %v7264_v25  ;;  %7327 = vmatpush.msrb.mxu3 %v7326_v24  ;;  %v7337_v9 = vsub.f32 %v10302_v7, %v7336_v12  ;;  %v7342_v52 = vand.u32 4294901760, %v10317_v15  ;;  %v7374_v55 = vand.u32 4294901760, %v7373_v42 }
 0xf76   :  { %7224 = vmatmul.f32.vlgmr.msra.gmra.mxu0 %v7044_v1  ;;  %7287 = vmatpush.msrb.mxu2 %v10270_v53  ;;  %v7332_v19 = vand.u32 4294901760, %v7331_v17  ;;  %v7383_v1 = vsub.f32 %v7258_v27, %v7306_v54 }
 0xf77   :  { %7400 = vmatpush.msrb.mxu0 %v10276_v49  ;;  %7447 = vmatpush.msrb.mxu1 %v10289_v13  ;;  %v10335_v46 = vsub.f32 %v7264_v25, %v10321_v4  ;;  %v7338_v41 = vand.u32 4294901760, %v7337_v9  ;;  %v7343_v37 = vsub.f32 %v10317_v15, %v7342_v52  ;;  %v7607_v49 = vld [vmem:[%s10437_s9] ss:$0 sm:$0xff] }
 0xf78   :  { %7289 = vmatpush.msrb.mxu2 %v10278_v47  ;;  %7333 = vmatpush.msrb.mxu3 %v7332_v19  ;;  %v7384_v31 = vand.u32 4294901760, %v7383_v1 }
 0xf79   :  { %7403 = vmatpush.msrb.mxu0 %v10287_v16  ;;  %7449 = vmatpush.msrb.mxu1 %v10304_v0  ;;  %v7348_v60 = vand.u32 4294901760, %v10335_v46  ;;  %v7344_v11 = vand.u32 4294901760, %v7343_v37 }
 0xf7a   :  { %7148 = vmatmul.f32.vlgmr.msra.gmra.mxu2 %v7045_v34  ;;  %7339 = vmatpush.msrb.mxu3 %v7338_v41  ;;  %v7378_v34 = vand.u32 4294901760, %v7377_v33  ;;  %v7385_v28 = vsub.f32 %v7383_v1, %v7384_v31 }
 0xf7b   :  { %7291 = vmatpush.msrb.mxu2 %v10289_v13  ;;  %7406 = vmatpush.msrb.mxu0 %v10302_v7  ;;  %v7349_v58 = vsub.f32 %v10335_v46, %v7348_v60 }
 0xf7c   :  { %7451 = vmatpush.msrb.mxu1 %v10321_v4  ;;  %7345 = vmatpush.msrb.mxu3 %v7344_v11  ;;  %v7379_v26 = vsub.f32 %v7377_v33, %v7378_v34  ;;  %v7386_v6 = vand.u32 4294901760, %v7385_v28 }
 0xf7d   :  { %7293 = vmatpush.msrb.mxu2 %v10304_v0  ;;  %7409 = vmatpush.msrb.mxu0 %v10317_v15  ;;  %v7350_v29 = vand.u32 4294901760, %v7349_v58 }
 0xf7e   :  { %7453 = vmatpush.msrb.mxu1 %v10331_v56  ;;  %v7380_v50 = vand.u32 4294901760, %v7379_v26 }
 0xf7f   :  { %7295 = vmatpush.msrb.mxu2 %v10321_v4  ;;  %7412 = vmatpush.msrb.mxu0 %v10335_v46 }
 0xf80   :  { %7455 = vmatpush.msrb.mxu1 %v10348_v32  ;;  %7351 = vmatpush.msrb.mxu3 %v7350_v29 }
 0xf81   :  { %7297 = vmatpush.msrb.mxu2 %v10331_v56  ;;  %7415 = vmatpush.msrb.mxu0 %v10346_v2 }
 0xf82   :  { %7457 = vmatpush.msrb.mxu1 %v10360_v59  ;;  %7357 = vmatpush.msrb.mxu3 %v7356_v10 }
 0xf83   :  { %7299 = vmatpush.msrb.mxu2 %v10348_v32  ;;  %7418 = vmatpush.msrb.mxu0 %v10358_v63 }
 0xf84   :  { %7459 = vmatpush.msrb.mxu1 %v10376_v57  ;;  %7363 = vmatpush.msrb.mxu3 %v7362_v40 }
 0xf85   :  { %7301 = vmatpush.msrb.mxu2 %v10360_v59  ;;  %7421 = vmatpush.msrb.mxu0 %v7365_v39 }
 0xf86   :  { %7461 = vmatpush.msrb.mxu1 %v10387_v8  ;;  %7369 = vmatpush.msrb.mxu3 %v7368_v21 }
 0xf87   :  { %7303 = vmatpush.msrb.mxu2 %v10376_v57  ;;  %7424 = vmatpush.msrb.mxu0 %v7371_v5 }
 0xf88   :  { %7463 = vmatpush.msrb.mxu1 %v7306_v54  ;;  %7375 = vmatpush.msrb.mxu3 %v7374_v55 }
 0xf89   :  { %7305 = vmatpush.msrb.mxu2 %v10387_v8  ;;  %7427 = vmatpush.msrb.mxu0 %v7377_v33 }
 0xf8a   :  { %7381 = vmatpush.msrb.mxu3 %v7380_v50 }
 0xf8b   :  { %7307 = vmatpush.msrb.mxu2 %v7306_v54  ;;  %7430 = vmatpush.msrb.mxu0 %v7383_v1 }
 0xf8c   :  { %7387 = vmatpush.msrb.mxu3 %v7386_v6 }
 0xf8d   :  { %7479 = vmatpush.msra.mxu2 %v7324_v20 }
 0xf8e   :  { %7531 = vmatpush.msra.mxu3 %v10270_v53 }
 0xf8f   :  { %7483 = vmatpush.msra.mxu2 %v7330_v43 }
 0xf90   :  { %7533 = vmatpush.msra.mxu3 %v10278_v47 }
 0xf91   :  { %7487 = vmatpush.msra.mxu2 %v7336_v12 }
 0xf92   :  { %7535 = vmatpush.msra.mxu3 %v10289_v13 }
 0xf93   :  { %7491 = vmatpush.msra.mxu2 %v7342_v52 }
 0xf94   :  { %7537 = vmatpush.msra.mxu3 %v10304_v0 }
 0xf95   :  { %7495 = vmatpush.msra.mxu2 %v7348_v60 }
 0xf96   :  { %7539 = vmatpush.msra.mxu3 %v10321_v4 }
 0xf97   :  { %7499 = vmatpush.msra.mxu2 %v7354_v23  ;;  %v7608_v23 = vld [vmem:[%s10439_s11] ss:$0 sm:$0xff] }
 0xf98   :  { %7541 = vmatpush.msra.mxu3 %v10331_v56 }
 0xf99   :  { %7503 = vmatpush.msra.mxu2 %v7360_v45 }
 0xf9a   :  { %7543 = vmatpush.msra.mxu3 %v10348_v32 }
 0xf9b   :  { %7507 = vmatpush.msra.mxu2 %v7366_v3 }
 0xf9c   :  { %7545 = vmatpush.msra.mxu3 %v10360_v59 }
 0xf9d   :  { %7511 = vmatpush.msra.mxu2 %v7372_v36 }
 0xf9e   :  { %7547 = vmatpush.msra.mxu3 %v10376_v57 }
 0xf9f   :  { %7515 = vmatpush.msra.mxu2 %v7378_v34 }
 0xfa0   :  { %7549 = vmatpush.msra.mxu3 %v10387_v8 }
 0xfa1   :  { %7519 = vmatpush.msra.mxu2 %v7384_v31 }
 0xfa2   :  { %7551 = vmatpush.msra.mxu3 %v7306_v54 }
 0xfda   :  { %v6818_v16 = vpop.f32.mrf.mxu1 }
 0xfe2   :  { %v6717_v44 = vpop.f32.mrf.mxu0  ;;  %v6872_v53 = vpop.f32.mrf.mxu2 }
 0xfe3   :  { %v6718_v20 = vadd.f32 %v7607_v49, %v6717_v44  ;;  %v7017_v0 = vpop.f32.mrf.mxu1 }
 0xfe4   :  { %v6911_v47 = vpop.f32.mrf.mxu3 }
 0xfe5   :  { %v6819_v30 = vadd.f32 %v6818_v16, %v6718_v20 }
 0xfe7   :  { %v6873_v22 = vadd.f32 %v6872_v53, %v6819_v30 }
 0xfe9   :  { %v6912_v43 = vadd.f32 %v6911_v47, %v6873_v22 }
 0xfea   :  { %v6980_v13 = vpop.f32.mrf.mxu0 }
 0xfeb   :  { %v6981_v7 = vadd.f32 %v6980_v13, %v6912_v43  ;;  %v7254_v46 = vpop.f32.mrf.mxu1 }
 0xfed   :  { %v7111_v25 = vpop.f32.mrf.mxu3  ;;  %v7018_v17 = vadd.f32 %v7017_v0, %v6981_v7 }
 0xff3   :  { %v7225_v52 = vpop.f32.mrf.mxu0 }
 0xff5   :  { %v7050_v24 = vpop.f32.mrf.mxu2 }
 0xff6   :  { %v7051_v12 = vadd.f32 %v7050_v24, %v7018_v17  ;;  %v7180_v19 = vpop.f32.mrf.mxu3 }
 0xff8   :  { %v7112_v15 = vadd.f32 %v7111_v25, %v7051_v12 }
 0xffd   :  { %v7149_v4 = vpop.f32.mrf.mxu2 }
 0xffe   :  { %v7150_v51 = vadd.f32 %v7149_v4, %v7112_v15 }
0x1000   :  { %v7181_v9 = vadd.f32 %v7180_v19, %v7150_v51 }
0x1002   :  { %v7226_v56 = vadd.f32 %v7225_v52, %v7181_v9 }
0x1004   :  { %v7255_v48 = vadd.f32 %v7254_v46, %v7226_v56 }
0x1006   :  { %v7257_v41 = vmax.f32 %v7255_v48, 0.0 }
0x1008   :  { %v7275_v37 = vsel %vm7273_vm6, %v7257_v41, 0 }
0x1009   :  { %v7308_v2 = vand.u32 4294901760, %v7275_v37 }
0x100b   :  { %v7309_v32 = vsub.f32 %v7275_v37, %v7308_v2  ;;  %7389 = vmatmul.f32.vlgmr.msrb.gmra.mxu3 %v7308_v2 }
0x100d   :  { %7433 = vmatmul.f32.vlgmr.msrb.gmra.mxu0 %v7309_v32  ;;  %v7310_v60 = vand.u32 4294901760, %v7309_v32 }
0x100f   :  { %7467 = vmatmul.f32.vlgmr.msrb.gmra.mxu1 %v7310_v60  ;;  %v7311_v18 = vsub.f32 %v7309_v32, %v7310_v60 }
0x1011   :  { %v7312_v11 = vand.u32 4294901760, %v7311_v18 }
0x1013   :  { %7313 = vmatmul.f32.vlgmr.msrb.gmra.mxu2 %v7312_v11  ;;  %7553 = vmatmul.f32.vlgmr.msra.gmra.mxu3 %v7308_v2 }
0x101b   :  { %7521 = vmatmul.f32.vlgmr.msra.gmra.mxu2 %v7308_v2 }
0x108a   :  { %v7434_v38 = vpop.f32.mrf.mxu0 }
0x108c   :  { %v7468_v39 = vpop.f32.mrf.mxu1 }
0x108e   :  { %v7390_v63 = vpop.f32.mrf.mxu3 }
0x1096   :  { %v7314_v59 = vpop.f32.mrf.mxu2  ;;  %v7554_v10 = vpop.f32.mrf.mxu3 }
0x1097   :  { %v7315_v58 = vadd.f32 %v7608_v23, %v7314_v59 }
0x1099   :  { %v7391_v35 = vadd.f32 %v7390_v63, %v7315_v58 }
0x109b   :  { %v7435_v45 = vadd.f32 %v7434_v38, %v7391_v35 }
0x109d   :  { %v7469_v57 = vadd.f32 %v7468_v39, %v7435_v45 }
0x109e   :  { %v7522_v29 = vpop.f32.mrf.mxu2 }
0x109f   :  { %v7523_v14 = vadd.f32 %v7522_v29, %v7469_v57 }
0x10a1   :  { %v7555_v61 = vadd.f32 %v7554_v10, %v7523_v14 }
0x10a3   :  { %7558 = vst.msk [vmem:[#allocation4] sm:$0x3] %vm7557_vm7, %v7555_v61 }
0x10a4   :  { %7569 = dma.vmem_to_hbm [thread:$0]  %s7565_s8, 32, %s7567_s18, [#allocation5]  }
0x10a5   :  { %7779 = dma.done.wait [#allocation5], 32  }
0x10a6   :  { %7780 = vsyncadd [#allocation5], 4294967264 }
0x10a7   :  { %7574 = vsyncpa [#allocation5], 1 }

</bundles_post_ra>
